<compile_context>
chip_gen: v5e
topology: v5e:2x2
jax: 0.10.0
libtpu: 0.0.40
codegen_flags: <defaults>
</compile_context>

<pallas_src>
import functools
import math

import jax
import jax.numpy as jnp
from jax.experimental import pallas as pl
from jax.experimental.pallas import tpu as pltpu

# Explicit scoped-VMEM budget (default is only 16/32/32 MiB on v5e/v6e/v7x).
# 48 MiB leaves headroom under v7x's 64 MiB physical VMEM; can be raised
# toward ~100 MiB on v5e/v6e if tiles grow.
# TODO(synk): re-derive tile caps + vmem limit per generation via get_tpu_info.
_VMEM_LIMIT = 48 * 1024 * 1024


# -----------------------------------------------------------------------------
# Tiling helper
# -----------------------------------------------------------------------------
def _pick_tile(dim, cap, align):
    """Largest multiple of `align` <= cap that evenly divides dim, else dim.

    Note: the full-dim fallback can create a single huge block for awkward
    shapes (VMEM blow-up) — acceptable for the model dims used here.
    At realistic power-of-two dims the picks land on 256-multiples, which
    fills the 256x256 MXUs on v6e/v7x."""
    if dim <= cap:
        return dim
    t = (cap // align) * align
    while t >= align:
        if dim % t == 0:
            return t
        t -= align
    return dim


# -----------------------------------------------------------------------------
# Tiled linear (GEMM + bias [+ ReLU]); bf16 operands, f32 accumulator
# -----------------------------------------------------------------------------
def _linear_kernel(x_ref, w_ref, b_ref, o_ref, acc_ref, *, relu, n_k):
    k = pl.program_id(2)

    @pl.when(k == 0)
    def _init():
        acc_ref[...] = jnp.zeros_like(acc_ref)

    acc_ref[...] += jnp.dot(x_ref[...].astype(jnp.bfloat16),
                            w_ref[...].astype(jnp.bfloat16),
                            preferred_element_type=jnp.float32)

    @pl.when(k == n_k - 1)
    def _epilogue():
        y = acc_ref[...] + b_ref[...]
        if relu:
            y = jnp.maximum(y, 0.0)
        o_ref[...] = y.astype(o_ref.dtype)


def linear(x, w, b, relu=False, out_dtype=jnp.bfloat16,
           tm_cap=256, tn_cap=256, tk_cap=512):
    """x: [M, K], w: [K, N] (bf16), b: [N] (f32) -> [M, N] (out_dtype)."""
    M, K = x.shape
    N = w.shape[1]
    tm = _pick_tile(M, tm_cap, 8)
    tn = _pick_tile(N, tn_cap, 128)
    tk = _pick_tile(K, tk_cap, 128)
    n_k = K // tk
    kern = functools.partial(_linear_kernel, relu=relu, n_k=n_k)
    return pl.pallas_call(
        kern,
        out_shape=jax.ShapeDtypeStruct((M, N), out_dtype),
        grid=(M // tm, N // tn, n_k),
        in_specs=[
            pl.BlockSpec((tm, tk), lambda i, j, k: (i, k)),
            pl.BlockSpec((tk, tn), lambda i, j, k: (k, j)),
            pl.BlockSpec((1, tn), lambda i, j, k: (0, j)),
        ],
        out_specs=pl.BlockSpec((tm, tn), lambda i, j, k: (i, j)),
        scratch_shapes=[pltpu.VMEM((tm, tn), jnp.float32)],
        compiler_params=pltpu.CompilerParams(
            dimension_semantics=("parallel", "parallel", "arbitrary"),
            vmem_limit_bytes=_VMEM_LIMIT),
    )(x, w, b.reshape(1, N))


# -----------------------------------------------------------------------------
# Attention: grid (B, Sq-tiles); heads split in-kernel; lane-dense stores
# -----------------------------------------------------------------------------
def _attention_kernel(q_ref, k_ref, v_ref, m_ref, o_ref, w_ref,
                      *, num_heads, scale):
    q = q_ref[0]            # [tq, D] bf16
    k = k_ref[0]            # [Sk, D] bf16
    v = v_ref[0]            # [Sk, D] bf16
    # Mask bias computed ONCE per grid step (hoisted out of the head loop),
    # kept in f32; compact mask broadcasts in-VMEM.
    mbias = m_ref[0, 0].astype(jnp.float32) * (-1e9)   # [tq or 1, Sk]
    dh = q.shape[-1] // num_heads
    ctx_heads = []
    # Static head loop: for realistic dims (dh >= 128) these are full-lane
    # slices; at small dh they stay within one vreg.  All HBM stores below
    # are full-lane-width (Sk for weights, D for the context).
    for h in range(num_heads):
        lo = h * dh
        qh = q[:, lo:lo + dh]
        kh = k[:, lo:lo + dh]
        vh = v[:, lo:lo + dh]
        # contract last dims directly (no explicit K transpose); f32 logits
        s = jax.lax.dot_general(
            qh, kh, (((1,), (1,)), ((), ())),
            preferred_element_type=jnp.float32) * scale
        s = s + mbias
        s_max = jnp.max(s, axis=-1, keepdims=True)
        e = jnp.exp(s - s_max)
        denom = jnp.sum(e, axis=-1, keepdims=True)
        p = e * pl.reciprocal(denom, approx=True)       # EUP slot, ~free
        w_ref[0, h] = p                                 # [tq, Sk] lane-dense
        ctx_heads.append(jnp.dot(p.astype(v.dtype), vh,
                                 preferred_element_type=jnp.float32))
    # Single full-width [tq, D] store (no per-head masked stores).
    o_ref[0] = jnp.concatenate(ctx_heads, axis=-1).astype(o_ref.dtype)


def attention(q_src, q_sel, k_src, k_sel, v_src, v_sel, mask, num_heads,
              d_model, tq_cap=512):
    """q_src: [B,Sq,nq*D], k_src/v_src: [B,Sk,nk*D]; *_sel selects the D-wide
    block along the fused last axis (so fused QKV/KV projections are consumed
    in place, without materializing q/k/v slices in HBM).

    mask: compact [Bm,1,Sm,Sk] with Bm in {1,B}, Sm in {1,Sq}; value 1 = masked.
    Returns (context [B,Sq,D] bf16 lane-dense, attn_weights [B,H,Sq,Sk] f32).
    """
    B, Sq = q_src.shape[0], q_src.shape[1]
    Sk = k_src.shape[1]
    D = d_model
    H = num_heads
    tq = _pick_tile(Sq, tq_cap, 8)
    nq = Sq // tq

    Bm, _, Sm, Skm = mask.shape
    assert Skm == Sk and Bm in (1, B) and Sm in (1, Sq)
    bs_m = tq if Sm == Sq else 1
    mask_f = mask.astype(jnp.float32)

    scale = 1.0 / math.sqrt(float(D // H))
    kern = functools.partial(_attention_kernel, num_heads=H, scale=scale)

    q_map = lambda b, i, s=q_sel: (b, i, s)
    k_map = lambda b, i, s=k_sel: (b, 0, s)
    v_map = lambda b, i, s=v_sel: (b, 0, s)
    if Bm > 1 and Sm > 1:
        m_map = lambda b, i: (b, 0, i, 0)
    elif Bm > 1:
        m_map = lambda b, i: (b, 0, 0, 0)
    elif Sm > 1:
        m_map = lambda b, i: (0, 0, i, 0)
    else:
        m_map = lambda b, i: (0, 0, 0, 0)

    # TODO(synk): attention weights stay f32 because the module returns them;
    # emit bf16 (or drop the output) when the caller does not need them.
    ctx, w = pl.pallas_call(
        kern,
        out_shape=(
            jax.ShapeDtypeStruct((B, Sq, D), jnp.bfloat16),
            jax.ShapeDtypeStruct((B, H, Sq, Sk), jnp.float32),
        ),
        grid=(B, nq),
        in_specs=[
            pl.BlockSpec((1, tq, D), q_map),
            pl.BlockSpec((1, Sk, D), k_map),
            pl.BlockSpec((1, Sk, D), v_map),
            pl.BlockSpec((1, 1, bs_m, Sk), m_map),
        ],
        out_specs=(
            pl.BlockSpec((1, tq, D), lambda b, i: (b, i, 0)),
            pl.BlockSpec((1, H, tq, Sk), lambda b, i: (b, 0, i, 0)),
        ),
        compiler_params=pltpu.CompilerParams(
            dimension_semantics=("parallel", "parallel"),
            vmem_limit_bytes=_VMEM_LIMIT),
    )(q_src, k_src, v_src, mask_f)
    return ctx, w


# -----------------------------------------------------------------------------
# Fused: GEMM (+bias) + residual add + LayerNorm    (attention output path)
# -----------------------------------------------------------------------------
def _linear_add_ln_kernel(x_ref, w_ref, b_ref, r_ref, g_ref, be_ref, o_ref,
                          acc_ref, *, n_k, eps):
    k = pl.program_id(1)

    @pl.when(k == 0)
    def _init():
        acc_ref[...] = jnp.zeros_like(acc_ref)

    acc_ref[...] += jnp.dot(x_ref[...].astype(jnp.bfloat16),
                            w_ref[...].astype(jnp.bfloat16),
                            preferred_element_type=jnp.float32)

    @pl.when(k == n_k - 1)
    def _epilogue():
        # residual add + LayerNorm statistics in f32
        y = acc_ref[...] + b_ref[...] + r_ref[...].astype(jnp.float32)
        mean = jnp.mean(y, axis=-1, keepdims=True)
        var = jnp.mean(jnp.square(y - mean), axis=-1, keepdims=True)
        norm = (y - mean) * jax.lax.rsqrt(var + eps)
        o_ref[...] = (norm * g_ref[...] + be_ref[...]).astype(o_ref.dtype)


def linear_add_layernorm(x, w, b, residual, gamma, beta, eps=1e-6,
                         out_dtype=jnp.bfloat16, tm_cap=256, tk_cap=512):
    """LayerNorm(x @ w + b + residual).  x: [M,K], w: [K,D], residual: [M,D]."""
    # TODO(synk): for very large D on v7x, split D with a two-pass LayerNorm
    # instead of keeping full-D residual/weight blocks resident.
    M, K = x.shape
    D = w.shape[1]
    tm = _pick_tile(M, tm_cap, 8)
    tk = _pick_tile(K, tk_cap, 128)
    n_k = K // tk
    kern = functools.partial(_linear_add_ln_kernel, n_k=n_k, eps=eps)
    return pl.pallas_call(
        kern,
        out_shape=jax.ShapeDtypeStruct((M, D), out_dtype),
        grid=(M // tm, n_k),
        in_specs=[
            pl.BlockSpec((tm, tk), lambda i, k: (i, k)),
            pl.BlockSpec((tk, D), lambda i, k: (k, 0)),
            pl.BlockSpec((1, D), lambda i, k: (0, 0)),
            pl.BlockSpec((tm, D), lambda i, k: (i, 0)),
            pl.BlockSpec((1, D), lambda i, k: (0, 0)),
            pl.BlockSpec((1, D), lambda i, k: (0, 0)),
        ],
        out_specs=pl.BlockSpec((tm, D), lambda i, k: (i, 0)),
        scratch_shapes=[pltpu.VMEM((tm, D), jnp.float32)],
        compiler_params=pltpu.CompilerParams(
            dimension_semantics=("parallel", "arbitrary"),
            vmem_limit_bytes=_VMEM_LIMIT),
    )(x, w, b.reshape(1, D), residual, gamma.reshape(1, D),
      beta.reshape(1, D))


# -----------------------------------------------------------------------------
# Fused FFN: Linear1 + ReLU + Linear2 + residual + LayerNorm, F-tiled reduction
# -----------------------------------------------------------------------------
def _ffn_add_ln_kernel(x_ref, w1_ref, b1_ref, w2_ref, b2_ref, g_ref, be_ref,
                       o_ref, acc_ref, *, n_f, eps):
    f = pl.program_id(1)

    @pl.when(f == 0)
    def _init():
        acc_ref[...] = jnp.zeros_like(acc_ref)

    xb = x_ref[...].astype(jnp.bfloat16)
    h = jnp.dot(xb, w1_ref[...].astype(jnp.bfloat16),
                preferred_element_type=jnp.float32)
    h = jnp.maximum(h + b1_ref[...], 0.0).astype(jnp.bfloat16)  # [tm, tf]
    acc_ref[...] += jnp.dot(h, w2_ref[...].astype(jnp.bfloat16),
                            preferred_element_type=jnp.float32)

    @pl.when(f == n_f - 1)
    def _epilogue():
        y = acc_ref[...] + b2_ref[...] + x_ref[...].astype(jnp.float32)
        mean = jnp.mean(y, axis=-1, keepdims=True)
        var = jnp.mean(jnp.square(y - mean), axis=-1, keepdims=True)
        norm = (y - mean) * jax.lax.rsqrt(var + eps)
        o_ref[...] = (norm * g_ref[...] + be_ref[...]).astype(o_ref.dtype)


def ffn_add_layernorm(x, w1, b1, w2, b2, gamma, beta, eps=1e-6,
                      out_dtype=jnp.float32, tm_cap=256, tf_cap=512):
    """LayerNorm(Linear2(ReLU(Linear1(x))) + x).  x: [M, D].

    The hidden dim F is tiled (reduction grid axis) so only [D,tf]/[tf,D]
    weight tiles and a [tm,tf] hidden slab live in VMEM — fits v7x's 64 MiB."""
    M, D = x.shape
    F = w1.shape[1]
    tm = _pick_tile(M, tm_cap, 8)
    tf = _pick_tile(F, tf_cap, 128)
    n_f = F // tf
    kern = functools.partial(_ffn_add_ln_kernel, n_f=n_f, eps=eps)
    return pl.pallas_call(
        kern,
        out_shape=jax.ShapeDtypeStruct((M, D), out_dtype),
        grid=(M // tm, n_f),
        in_specs=[
            pl.BlockSpec((tm, D), lambda i, f: (i, 0)),
            pl.BlockSpec((D, tf), lambda i, f: (0, f)),
            pl.BlockSpec((1, tf), lambda i, f: (0, f)),
            pl.BlockSpec((tf, D), lambda i, f: (f, 0)),
            pl.BlockSpec((1, D), lambda i, f: (0, 0)),
            pl.BlockSpec((1, D), lambda i, f: (0, 0)),
            pl.BlockSpec((1, D), lambda i, f: (0, 0)),
        ],
        out_specs=pl.BlockSpec((tm, D), lambda i, f: (i, 0)),
        scratch_shapes=[pltpu.VMEM((tm, D), jnp.float32)],
        compiler_params=pltpu.CompilerParams(
            dimension_semantics=("parallel", "arbitrary"),
            vmem_limit_bytes=_VMEM_LIMIT),
    )(x, w1, b1.reshape(1, F), w2, b2.reshape(1, D),
      gamma.reshape(1, D), beta.reshape(1, D))


# -----------------------------------------------------------------------------
# Module glue
# -----------------------------------------------------------------------------
def mha_self_block(p, ln, x, mask, num_heads):
    """Masked self-attention + residual + LayerNorm (dropout = identity)."""
    B, S, D = x.shape
    qkv = linear(x.reshape(-1, D), p["w_qkv"], p["b_qkv"],
                 out_dtype=jnp.bfloat16).reshape(B, S, 3 * D)
    if D % 128 == 0:
        # q/k/v never sliced in HBM: index_map picks block 0/1/2 of qkv.
        ctx, w = attention(qkv, 0, qkv, 1, qkv, 2, mask, num_heads, D)
    else:
        # TODO(synk): lane-unaligned D falls back to materialized slices.
        qp, kp, vp = qkv[..., :D], qkv[..., D:2 * D], qkv[..., 2 * D:]
        ctx, w = attention(qp, 0, kp, 0, vp, 0, mask, num_heads, D)
    out = linear_add_layernorm(
        ctx.reshape(-1, D), p["wo"], p["bo"], x.reshape(-1, D),
        ln["gamma"], ln["beta"], out_dtype=jnp.bfloat16).reshape(B, S, D)
    return out, w


def mha_cross_block(p, ln, q_in, enc, mask, num_heads):
    """Cross-attention (k=v=enc_output, q=out1) + residual + LayerNorm."""
    B, Sq, D = q_in.shape
    Sk = enc.shape[1]
    kv = linear(enc.reshape(-1, D), p["w_kv"], p["b_kv"],
                out_dtype=jnp.bfloat16).reshape(B, Sk, 2 * D)
    qp = linear(q_in.reshape(-1, D), p["w_q"], p["b_q"],
                out_dtype=jnp.bfloat16).reshape(B, Sq, D)
    if D % 128 == 0:
        ctx, w = attention(qp, 0, kv, 0, kv, 1, mask, num_heads, D)
    else:
        kp, vp = kv[..., :D], kv[..., D:]
        ctx, w = attention(qp, 0, kp, 0, vp, 0, mask, num_heads, D)
    out = linear_add_layernorm(
        ctx.reshape(-1, D), p["wo"], p["bo"], q_in.reshape(-1, D),
        ln["gamma"], ln["beta"], out_dtype=jnp.bfloat16).reshape(B, Sq, D)
    return out, w


def decoder_layer(params, x, enc_output, look_ahead_mask, padding_mask,
                  num_heads):
    B, S, D = x.shape
    # Block 1: masked self-attention + LN1 (dropout1 = identity)
    out1, w1 = mha_self_block(params["mha1"], params["ln1"], x,
                              look_ahead_mask, num_heads)
    # Block 2: cross-attention over encoder output + LN2 (dropout2 = identity)
    out2, w2 = mha_cross_block(params["mha2"], params["ln2"], out1,
                               enc_output, padding_mask, num_heads)
    # Block 3: fused F-tiled FFN + LN3 (dropout3 = identity); final output f32
    out3 = ffn_add_layernorm(
        out2.reshape(-1, D),
        params["ffn"]["w1"], params["ffn"]["b1"],
        params["ffn"]["w2"], params["ffn"]["b2"],
        params["ln3"]["gamma"], params["ln3"]["beta"],
        out_dtype=jnp.float32).reshape(B, S, D)
    return out3, w1, w2


# -----------------------------------------------------------------------------
# Parameter init + one-time preprocessing (fusing + bf16 cast of GEMM weights)
# -----------------------------------------------------------------------------
def _init_raw_mha(key, d):
    ks = jax.random.split(key, 4)
    s = 1.0 / math.sqrt(d)
    return {
        "wq": jax.random.normal(ks[0], (d, d), jnp.float32) * s,
        "bq": jnp.zeros((d,), jnp.float32),
        "wk": jax.random.normal(ks[1], (d, d), jnp.float32) * s,
        "bk": jnp.zeros((d,), jnp.float32),
        "wv": jax.random.normal(ks[2], (d, d), jnp.float32) * s,
        "bv": jnp.zeros((d,), jnp.float32),
        "wo": jax.random.normal(ks[3], (d, d), jnp.float32) * s,
        "bo": jnp.zeros((d,), jnp.float32),
    }


def _fuse_mha_params(m):
    """Pre-concatenate Q/K/V projections and cast GEMM weights to bf16 ONCE at
    setup (no per-forward jnp.concatenate).  Biases / LN params stay f32."""
    return {
        "w_qkv": jnp.concatenate([m["wq"], m["wk"], m["wv"]],
                                 axis=1).astype(jnp.bfloat16),
        "b_qkv": jnp.concatenate([m["bq"], m["bk"], m["bv"]], axis=0),
        "w_kv": jnp.concatenate([m["wk"], m["wv"]],
                                axis=1).astype(jnp.bfloat16),
        "b_kv": jnp.concatenate([m["bk"], m["bv"]], axis=0),
        "w_q": m["wq"].astype(jnp.bfloat16),
        "b_q": m["bq"],
        "wo": m["wo"].astype(jnp.bfloat16),
        "bo": m["bo"],
    }


def init_params(key, model_dim, feedforward_dim):
    k1, k2, k3, k4 = jax.random.split(key, 4)
    ln = lambda: {"gamma": jnp.ones((model_dim,), jnp.float32),
                  "beta": jnp.zeros((model_dim,), jnp.float32)}
    return {
        "mha1": _fuse_mha_params(_init_raw_mha(k1, model_dim)),
        "mha2": _fuse_mha_params(_init_raw_mha(k2, model_dim)),
        "ffn": {
            "w1": (jax.random.normal(k3, (model_dim, feedforward_dim),
                                     jnp.float32)
                   / math.sqrt(model_dim)).astype(jnp.bfloat16),
            "b1": jnp.zeros((feedforward_dim,), jnp.float32),
            "w2": (jax.random.normal(k4, (feedforward_dim, model_dim),
                                     jnp.float32)
                   / math.sqrt(feedforward_dim)).astype(jnp.bfloat16),
            "b2": jnp.zeros((model_dim,), jnp.float32),
        },
        "ln1": ln(), "ln2": ln(), "ln3": ln(),
    }


# -----------------------------------------------------------------------------
if __name__ == "__main__":
    model_dim, num_heads, feedforward_dim = 128, 4, 256
    B, S_dec, S_enc = 2, 8, 16

    key = jax.random.PRNGKey(0)
    kp, kx, ke = jax.random.split(key, 3)
    params = init_params(kp, model_dim, feedforward_dim)

    x = jax.random.normal(kx, (B, S_dec, model_dim), jnp.float32)
    enc_output = jax.random.normal(ke, (B, S_enc, model_dim), jnp.float32)

    # look-ahead mask: 1 = masked (upper triangular, no peeking ahead); compact
    look_ahead_mask = (
        1.0 - jnp.tril(jnp.ones((S_dec, S_dec), jnp.float32))
    ).reshape(1, 1, S_dec, S_dec)
    # padding mask: mask the last 4 encoder positions of batch element 1; compact
    padding_mask = jnp.zeros((B, 1, 1, S_enc), jnp.float32)
    padding_mask = padding_mask.at[1, 0, 0, S_enc - 4:].set(1.0)

    fwd = jax.jit(functools.partial(decoder_layer, num_heads=num_heads))
    out3, attn_w1, attn_w2 = fwd(params, x, enc_output, look_ahead_mask,
                                 padding_mask)
    jax.block_until_ready((out3, attn_w1, attn_w2))

    assert out3.shape == (B, S_dec, model_dim)
    assert attn_w1.shape == (B, num_heads, S_dec, S_dec)
    assert attn_w2.shape == (B, num_heads, S_dec, S_enc)
    assert bool(jnp.all(jnp.isfinite(out3)))
    assert bool(jnp.all(jnp.isfinite(attn_w1)))
    assert bool(jnp.all(jnp.isfinite(attn_w2)))
    print("KERNEL_OK")
</pallas_src>

<mosaic_0001>
module attributes {stable_mosaic.version = 11 : i64} {
  func.func @_linear_kernel(%arg0: i32, %arg1: i32, %arg2: i32, %arg3: memref<32x128xf32, #tpu.memory_space<vmem>>, %arg4: memref<128x256xbf16, #tpu.memory_space<vmem>>, %arg5: memref<1x256xf32, #tpu.memory_space<vmem>>, %arg6: memref<32x256xbf16, #tpu.memory_space<vmem>>, %arg7: memref<32x256xf32, #tpu.memory_space<vmem>>) attributes {dimension_semantics = [#tpu.dimension_semantics<parallel>, #tpu.dimension_semantics<parallel>, #tpu.dimension_semantics<arbitrary>], iteration_bounds = array<i64: 1, 1, 1>, scalar_prefetch = 0 : i64, scratch_operands = 1 : i64, tpu.core_type = #tpu.core_type<tc>, window_params = [{transform_indices = @transform_0, window_bounds = array<i64: 32, 128>}, {transform_indices = @transform_1, window_bounds = array<i64: 128, 256>}, {transform_indices = @transform_2, window_bounds = array<i64: 1, 256>}, {transform_indices = @transform_3, window_bounds = array<i64: 32, 256>}]} {
    %c0_i32 = arith.constant 0 : i32
    %0 = arith.cmpi eq, %arg2, %c0_i32 : i32
    %1 = arith.extui %0 : i1 to i32
    %c0_i32_0 = arith.constant 0 : i32
    %2 = arith.cmpi ne, %1, %c0_i32_0 : i32
    scf.if %2 {
      %cst_10 = arith.constant 0.000000e+00 : f32
      %13 = vector.broadcast %cst_10 : f32 to vector<32x256xf32>
      %c0_11 = arith.constant 0 : index
      %c0_12 = arith.constant 0 : index
      %14 = vector.load %arg7[%c0_11, %c0_12] : memref<32x256xf32, #tpu.memory_space<vmem>>, vector<32x256xf32>
      tpu.vector_store %arg7[%c0_11, %c0_12], %13 {strides = array<i32>} : memref<32x256xf32, #tpu.memory_space<vmem>>, vector<32x256xf32>,
    } else {
    }
    %c0 = arith.constant 0 : index
    %c0_1 = arith.constant 0 : index
    %3 = vector.load %arg7[%c0, %c0_1] : memref<32x256xf32, #tpu.memory_space<vmem>>, vector<32x256xf32>
    %c0_2 = arith.constant 0 : index
    %c0_3 = arith.constant 0 : index
    %4 = vector.load %arg3[%c0_2, %c0_3] : memref<32x128xf32, #tpu.memory_space<vmem>>, vector<32x128xf32>
    %5 = arith.truncf %4 : vector<32x128xf32> to vector<32x128xbf16>
    %c0_4 = arith.constant 0 : index
    %c0_5 = arith.constant 0 : index
    %6 = vector.load %arg4[%c0_4, %c0_5] : memref<128x256xbf16, #tpu.memory_space<vmem>>, vector<128x256xbf16>
    %cst = arith.constant dense<0.000000e+00> : vector<32x256xf32>
    %7 = tpu.matmul %5, %6, %cst {dimension_numbers = #tpu.dot_dimension_numbers<[1], [0], [0], [1], [0, 0, 1, 1], [], []>} : vector<32x128xbf16>, vector<128x256xbf16>, vector<32x256xf32> -> vector<32x256xf32>
    %8 = arith.addf %3, %7 : vector<32x256xf32>
    %c0_6 = arith.constant 0 : index
    %c0_7 = arith.constant 0 : index
    %9 = vector.load %arg7[%c0_6, %c0_7] : memref<32x256xf32, #tpu.memory_space<vmem>>, vector<32x256xf32>
    tpu.vector_store %arg7[%c0_6, %c0_7], %8 {strides = array<i32>} : memref<32x256xf32, #tpu.memory_space<vmem>>, vector<32x256xf32>,
    %c0_i32_8 = arith.constant 0 : i32
    %10 = arith.cmpi eq, %arg2, %c0_i32_8 : i32
    %11 = arith.extui %10 : i1 to i32
    %c0_i32_9 = arith.constant 0 : i32
    %12 = arith.cmpi ne, %11, %c0_i32_9 : i32
    scf.if %12 {
      %c0_10 = arith.constant 0 : index
      %c0_11 = arith.constant 0 : index
      %13 = vector.load %arg7[%c0_10, %c0_11] : memref<32x256xf32, #tpu.memory_space<vmem>>, vector<32x256xf32>
      %c0_12 = arith.constant 0 : index
      %c0_13 = arith.constant 0 : index
      %14 = vector.load %arg5[%c0_12, %c0_13] : memref<1x256xf32, #tpu.memory_space<vmem>>, vector<1x256xf32>
      %15 = vector.broadcast %14 : vector<1x256xf32> to vector<32x256xf32>
      %16 = arith.addf %13, %15 : vector<32x256xf32>
      %17 = arith.truncf %16 : vector<32x256xf32> to vector<32x256xbf16>
      %c0_14 = arith.constant 0 : index
      %c0_15 = arith.constant 0 : index
      %18 = vector.load %arg6[%c0_14, %c0_15] : memref<32x256xbf16, #tpu.memory_space<vmem>>, vector<32x256xbf16>
      tpu.vector_store %arg6[%c0_14, %c0_15], %17 {strides = array<i32>} : memref<32x256xbf16, #tpu.memory_space<vmem>>, vector<32x256xbf16>,
    } else {
    }
    return
  }
  func.func @transform_0(%arg0: i32, %arg1: i32, %arg2: i32) -> (i32, i32) {
    %c0_i32 = arith.constant 0 : i32
    return %arg0, %arg2 : i32, i32
  }
  func.func @transform_1(%arg0: i32, %arg1: i32, %arg2: i32) -> (i32, i32) {
    %c0_i32 = arith.constant 0 : i32
    return %arg2, %arg1 : i32, i32
  }
  func.func @transform_2(%arg0: i32, %arg1: i32, %arg2: i32) -> (i32, i32) {
    %c0_i32 = arith.constant 0 : i32
    %c0_i32_0 = arith.constant 0 : i32
    return %c0_i32, %arg1 : i32, i32
  }
  func.func @transform_3(%arg0: i32, %arg1: i32, %arg2: i32) -> (i32, i32) {
    %c0_i32 = arith.constant 0 : i32
    return %arg0, %arg1 : i32, i32
  }
}

module attributes {stable_mosaic.version = 11 : i64} {
  func.func @_linear_kernel(%arg0: i32, %arg1: i32, %arg2: i32, %arg3: memref<16x128xf32, #tpu.memory_space<vmem>>, %arg4: memref<128x128xbf16, #tpu.memory_space<vmem>>, %arg5: memref<1x128xf32, #tpu.memory_space<vmem>>, %arg6: memref<16x128xbf16, #tpu.memory_space<vmem>>, %arg7: memref<16x128xf32, #tpu.memory_space<vmem>>) attributes {dimension_semantics = [#tpu.dimension_semantics<parallel>, #tpu.dimension_semantics<parallel>, #tpu.dimension_semantics<arbitrary>], iteration_bounds = array<i64: 1, 3, 1>, scalar_prefetch = 0 : i64, scratch_operands = 1 : i64, tpu.core_type = #tpu.core_type<tc>, window_params = [{transform_indices = @transform_0, window_bounds = array<i64: 16, 128>}, {transform_indices = @transform_1, window_bounds = array<i64: 128, 128>}, {transform_indices = @transform_2, window_bounds = array<i64: 1, 128>}, {transform_indices = @transform_3, window_bounds = array<i64: 16, 128>}]} {
    %c0_i32 = arith.constant 0 : i32
    %0 = arith.cmpi eq, %arg2, %c0_i32 : i32
    %1 = arith.extui %0 : i1 to i32
    %c0_i32_0 = arith.constant 0 : i32
    %2 = arith.cmpi ne, %1, %c0_i32_0 : i32
    scf.if %2 {
      %cst_10 = arith.constant 0.000000e+00 : f32
      %13 = vector.broadcast %cst_10 : f32 to vector<16x128xf32>
      %c0_11 = arith.constant 0 : index
      %c0_12 = arith.constant 0 : index
      %14 = vector.load %arg7[%c0_11, %c0_12] : memref<16x128xf32, #tpu.memory_space<vmem>>, vector<16x128xf32>
      tpu.vector_store %arg7[%c0_11, %c0_12], %13 {strides = array<i32>} : memref<16x128xf32, #tpu.memory_space<vmem>>, vector<16x128xf32>,
    } else {
    }
    %c0 = arith.constant 0 : index
    %c0_1 = arith.constant 0 : index
    %3 = vector.load %arg7[%c0, %c0_1] : memref<16x128xf32, #tpu.memory_space<vmem>>, vector<16x128xf32>
    %c0_2 = arith.constant 0 : index
    %c0_3 = arith.constant 0 : index
    %4 = vector.load %arg3[%c0_2, %c0_3] : memref<16x128xf32, #tpu.memory_space<vmem>>, vector<16x128xf32>
    %5 = arith.truncf %4 : vector<16x128xf32> to vector<16x128xbf16>
    %c0_4 = arith.constant 0 : index
    %c0_5 = arith.constant 0 : index
    %6 = vector.load %arg4[%c0_4, %c0_5] : memref<128x128xbf16, #tpu.memory_space<vmem>>, vector<128x128xbf16>
    %cst = arith.constant dense<0.000000e+00> : vector<16x128xf32>
    %7 = tpu.matmul %5, %6, %cst {dimension_numbers = #tpu.dot_dimension_numbers<[1], [0], [0], [1], [0, 0, 1, 1], [], []>} : vector<16x128xbf16>, vector<128x128xbf16>, vector<16x128xf32> -> vector<16x128xf32>
    %8 = arith.addf %3, %7 : vector<16x128xf32>
    %c0_6 = arith.constant 0 : index
    %c0_7 = arith.constant 0 : index
    %9 = vector.load %arg7[%c0_6, %c0_7] : memref<16x128xf32, #tpu.memory_space<vmem>>, vector<16x128xf32>
    tpu.vector_store %arg7[%c0_6, %c0_7], %8 {strides = array<i32>} : memref<16x128xf32, #tpu.memory_space<vmem>>, vector<16x128xf32>,
    %c0_i32_8 = arith.constant 0 : i32
    %10 = arith.cmpi eq, %arg2, %c0_i32_8 : i32
    %11 = arith.extui %10 : i1 to i32
    %c0_i32_9 = arith.constant 0 : i32
    %12 = arith.cmpi ne, %11, %c0_i32_9 : i32
    scf.if %12 {
      %c0_10 = arith.constant 0 : index
      %c0_11 = arith.constant 0 : index
      %13 = vector.load %arg7[%c0_10, %c0_11] : memref<16x128xf32, #tpu.memory_space<vmem>>, vector<16x128xf32>
      %c0_12 = arith.constant 0 : index
      %c0_13 = arith.constant 0 : index
      %14 = vector.load %arg5[%c0_12, %c0_13] : memref<1x128xf32, #tpu.memory_space<vmem>>, vector<1x128xf32>
      %15 = vector.broadcast %14 : vector<1x128xf32> to vector<16x128xf32>
      %16 = arith.addf %13, %15 : vector<16x128xf32>
      %17 = arith.truncf %16 : vector<16x128xf32> to vector<16x128xbf16>
      %c0_14 = arith.constant 0 : index
      %c0_15 = arith.constant 0 : index
      %18 = vector.load %arg6[%c0_14, %c0_15] : memref<16x128xbf16, #tpu.memory_space<vmem>>, vector<16x128xbf16>
      tpu.vector_store %arg6[%c0_14, %c0_15], %17 {strides = array<i32>} : memref<16x128xbf16, #tpu.memory_space<vmem>>, vector<16x128xbf16>,
    } else {
    }
    return
  }
  func.func @transform_0(%arg0: i32, %arg1: i32, %arg2: i32) -> (i32, i32) {
    %c0_i32 = arith.constant 0 : i32
    return %arg0, %arg2 : i32, i32
  }
  func.func @transform_1(%arg0: i32, %arg1: i32, %arg2: i32) -> (i32, i32) {
    %c0_i32 = arith.constant 0 : i32
    return %arg2, %arg1 : i32, i32
  }
  func.func @transform_2(%arg0: i32, %arg1: i32, %arg2: i32) -> (i32, i32) {
    %c0_i32 = arith.constant 0 : i32
    %c0_i32_0 = arith.constant 0 : i32
    return %c0_i32, %arg1 : i32, i32
  }
  func.func @transform_3(%arg0: i32, %arg1: i32, %arg2: i32) -> (i32, i32) {
    %c0_i32 = arith.constant 0 : i32
    return %arg0, %arg1 : i32, i32
  }
}

module attributes {stable_mosaic.version = 11 : i64} {
  func.func @_attention_kernel(%arg0: i32, %arg1: i32, %arg2: memref<1x8x128xbf16, #tpu.memory_space<vmem>>, %arg3: memref<1x8x128xbf16, #tpu.memory_space<vmem>>, %arg4: memref<1x8x128xbf16, #tpu.memory_space<vmem>>, %arg5: memref<1x1x8x8xf32, #tpu.memory_space<vmem>>, %arg6: memref<1x8x128xbf16, #tpu.memory_space<vmem>>, %arg7: memref<1x4x8x8xf32, #tpu.memory_space<vmem>>) attributes {dimension_semantics = [#tpu.dimension_semantics<parallel>, #tpu.dimension_semantics<parallel>], iteration_bounds = array<i64: 2, 1>, scalar_prefetch = 0 : i64, scratch_operands = 0 : i64, tpu.core_type = #tpu.core_type<tc>, window_params = [{transform_indices = @transform_0, window_bounds = array<i64: 1, 8, 128>}, {transform_indices = @transform_1, window_bounds = array<i64: 1, 8, 128>}, {transform_indices = @transform_2, window_bounds = array<i64: 1, 8, 128>}, {transform_indices = @transform_3, window_bounds = array<i64: 1, 1, 8, 8>}, {transform_indices = @transform_4, window_bounds = array<i64: 1, 8, 128>}, {transform_indices = @transform_5, window_bounds = array<i64: 1, 4, 8, 8>}]} {
    %c0 = arith.constant 0 : index
    %c0_0 = arith.constant 0 : index
    %c0_1 = arith.constant 0 : index
    %0 = vector.load %arg2[%c0, %c0_0, %c0_1] : memref<1x8x128xbf16, #tpu.memory_space<vmem>>, vector<1x8x128xbf16>
    %1 = vector.shape_cast %0 : vector<1x8x128xbf16> to vector<8x128xbf16>
    %c0_2 = arith.constant 0 : index
    %c0_3 = arith.constant 0 : index
    %c0_4 = arith.constant 0 : index
    %2 = vector.load %arg3[%c0_2, %c0_3, %c0_4] : memref<1x8x128xbf16, #tpu.memory_space<vmem>>, vector<1x8x128xbf16>
    %3 = vector.shape_cast %2 : vector<1x8x128xbf16> to vector<8x128xbf16>
    %c0_5 = arith.constant 0 : index
    %c0_6 = arith.constant 0 : index
    %c0_7 = arith.constant 0 : index
    %4 = vector.load %arg4[%c0_5, %c0_6, %c0_7] : memref<1x8x128xbf16, #tpu.memory_space<vmem>>, vector<1x8x128xbf16>
    %5 = vector.shape_cast %4 : vector<1x8x128xbf16> to vector<8x128xbf16>
    %c0_8 = arith.constant 0 : index
    %c0_9 = arith.constant 0 : index
    %c0_10 = arith.constant 0 : index
    %c0_11 = arith.constant 0 : index
    %6 = vector.load %arg5[%c0_8, %c0_9, %c0_10, %c0_11] : memref<1x1x8x8xf32, #tpu.memory_space<vmem>>, vector<1x1x8x8xf32>
    %7 = vector.shape_cast %6 : vector<1x1x8x8xf32> to vector<8x8xf32>
    %cst = arith.constant -1.000000e+09 : f32
    %8 = vector.broadcast %cst : f32 to vector<8x8xf32>
    %9 = arith.mulf %7, %8 : vector<8x8xf32>
    %10 = vector.extract_strided_slice %1 {offsets = [0, 0], sizes = [8, 32], strides = [1, 1]} : vector<8x128xbf16> to vector<8x32xbf16>
    %11 = vector.extract_strided_slice %3 {offsets = [0, 0], sizes = [8, 32], strides = [1, 1]} : vector<8x128xbf16> to vector<8x32xbf16>
    %12 = vector.extract_strided_slice %5 {offsets = [0, 0], sizes = [8, 32], strides = [1, 1]} : vector<8x128xbf16> to vector<8x32xbf16>
    %cst_12 = arith.constant dense<0.000000e+00> : vector<8x8xf32>
    %13 = tpu.matmul %10, %11, %cst_12 {dimension_numbers = #tpu.dot_dimension_numbers<[1], [1], [0], [0], [0, 0, 1, 0], [], []>} : vector<8x32xbf16>, vector<8x32xbf16>, vector<8x8xf32> -> vector<8x8xf32>
    %cst_13 = arith.constant 0.176776692 : f32
    %14 = vector.broadcast %cst_13 : f32 to vector<8x8xf32>
    %15 = arith.mulf %13, %14 : vector<8x8xf32>
    %16 = arith.addf %15, %9 : vector<8x8xf32>
    %cst_14 = arith.constant dense<0xFF800000> : vector<8xf32>
    %17 = vector.multi_reduction <maximumf>, %16, %cst_14 [1] : vector<8x8xf32> to vector<8xf32>
    %18 = vector.shape_cast %17 : vector<8xf32> to vector<8x1xf32>
    %19 = vector.broadcast %18 : vector<8x1xf32> to vector<8x8xf32>
    %20 = arith.subf %16, %19 : vector<8x8xf32>
    %21 = math.exp %20 : vector<8x8xf32>
    %cst_15 = arith.constant dense<0.000000e+00> : vector<8xf32>
    %22 = vector.multi_reduction <add>, %21, %cst_15 [1] : vector<8x8xf32> to vector<8xf32>
    %23 = vector.shape_cast %22 : vector<8xf32> to vector<8x1xf32>
    %24 = tpu.reciprocal %23 {approx = true} : vector<8x1xf32> -> vector<8x1xf32>
    %25 = vector.broadcast %24 : vector<8x1xf32> to vector<8x8xf32>
    %26 = arith.mulf %21, %25 : vector<8x8xf32>
    %c0_16 = arith.constant 0 : index
    %c0_17 = arith.constant 0 : index
    %c0_18 = arith.constant 0 : index
    %c0_19 = arith.constant 0 : index
    %27 = vector.load %arg7[%c0_16, %c0_17, %c0_18, %c0_19] : memref<1x4x8x8xf32, #tpu.memory_space<vmem>>, vector<1x1x8x8xf32>
    %28 = vector.shape_cast %27 : vector<1x1x8x8xf32> to vector<8x8xf32>
    %29 = vector.shape_cast %26 : vector<8x8xf32> to vector<1x1x8x8xf32>
    tpu.vector_store %arg7[%c0_16, %c0_17, %c0_18, %c0_19], %29 {strides = array<i32>} : memref<1x4x8x8xf32, #tpu.memory_space<vmem>>, vector<1x1x8x8xf32>,
    %30 = arith.truncf %26 : vector<8x8xf32> to vector<8x8xbf16>
    %cst_20 = arith.constant dense<0.000000e+00> : vector<8x32xf32>
    %31 = tpu.matmul %30, %12, %cst_20 {dimension_numbers = #tpu.dot_dimension_numbers<[1], [0], [0], [1], [0, 0, 1, 1], [], []>} : vector<8x8xbf16>, vector<8x32xbf16>, vector<8x32xf32> -> vector<8x32xf32>
    %32 = vector.extract_strided_slice %1 {offsets = [0, 32], sizes = [8, 32], strides = [1, 1]} : vector<8x128xbf16> to vector<8x32xbf16>
    %33 = vector.extract_strided_slice %3 {offsets = [0, 32], sizes = [8, 32], strides = [1, 1]} : vector<8x128xbf16> to vector<8x32xbf16>
    %34 = vector.extract_strided_slice %5 {offsets = [0, 32], sizes = [8, 32], strides = [1, 1]} : vector<8x128xbf16> to vector<8x32xbf16>
    %cst_21 = arith.constant dense<0.000000e+00> : vector<8x8xf32>
    %35 = tpu.matmul %32, %33, %cst_21 {dimension_numbers = #tpu.dot_dimension_numbers<[1], [1], [0], [0], [0, 0, 1, 0], [], []>} : vector<8x32xbf16>, vector<8x32xbf16>, vector<8x8xf32> -> vector<8x8xf32>
    %cst_22 = arith.constant 0.176776692 : f32
    %36 = vector.broadcast %cst_22 : f32 to vector<8x8xf32>
    %37 = arith.mulf %35, %36 : vector<8x8xf32>
    %38 = arith.addf %37, %9 : vector<8x8xf32>
    %cst_23 = arith.constant dense<0xFF800000> : vector<8xf32>
    %39 = vector.multi_reduction <maximumf>, %38, %cst_23 [1] : vector<8x8xf32> to vector<8xf32>
    %40 = vector.shape_cast %39 : vector<8xf32> to vector<8x1xf32>
    %41 = vector.broadcast %40 : vector<8x1xf32> to vector<8x8xf32>
    %42 = arith.subf %38, %41 : vector<8x8xf32>
    %43 = math.exp %42 : vector<8x8xf32>
    %cst_24 = arith.constant dense<0.000000e+00> : vector<8xf32>
    %44 = vector.multi_reduction <add>, %43, %cst_24 [1] : vector<8x8xf32> to vector<8xf32>
    %45 = vector.shape_cast %44 : vector<8xf32> to vector<8x1xf32>
    %46 = tpu.reciprocal %45 {approx = true} : vector<8x1xf32> -> vector<8x1xf32>
    %47 = vector.broadcast %46 : vector<8x1xf32> to vector<8x8xf32>
    %48 = arith.mulf %43, %47 : vector<8x8xf32>
    %c0_25 = arith.constant 0 : index
    %c1 = arith.constant 1 : index
    %c0_26 = arith.constant 0 : index
    %c0_27 = arith.constant 0 : index
    %49 = vector.load %arg7[%c0_25, %c1, %c0_26, %c0_27] : memref<1x4x8x8xf32, #tpu.memory_space<vmem>>, vector<1x1x8x8xf32>
    %50 = vector.shape_cast %49 : vector<1x1x8x8xf32> to vector<8x8xf32>
    %51 = vector.shape_cast %48 : vector<8x8xf32> to vector<1x1x8x8xf32>
    tpu.vector_store %arg7[%c0_25, %c1, %c0_26, %c0_27], %51 {strides = array<i32>} : memref<1x4x8x8xf32, #tpu.memory_space<vmem>>, vector<1x1x8x8xf32>,
    %52 = arith.truncf %48 : vector<8x8xf32> to vector<8x8xbf16>
    %cst_28 = arith.constant dense<0.000000e+00> : vector<8x32xf32>
    %53 = tpu.matmul %52, %34, %cst_28 {dimension_numbers = #tpu.dot_dimension_numbers<[1], [0], [0], [1], [0, 0, 1, 1], [], []>} : vector<8x8xbf16>, vector<8x32xbf16>, vector<8x32xf32> -> vector<8x32xf32>
    %54 = vector.extract_strided_slice %1 {offsets = [0, 64], sizes = [8, 32], strides = [1, 1]} : vector<8x128xbf16> to vector<8x32xbf16>
    %55 = vector.extract_strided_slice %3 {offsets = [0, 64], sizes = [8, 32], strides = [1, 1]} : vector<8x128xbf16> to vector<8x32xbf16>
    %56 = vector.extract_strided_slice %5 {offsets = [0, 64], sizes = [8, 32], strides = [1, 1]} : vector<8x128xbf16> to vector<8x32xbf16>
    %cst_29 = arith.constant dense<0.000000e+00> : vector<8x8xf32>
    %57 = tpu.matmul %54, %55, %cst_29 {dimension_numbers = #tpu.dot_dimension_numbers<[1], [1], [0], [0], [0, 0, 1, 0], [], []>} : vector<8x32xbf16>, vector<8x32xbf16>, vector<8x8xf32> -> vector<8x8xf32>
    %cst_30 = arith.constant 0.176776692 : f32
    %58 = vector.broadcast %cst_30 : f32 to vector<8x8xf32>
    %59 = arith.mulf %57, %58 : vector<8x8xf32>
    %60 = arith.addf %59, %9 : vector<8x8xf32>
    %cst_31 = arith.constant dense<0xFF800000> : vector<8xf32>
    %61 = vector.multi_reduction <maximumf>, %60, %cst_31 [1] : vector<8x8xf32> to vector<8xf32>
    %62 = vector.shape_cast %61 : vector<8xf32> to vector<8x1xf32>
    %63 = vector.broadcast %62 : vector<8x1xf32> to vector<8x8xf32>
    %64 = arith.subf %60, %63 : vector<8x8xf32>
    %65 = math.exp %64 : vector<8x8xf32>
    %cst_32 = arith.constant dense<0.000000e+00> : vector<8xf32>
    %66 = vector.multi_reduction <add>, %65, %cst_32 [1] : vector<8x8xf32> to vector<8xf32>
    %67 = vector.shape_cast %66 : vector<8xf32> to vector<8x1xf32>
    %68 = tpu.reciprocal %67 {approx = true} : vector<8x1xf32> -> vector<8x1xf32>
    %69 = vector.broadcast %68 : vector<8x1xf32> to vector<8x8xf32>
    %70 = arith.mulf %65, %69 : vector<8x8xf32>
    %c0_33 = arith.constant 0 : index
    %c2 = arith.constant 2 : index
    %c0_34 = arith.constant 0 : index
    %c0_35 = arith.constant 0 : index
    %71 = vector.load %arg7[%c0_33, %c2, %c0_34, %c0_35] : memref<1x4x8x8xf32, #tpu.memory_space<vmem>>, vector<1x1x8x8xf32>
    %72 = vector.shape_cast %71 : vector<1x1x8x8xf32> to vector<8x8xf32>
    %73 = vector.shape_cast %70 : vector<8x8xf32> to vector<1x1x8x8xf32>
    tpu.vector_store %arg7[%c0_33, %c2, %c0_34, %c0_35], %73 {strides = array<i32>} : memref<1x4x8x8xf32, #tpu.memory_space<vmem>>, vector<1x1x8x8xf32>,
    %74 = arith.truncf %70 : vector<8x8xf32> to vector<8x8xbf16>
    %cst_36 = arith.constant dense<0.000000e+00> : vector<8x32xf32>
    %75 = tpu.matmul %74, %56, %cst_36 {dimension_numbers = #tpu.dot_dimension_numbers<[1], [0], [0], [1], [0, 0, 1, 1], [], []>} : vector<8x8xbf16>, vector<8x32xbf16>, vector<8x32xf32> -> vector<8x32xf32>
    %76 = vector.extract_strided_slice %1 {offsets = [0, 96], sizes = [8, 32], strides = [1, 1]} : vector<8x128xbf16> to vector<8x32xbf16>
    %77 = vector.extract_strided_slice %3 {offsets = [0, 96], sizes = [8, 32], strides = [1, 1]} : vector<8x128xbf16> to vector<8x32xbf16>
    %78 = vector.extract_strided_slice %5 {offsets = [0, 96], sizes = [8, 32], strides = [1, 1]} : vector<8x128xbf16> to vector<8x32xbf16>
    %cst_37 = arith.constant dense<0.000000e+00> : vector<8x8xf32>
    %79 = tpu.matmul %76, %77, %cst_37 {dimension_numbers = #tpu.dot_dimension_numbers<[1], [1], [0], [0], [0, 0, 1, 0], [], []>} : vector<8x32xbf16>, vector<8x32xbf16>, vector<8x8xf32> -> vector<8x8xf32>
    %cst_38 = arith.constant 0.176776692 : f32
    %80 = vector.broadcast %cst_38 : f32 to vector<8x8xf32>
    %81 = arith.mulf %79, %80 : vector<8x8xf32>
    %82 = arith.addf %81, %9 : vector<8x8xf32>
    %cst_39 = arith.constant dense<0xFF800000> : vector<8xf32>
    %83 = vector.multi_reduction <maximumf>, %82, %cst_39 [1] : vector<8x8xf32> to vector<8xf32>
    %84 = vector.shape_cast %83 : vector<8xf32> to vector<8x1xf32>
    %85 = vector.broadcast %84 : vector<8x1xf32> to vector<8x8xf32>
    %86 = arith.subf %82, %85 : vector<8x8xf32>
    %87 = math.exp %86 : vector<8x8xf32>
    %cst_40 = arith.constant dense<0.000000e+00> : vector<8xf32>
    %88 = vector.multi_reduction <add>, %87, %cst_40 [1] : vector<8x8xf32> to vector<8xf32>
    %89 = vector.shape_cast %88 : vector<8xf32> to vector<8x1xf32>
    %90 = tpu.reciprocal %89 {approx = true} : vector<8x1xf32> -> vector<8x1xf32>
    %91 = vector.broadcast %90 : vector<8x1xf32> to vector<8x8xf32>
    %92 = arith.mulf %87, %91 : vector<8x8xf32>
    %c0_41 = arith.constant 0 : index
    %c3 = arith.constant 3 : index
    %c0_42 = arith.constant 0 : index
    %c0_43 = arith.constant 0 : index
    %93 = vector.load %arg7[%c0_41, %c3, %c0_42, %c0_43] : memref<1x4x8x8xf32, #tpu.memory_space<vmem>>, vector<1x1x8x8xf32>
    %94 = vector.shape_cast %93 : vector<1x1x8x8xf32> to vector<8x8xf32>
    %95 = vector.shape_cast %92 : vector<8x8xf32> to vector<1x1x8x8xf32>
    tpu.vector_store %arg7[%c0_41, %c3, %c0_42, %c0_43], %95 {strides = array<i32>} : memref<1x4x8x8xf32, #tpu.memory_space<vmem>>, vector<1x1x8x8xf32>,
    %96 = arith.truncf %92 : vector<8x8xf32> to vector<8x8xbf16>
    %cst_44 = arith.constant dense<0.000000e+00> : vector<8x32xf32>
    %97 = tpu.matmul %96, %78, %cst_44 {dimension_numbers = #tpu.dot_dimension_numbers<[1], [0], [0], [1], [0, 0, 1, 1], [], []>} : vector<8x8xbf16>, vector<8x32xbf16>, vector<8x32xf32> -> vector<8x32xf32>
    %98 = tpu.concatenate %31, %53, %75, %97 in 1 : vector<8x32xf32>, vector<8x32xf32>, vector<8x32xf32>, vector<8x32xf32> -> vector<8x128xf32>
    %99 = arith.truncf %98 : vector<8x128xf32> to vector<8x128xbf16>
    %c0_45 = arith.constant 0 : index
    %c0_46 = arith.constant 0 : index
    %c0_47 = arith.constant 0 : index
    %100 = vector.load %arg6[%c0_45, %c0_46, %c0_47] : memref<1x8x128xbf16, #tpu.memory_space<vmem>>, vector<1x8x128xbf16>
    %101 = vector.shape_cast %100 : vector<1x8x128xbf16> to vector<8x128xbf16>
    %102 = vector.shape_cast %99 : vector<8x128xbf16> to vector<1x8x128xbf16>
    tpu.vector_store %arg6[%c0_45, %c0_46, %c0_47], %102 {strides = array<i32>} : memref<1x8x128xbf16, #tpu.memory_space<vmem>>, vector<1x8x128xbf16>,
    return
  }
  func.func @transform_0(%arg0: i32, %arg1: i32) -> (i32, i32, i32) {
    %c0_i32 = arith.constant 0 : i32
    %c0_i32_0 = arith.constant 0 : i32
    return %arg0, %arg1, %c0_i32 : i32, i32, i32
  }
  func.func @transform_1(%arg0: i32, %arg1: i32) -> (i32, i32, i32) {
    %c0_i32 = arith.constant 0 : i32
    %c1_i32 = arith.constant 1 : i32
    %c0_i32_0 = arith.constant 0 : i32
    return %arg0, %c0_i32, %c1_i32 : i32, i32, i32
  }
  func.func @transform_2(%arg0: i32, %arg1: i32) -> (i32, i32, i32) {
    %c0_i32 = arith.constant 0 : i32
    %c2_i32 = arith.constant 2 : i32
    %c0_i32_0 = arith.constant 0 : i32
    return %arg0, %c0_i32, %c2_i32 : i32, i32, i32
  }
  func.func @transform_3(%arg0: i32, %arg1: i32) -> (i32, i32, i32, i32) {
    %c0_i32 = arith.constant 0 : i32
    %c0_i32_0 = arith.constant 0 : i32
    %c0_i32_1 = arith.constant 0 : i32
    %c0_i32_2 = arith.constant 0 : i32
    return %c0_i32, %c0_i32_0, %arg1, %c0_i32_1 : i32, i32, i32, i32
  }
  func.func @transform_4(%arg0: i32, %arg1: i32) -> (i32, i32, i32) {
    %c0_i32 = arith.constant 0 : i32
    %c0_i32_0 = arith.constant 0 : i32
    return %arg0, %arg1, %c0_i32 : i32, i32, i32
  }
  func.func @transform_5(%arg0: i32, %arg1: i32) -> (i32, i32, i32, i32) {
    %c0_i32 = arith.constant 0 : i32
    %c0_i32_0 = arith.constant 0 : i32
    %c0_i32_1 = arith.constant 0 : i32
    return %arg0, %c0_i32, %arg1, %c0_i32_0 : i32, i32, i32, i32
  }
}

module attributes {stable_mosaic.version = 11 : i64} {
  func.func @_linear_add_ln_kernel(%arg0: i32, %arg1: i32, %arg2: memref<16x128xbf16, #tpu.memory_space<vmem>>, %arg3: memref<128x128xbf16, #tpu.memory_space<vmem>>, %arg4: memref<1x128xf32, #tpu.memory_space<vmem>>, %arg5: memref<16x128xf32, #tpu.memory_space<vmem>>, %arg6: memref<1x128xf32, #tpu.memory_space<vmem>>, %arg7: memref<1x128xf32, #tpu.memory_space<vmem>>, %arg8: memref<16x128xbf16, #tpu.memory_space<vmem>>, %arg9: memref<16x128xf32, #tpu.memory_space<vmem>>) attributes {dimension_semantics = [#tpu.dimension_semantics<parallel>, #tpu.dimension_semantics<arbitrary>], iteration_bounds = array<i64: 1, 1>, scalar_prefetch = 0 : i64, scratch_operands = 1 : i64, tpu.core_type = #tpu.core_type<tc>, window_params = [{transform_indices = @transform_0, window_bounds = array<i64: 16, 128>}, {transform_indices = @transform_1, window_bounds = array<i64: 128, 128>}, {pipeline_mode = #tpu.pipeline_mode<synchronous>, transform_indices = @transform_2, window_bounds = array<i64: 1, 128>}, {transform_indices = @transform_3, window_bounds = array<i64: 16, 128>}, {pipeline_mode = #tpu.pipeline_mode<synchronous>, transform_indices = @transform_4, window_bounds = array<i64: 1, 128>}, {pipeline_mode = #tpu.pipeline_mode<synchronous>, transform_indices = @transform_5, window_bounds = array<i64: 1, 128>}, {transform_indices = @transform_6, window_bounds = array<i64: 16, 128>}]} {
    %c0_i32 = arith.constant 0 : i32
    %0 = arith.cmpi eq, %arg1, %c0_i32 : i32
    %1 = arith.extui %0 : i1 to i32
    %c0_i32_0 = arith.constant 0 : i32
    %2 = arith.cmpi ne, %1, %c0_i32_0 : i32
    scf.if %2 {
      %cst_10 = arith.constant 0.000000e+00 : f32
      %12 = vector.broadcast %cst_10 : f32 to vector<16x128xf32>
      %c0_11 = arith.constant 0 : index
      %c0_12 = arith.constant 0 : index
      %13 = vector.load %arg9[%c0_11, %c0_12] : memref<16x128xf32, #tpu.memory_space<vmem>>, vector<16x128xf32>
      tpu.vector_store %arg9[%c0_11, %c0_12], %12 {strides = array<i32>} : memref<16x128xf32, #tpu.memory_space<vmem>>, vector<16x128xf32>,
    } else {
    }
    %c0 = arith.constant 0 : index
    %c0_1 = arith.constant 0 : index
    %3 = vector.load %arg9[%c0, %c0_1] : memref<16x128xf32, #tpu.memory_space<vmem>>, vector<16x128xf32>
    %c0_2 = arith.constant 0 : index
    %c0_3 = arith.constant 0 : index
    %4 = vector.load %arg2[%c0_2, %c0_3] : memref<16x128xbf16, #tpu.memory_space<vmem>>, vector<16x128xbf16>
    %c0_4 = arith.constant 0 : index
    %c0_5 = arith.constant 0 : index
    %5 = vector.load %arg3[%c0_4, %c0_5] : memref<128x128xbf16, #tpu.memory_space<vmem>>, vector<128x128xbf16>
    %cst = arith.constant dense<0.000000e+00> : vector<16x128xf32>
    %6 = tpu.matmul %4, %5, %cst {dimension_numbers = #tpu.dot_dimension_numbers<[1], [0], [0], [1], [0, 0, 1, 1], [], []>} : vector<16x128xbf16>, vector<128x128xbf16>, vector<16x128xf32> -> vector<16x128xf32>
    %7 = arith.addf %3, %6 : vector<16x128xf32>
    %c0_6 = arith.constant 0 : index
    %c0_7 = arith.constant 0 : index
    %8 = vector.load %arg9[%c0_6, %c0_7] : memref<16x128xf32, #tpu.memory_space<vmem>>, vector<16x128xf32>
    tpu.vector_store %arg9[%c0_6, %c0_7], %7 {strides = array<i32>} : memref<16x128xf32, #tpu.memory_space<vmem>>, vector<16x128xf32>,
    %c0_i32_8 = arith.constant 0 : i32
    %9 = arith.cmpi eq, %arg1, %c0_i32_8 : i32
    %10 = arith.extui %9 : i1 to i32
    %c0_i32_9 = arith.constant 0 : i32
    %11 = arith.cmpi ne, %10, %c0_i32_9 : i32
    scf.if %11 {
      %c0_10 = arith.constant 0 : index
      %c0_11 = arith.constant 0 : index
      %12 = vector.load %arg9[%c0_10, %c0_11] : memref<16x128xf32, #tpu.memory_space<vmem>>, vector<16x128xf32>
      %c0_12 = arith.constant 0 : index
      %c0_13 = arith.constant 0 : index
      %13 = vector.load %arg4[%c0_12, %c0_13] : memref<1x128xf32, #tpu.memory_space<vmem>>, vector<1x128xf32>
      %14 = vector.broadcast %13 : vector<1x128xf32> to vector<16x128xf32>
      %15 = arith.addf %12, %14 : vector<16x128xf32>
      %c0_14 = arith.constant 0 : index
      %c0_15 = arith.constant 0 : index
      %16 = vector.load %arg5[%c0_14, %c0_15] : memref<16x128xf32, #tpu.memory_space<vmem>>, vector<16x128xf32>
      %17 = arith.addf %15, %16 : vector<16x128xf32>
      %cst_16 = arith.constant dense<0.000000e+00> : vector<16xf32>
      %18 = vector.multi_reduction <add>, %17, %cst_16 [1] : vector<16x128xf32> to vector<16xf32>
      %19 = vector.shape_cast %18 : vector<16xf32> to vector<16x1xf32>
      %cst_17 = arith.constant 1.280000e+02 : f32
      %20 = vector.broadcast %cst_17 : f32 to vector<16x1xf32>
      %21 = arith.divf %19, %20 : vector<16x1xf32>
      %22 = vector.broadcast %21 : vector<16x1xf32> to vector<16x128xf32>
      %23 = arith.subf %17, %22 : vector<16x128xf32>
      %24 = arith.mulf %23, %23 : vector<16x128xf32>
      %cst_18 = arith.constant dense<0.000000e+00> : vector<16xf32>
      %25 = vector.multi_reduction <add>, %24, %cst_18 [1] : vector<16x128xf32> to vector<16xf32>
      %26 = vector.shape_cast %25 : vector<16xf32> to vector<16x1xf32>
      %cst_19 = arith.constant 1.280000e+02 : f32
      %27 = vector.broadcast %cst_19 : f32 to vector<16x1xf32>
      %28 = arith.divf %26, %27 : vector<16x1xf32>
      %29 = vector.broadcast %21 : vector<16x1xf32> to vector<16x128xf32>
      %30 = arith.subf %17, %29 : vector<16x128xf32>
      %cst_20 = arith.constant 9.99999997E-7 : f32
      %31 = vector.broadcast %cst_20 : f32 to vector<16x1xf32>
      %32 = arith.addf %28, %31 : vector<16x1xf32>
      %33 = math.rsqrt %32 : vector<16x1xf32>
      %34 = vector.broadcast %33 : vector<16x1xf32> to vector<16x128xf32>
      %35 = arith.mulf %30, %34 : vector<16x128xf32>
      %c0_21 = arith.constant 0 : index
      %c0_22 = arith.constant 0 : index
      %36 = vector.load %arg6[%c0_21, %c0_22] : memref<1x128xf32, #tpu.memory_space<vmem>>, vector<1x128xf32>
      %37 = vector.broadcast %36 : vector<1x128xf32> to vector<16x128xf32>
      %38 = arith.mulf %35, %37 : vector<16x128xf32>
      %c0_23 = arith.constant 0 : index
      %c0_24 = arith.constant 0 : index
      %39 = vector.load %arg7[%c0_23, %c0_24] : memref<1x128xf32, #tpu.memory_space<vmem>>, vector<1x128xf32>
      %40 = vector.broadcast %39 : vector<1x128xf32> to vector<16x128xf32>
      %41 = arith.addf %38, %40 : vector<16x128xf32>
      %42 = arith.truncf %41 : vector<16x128xf32> to vector<16x128xbf16>
      %c0_25 = arith.constant 0 : index
      %c0_26 = arith.constant 0 : index
      %43 = vector.load %arg8[%c0_25, %c0_26] : memref<16x128xbf16, #tpu.memory_space<vmem>>, vector<16x128xbf16>
      tpu.vector_store %arg8[%c0_25, %c0_26], %42 {strides = array<i32>} : memref<16x128xbf16, #tpu.memory_space<vmem>>, vector<16x128xbf16>,
    } else {
    }
    return
  }
  func.func @transform_0(%arg0: i32, %arg1: i32) -> (i32, i32) {
    %c0_i32 = arith.constant 0 : i32
    return %arg0, %arg1 : i32, i32
  }
  func.func @transform_1(%arg0: i32, %arg1: i32) -> (i32, i32) {
    %c0_i32 = arith.constant 0 : i32
    %c0_i32_0 = arith.constant 0 : i32
    return %arg1, %c0_i32 : i32, i32
  }
  func.func @transform_2(%arg0: i32, %arg1: i32) -> (i32, i32) {
    %c0_i32 = arith.constant 0 : i32
    %c0_i32_0 = arith.constant 0 : i32
    %c0_i32_1 = arith.constant 0 : i32
    return %c0_i32, %c0_i32_0 : i32, i32
  }
  func.func @transform_3(%arg0: i32, %arg1: i32) -> (i32, i32) {
    %c0_i32 = arith.constant 0 : i32
    %c0_i32_0 = arith.constant 0 : i32
    return %arg0, %c0_i32 : i32, i32
  }
  func.func @transform_4(%arg0: i32, %arg1: i32) -> (i32, i32) {
    %c0_i32 = arith.constant 0 : i32
    %c0_i32_0 = arith.constant 0 : i32
    %c0_i32_1 = arith.constant 0 : i32
    return %c0_i32, %c0_i32_0 : i32, i32
  }
  func.func @transform_5(%arg0: i32, %arg1: i32) -> (i32, i32) {
    %c0_i32 = arith.constant 0 : i32
    %c0_i32_0 = arith.constant 0 : i32
    %c0_i32_1 = arith.constant 0 : i32
    return %c0_i32, %c0_i32_0 : i32, i32
  }
  func.func @transform_6(%arg0: i32, %arg1: i32) -> (i32, i32) {
    %c0_i32 = arith.constant 0 : i32
    %c0_i32_0 = arith.constant 0 : i32
    return %arg0, %c0_i32 : i32, i32
  }
}

module attributes {stable_mosaic.version = 11 : i64} {
  func.func @_linear_kernel(%arg0: i32, %arg1: i32, %arg2: i32, %arg3: memref<16x128xbf16, #tpu.memory_space<vmem>>, %arg4: memref<128x128xbf16, #tpu.memory_space<vmem>>, %arg5: memref<1x128xf32, #tpu.memory_space<vmem>>, %arg6: memref<16x128xbf16, #tpu.memory_space<vmem>>, %arg7: memref<16x128xf32, #tpu.memory_space<vmem>>) attributes {dimension_semantics = [#tpu.dimension_semantics<parallel>, #tpu.dimension_semantics<parallel>, #tpu.dimension_semantics<arbitrary>], iteration_bounds = array<i64: 1, 1, 1>, scalar_prefetch = 0 : i64, scratch_operands = 1 : i64, tpu.core_type = #tpu.core_type<tc>, window_params = [{transform_indices = @transform_0, window_bounds = array<i64: 16, 128>}, {transform_indices = @transform_1, window_bounds = array<i64: 128, 128>}, {transform_indices = @transform_2, window_bounds = array<i64: 1, 128>}, {transform_indices = @transform_3, window_bounds = array<i64: 16, 128>}]} {
    %c0_i32 = arith.constant 0 : i32
    %0 = arith.cmpi eq, %arg2, %c0_i32 : i32
    %1 = arith.extui %0 : i1 to i32
    %c0_i32_0 = arith.constant 0 : i32
    %2 = arith.cmpi ne, %1, %c0_i32_0 : i32
    scf.if %2 {
      %cst_10 = arith.constant 0.000000e+00 : f32
      %12 = vector.broadcast %cst_10 : f32 to vector<16x128xf32>
      %c0_11 = arith.constant 0 : index
      %c0_12 = arith.constant 0 : index
      %13 = vector.load %arg7[%c0_11, %c0_12] : memref<16x128xf32, #tpu.memory_space<vmem>>, vector<16x128xf32>
      tpu.vector_store %arg7[%c0_11, %c0_12], %12 {strides = array<i32>} : memref<16x128xf32, #tpu.memory_space<vmem>>, vector<16x128xf32>,
    } else {
    }
    %c0 = arith.constant 0 : index
    %c0_1 = arith.constant 0 : index
    %3 = vector.load %arg7[%c0, %c0_1] : memref<16x128xf32, #tpu.memory_space<vmem>>, vector<16x128xf32>
    %c0_2 = arith.constant 0 : index
    %c0_3 = arith.constant 0 : index
    %4 = vector.load %arg3[%c0_2, %c0_3] : memref<16x128xbf16, #tpu.memory_space<vmem>>, vector<16x128xbf16>
    %c0_4 = arith.constant 0 : index
    %c0_5 = arith.constant 0 : index
    %5 = vector.load %arg4[%c0_4, %c0_5] : memref<128x128xbf16, #tpu.memory_space<vmem>>, vector<128x128xbf16>
    %cst = arith.constant dense<0.000000e+00> : vector<16x128xf32>
    %6 = tpu.matmul %4, %5, %cst {dimension_numbers = #tpu.dot_dimension_numbers<[1], [0], [0], [1], [0, 0, 1, 1], [], []>} : vector<16x128xbf16>, vector<128x128xbf16>, vector<16x128xf32> -> vector<16x128xf32>
    %7 = arith.addf %3, %6 : vector<16x128xf32>
    %c0_6 = arith.constant 0 : index
    %c0_7 = arith.constant 0 : index
    %8 = vector.load %arg7[%c0_6, %c0_7] : memref<16x128xf32, #tpu.memory_space<vmem>>, vector<16x128xf32>
    tpu.vector_store %arg7[%c0_6, %c0_7], %7 {strides = array<i32>} : memref<16x128xf32, #tpu.memory_space<vmem>>, vector<16x128xf32>,
    %c0_i32_8 = arith.constant 0 : i32
    %9 = arith.cmpi eq, %arg2, %c0_i32_8 : i32
    %10 = arith.extui %9 : i1 to i32
    %c0_i32_9 = arith.constant 0 : i32
    %11 = arith.cmpi ne, %10, %c0_i32_9 : i32
    scf.if %11 {
      %c0_10 = arith.constant 0 : index
      %c0_11 = arith.constant 0 : index
      %12 = vector.load %arg7[%c0_10, %c0_11] : memref<16x128xf32, #tpu.memory_space<vmem>>, vector<16x128xf32>
      %c0_12 = arith.constant 0 : index
      %c0_13 = arith.constant 0 : index
      %13 = vector.load %arg5[%c0_12, %c0_13] : memref<1x128xf32, #tpu.memory_space<vmem>>, vector<1x128xf32>
      %14 = vector.broadcast %13 : vector<1x128xf32> to vector<16x128xf32>
      %15 = arith.addf %12, %14 : vector<16x128xf32>
      %16 = arith.truncf %15 : vector<16x128xf32> to vector<16x128xbf16>
      %c0_14 = arith.constant 0 : index
      %c0_15 = arith.constant 0 : index
      %17 = vector.load %arg6[%c0_14, %c0_15] : memref<16x128xbf16, #tpu.memory_space<vmem>>, vector<16x128xbf16>
      tpu.vector_store %arg6[%c0_14, %c0_15], %16 {strides = array<i32>} : memref<16x128xbf16, #tpu.memory_space<vmem>>, vector<16x128xbf16>,
    } else {
    }
    return
  }
  func.func @transform_0(%arg0: i32, %arg1: i32, %arg2: i32) -> (i32, i32) {
    %c0_i32 = arith.constant 0 : i32
    return %arg0, %arg2 : i32, i32
  }
  func.func @transform_1(%arg0: i32, %arg1: i32, %arg2: i32) -> (i32, i32) {
    %c0_i32 = arith.constant 0 : i32
    return %arg2, %arg1 : i32, i32
  }
  func.func @transform_2(%arg0: i32, %arg1: i32, %arg2: i32) -> (i32, i32) {
    %c0_i32 = arith.constant 0 : i32
    %c0_i32_0 = arith.constant 0 : i32
    return %c0_i32, %arg1 : i32, i32
  }
  func.func @transform_3(%arg0: i32, %arg1: i32, %arg2: i32) -> (i32, i32) {
    %c0_i32 = arith.constant 0 : i32
    return %arg0, %arg1 : i32, i32
  }
}

module attributes {stable_mosaic.version = 11 : i64} {
  func.func @_attention_kernel(%arg0: i32, %arg1: i32, %arg2: memref<1x8x128xbf16, #tpu.memory_space<vmem>>, %arg3: memref<1x16x128xbf16, #tpu.memory_space<vmem>>, %arg4: memref<1x16x128xbf16, #tpu.memory_space<vmem>>, %arg5: memref<1x1x1x16xf32, #tpu.memory_space<vmem>>, %arg6: memref<1x8x128xbf16, #tpu.memory_space<vmem>>, %arg7: memref<1x4x8x16xf32, #tpu.memory_space<vmem>>) attributes {dimension_semantics = [#tpu.dimension_semantics<parallel>, #tpu.dimension_semantics<parallel>], iteration_bounds = array<i64: 2, 1>, scalar_prefetch = 0 : i64, scratch_operands = 0 : i64, tpu.core_type = #tpu.core_type<tc>, window_params = [{transform_indices = @transform_0, window_bounds = array<i64: 1, 8, 128>}, {transform_indices = @transform_1, window_bounds = array<i64: 1, 16, 128>}, {transform_indices = @transform_2, window_bounds = array<i64: 1, 16, 128>}, {transform_indices = @transform_3, window_bounds = array<i64: 1, 1, 1, 16>}, {transform_indices = @transform_4, window_bounds = array<i64: 1, 8, 128>}, {transform_indices = @transform_5, window_bounds = array<i64: 1, 4, 8, 16>}]} {
    %c0 = arith.constant 0 : index
    %c0_0 = arith.constant 0 : index
    %c0_1 = arith.constant 0 : index
    %0 = vector.load %arg2[%c0, %c0_0, %c0_1] : memref<1x8x128xbf16, #tpu.memory_space<vmem>>, vector<1x8x128xbf16>
    %1 = vector.shape_cast %0 : vector<1x8x128xbf16> to vector<8x128xbf16>
    %c0_2 = arith.constant 0 : index
    %c0_3 = arith.constant 0 : index
    %c0_4 = arith.constant 0 : index
    %2 = vector.load %arg3[%c0_2, %c0_3, %c0_4] : memref<1x16x128xbf16, #tpu.memory_space<vmem>>, vector<1x16x128xbf16>
    %3 = vector.shape_cast %2 : vector<1x16x128xbf16> to vector<16x128xbf16>
    %c0_5 = arith.constant 0 : index
    %c0_6 = arith.constant 0 : index
    %c0_7 = arith.constant 0 : index
    %4 = vector.load %arg4[%c0_5, %c0_6, %c0_7] : memref<1x16x128xbf16, #tpu.memory_space<vmem>>, vector<1x16x128xbf16>
    %5 = vector.shape_cast %4 : vector<1x16x128xbf16> to vector<16x128xbf16>
    %c0_8 = arith.constant 0 : index
    %c0_9 = arith.constant 0 : index
    %c0_10 = arith.constant 0 : index
    %c0_11 = arith.constant 0 : index
    %6 = vector.load %arg5[%c0_8, %c0_9, %c0_10, %c0_11] : memref<1x1x1x16xf32, #tpu.memory_space<vmem>>, vector<1x1x1x16xf32>
    %7 = vector.shape_cast %6 : vector<1x1x1x16xf32> to vector<1x16xf32>
    %cst = arith.constant -1.000000e+09 : f32
    %8 = vector.broadcast %cst : f32 to vector<1x16xf32>
    %9 = arith.mulf %7, %8 : vector<1x16xf32>
    %10 = vector.extract_strided_slice %1 {offsets = [0, 0], sizes = [8, 32], strides = [1, 1]} : vector<8x128xbf16> to vector<8x32xbf16>
    %11 = vector.extract_strided_slice %3 {offsets = [0, 0], sizes = [16, 32], strides = [1, 1]} : vector<16x128xbf16> to vector<16x32xbf16>
    %12 = vector.extract_strided_slice %5 {offsets = [0, 0], sizes = [16, 32], strides = [1, 1]} : vector<16x128xbf16> to vector<16x32xbf16>
    %cst_12 = arith.constant dense<0.000000e+00> : vector<8x16xf32>
    %13 = tpu.matmul %10, %11, %cst_12 {dimension_numbers = #tpu.dot_dimension_numbers<[1], [1], [0], [0], [0, 0, 1, 0], [], []>} : vector<8x32xbf16>, vector<16x32xbf16>, vector<8x16xf32> -> vector<8x16xf32>
    %cst_13 = arith.constant 0.176776692 : f32
    %14 = vector.broadcast %cst_13 : f32 to vector<8x16xf32>
    %15 = arith.mulf %13, %14 : vector<8x16xf32>
    %16 = vector.broadcast %9 : vector<1x16xf32> to vector<8x16xf32>
    %17 = arith.addf %15, %16 : vector<8x16xf32>
    %cst_14 = arith.constant dense<0xFF800000> : vector<8xf32>
    %18 = vector.multi_reduction <maximumf>, %17, %cst_14 [1] : vector<8x16xf32> to vector<8xf32>
    %19 = vector.shape_cast %18 : vector<8xf32> to vector<8x1xf32>
    %20 = vector.broadcast %19 : vector<8x1xf32> to vector<8x16xf32>
    %21 = arith.subf %17, %20 : vector<8x16xf32>
    %22 = math.exp %21 : vector<8x16xf32>
    %cst_15 = arith.constant dense<0.000000e+00> : vector<8xf32>
    %23 = vector.multi_reduction <add>, %22, %cst_15 [1] : vector<8x16xf32> to vector<8xf32>
    %24 = vector.shape_cast %23 : vector<8xf32> to vector<8x1xf32>
    %25 = tpu.reciprocal %24 {approx = true} : vector<8x1xf32> -> vector<8x1xf32>
    %26 = vector.broadcast %25 : vector<8x1xf32> to vector<8x16xf32>
    %27 = arith.mulf %22, %26 : vector<8x16xf32>
    %c0_16 = arith.constant 0 : index
    %c0_17 = arith.constant 0 : index
    %c0_18 = arith.constant 0 : index
    %c0_19 = arith.constant 0 : index
    %28 = vector.load %arg7[%c0_16, %c0_17, %c0_18, %c0_19] : memref<1x4x8x16xf32, #tpu.memory_space<vmem>>, vector<1x1x8x16xf32>
    %29 = vector.shape_cast %28 : vector<1x1x8x16xf32> to vector<8x16xf32>
    %30 = vector.shape_cast %27 : vector<8x16xf32> to vector<1x1x8x16xf32>
    tpu.vector_store %arg7[%c0_16, %c0_17, %c0_18, %c0_19], %30 {strides = array<i32>} : memref<1x4x8x16xf32, #tpu.memory_space<vmem>>, vector<1x1x8x16xf32>,
    %31 = arith.truncf %27 : vector<8x16xf32> to vector<8x16xbf16>
    %cst_20 = arith.constant dense<0.000000e+00> : vector<8x32xf32>
    %32 = tpu.matmul %31, %12, %cst_20 {dimension_numbers = #tpu.dot_dimension_numbers<[1], [0], [0], [1], [0, 0, 1, 1], [], []>} : vector<8x16xbf16>, vector<16x32xbf16>, vector<8x32xf32> -> vector<8x32xf32>
    %33 = vector.extract_strided_slice %1 {offsets = [0, 32], sizes = [8, 32], strides = [1, 1]} : vector<8x128xbf16> to vector<8x32xbf16>
    %34 = vector.extract_strided_slice %3 {offsets = [0, 32], sizes = [16, 32], strides = [1, 1]} : vector<16x128xbf16> to vector<16x32xbf16>
    %35 = vector.extract_strided_slice %5 {offsets = [0, 32], sizes = [16, 32], strides = [1, 1]} : vector<16x128xbf16> to vector<16x32xbf16>
    %cst_21 = arith.constant dense<0.000000e+00> : vector<8x16xf32>
    %36 = tpu.matmul %33, %34, %cst_21 {dimension_numbers = #tpu.dot_dimension_numbers<[1], [1], [0], [0], [0, 0, 1, 0], [], []>} : vector<8x32xbf16>, vector<16x32xbf16>, vector<8x16xf32> -> vector<8x16xf32>
    %cst_22 = arith.constant 0.176776692 : f32
    %37 = vector.broadcast %cst_22 : f32 to vector<8x16xf32>
    %38 = arith.mulf %36, %37 : vector<8x16xf32>
    %39 = vector.broadcast %9 : vector<1x16xf32> to vector<8x16xf32>
    %40 = arith.addf %38, %39 : vector<8x16xf32>
    %cst_23 = arith.constant dense<0xFF800000> : vector<8xf32>
    %41 = vector.multi_reduction <maximumf>, %40, %cst_23 [1] : vector<8x16xf32> to vector<8xf32>
    %42 = vector.shape_cast %41 : vector<8xf32> to vector<8x1xf32>
    %43 = vector.broadcast %42 : vector<8x1xf32> to vector<8x16xf32>
    %44 = arith.subf %40, %43 : vector<8x16xf32>
    %45 = math.exp %44 : vector<8x16xf32>
    %cst_24 = arith.constant dense<0.000000e+00> : vector<8xf32>
    %46 = vector.multi_reduction <add>, %45, %cst_24 [1] : vector<8x16xf32> to vector<8xf32>
    %47 = vector.shape_cast %46 : vector<8xf32> to vector<8x1xf32>
    %48 = tpu.reciprocal %47 {approx = true} : vector<8x1xf32> -> vector<8x1xf32>
    %49 = vector.broadcast %48 : vector<8x1xf32> to vector<8x16xf32>
    %50 = arith.mulf %45, %49 : vector<8x16xf32>
    %c0_25 = arith.constant 0 : index
    %c1 = arith.constant 1 : index
    %c0_26 = arith.constant 0 : index
    %c0_27 = arith.constant 0 : index
    %51 = vector.load %arg7[%c0_25, %c1, %c0_26, %c0_27] : memref<1x4x8x16xf32, #tpu.memory_space<vmem>>, vector<1x1x8x16xf32>
    %52 = vector.shape_cast %51 : vector<1x1x8x16xf32> to vector<8x16xf32>
    %53 = vector.shape_cast %50 : vector<8x16xf32> to vector<1x1x8x16xf32>
    tpu.vector_store %arg7[%c0_25, %c1, %c0_26, %c0_27], %53 {strides = array<i32>} : memref<1x4x8x16xf32, #tpu.memory_space<vmem>>, vector<1x1x8x16xf32>,
    %54 = arith.truncf %50 : vector<8x16xf32> to vector<8x16xbf16>
    %cst_28 = arith.constant dense<0.000000e+00> : vector<8x32xf32>
    %55 = tpu.matmul %54, %35, %cst_28 {dimension_numbers = #tpu.dot_dimension_numbers<[1], [0], [0], [1], [0, 0, 1, 1], [], []>} : vector<8x16xbf16>, vector<16x32xbf16>, vector<8x32xf32> -> vector<8x32xf32>
    %56 = vector.extract_strided_slice %1 {offsets = [0, 64], sizes = [8, 32], strides = [1, 1]} : vector<8x128xbf16> to vector<8x32xbf16>
    %57 = vector.extract_strided_slice %3 {offsets = [0, 64], sizes = [16, 32], strides = [1, 1]} : vector<16x128xbf16> to vector<16x32xbf16>
    %58 = vector.extract_strided_slice %5 {offsets = [0, 64], sizes = [16, 32], strides = [1, 1]} : vector<16x128xbf16> to vector<16x32xbf16>
    %cst_29 = arith.constant dense<0.000000e+00> : vector<8x16xf32>
    %59 = tpu.matmul %56, %57, %cst_29 {dimension_numbers = #tpu.dot_dimension_numbers<[1], [1], [0], [0], [0, 0, 1, 0], [], []>} : vector<8x32xbf16>, vector<16x32xbf16>, vector<8x16xf32> -> vector<8x16xf32>
    %cst_30 = arith.constant 0.176776692 : f32
    %60 = vector.broadcast %cst_30 : f32 to vector<8x16xf32>
    %61 = arith.mulf %59, %60 : vector<8x16xf32>
    %62 = vector.broadcast %9 : vector<1x16xf32> to vector<8x16xf32>
    %63 = arith.addf %61, %62 : vector<8x16xf32>
    %cst_31 = arith.constant dense<0xFF800000> : vector<8xf32>
    %64 = vector.multi_reduction <maximumf>, %63, %cst_31 [1] : vector<8x16xf32> to vector<8xf32>
    %65 = vector.shape_cast %64 : vector<8xf32> to vector<8x1xf32>
    %66 = vector.broadcast %65 : vector<8x1xf32> to vector<8x16xf32>
    %67 = arith.subf %63, %66 : vector<8x16xf32>
    %68 = math.exp %67 : vector<8x16xf32>
    %cst_32 = arith.constant dense<0.000000e+00> : vector<8xf32>
    %69 = vector.multi_reduction <add>, %68, %cst_32 [1] : vector<8x16xf32> to vector<8xf32>
    %70 = vector.shape_cast %69 : vector<8xf32> to vector<8x1xf32>
    %71 = tpu.reciprocal %70 {approx = true} : vector<8x1xf32> -> vector<8x1xf32>
    %72 = vector.broadcast %71 : vector<8x1xf32> to vector<8x16xf32>
    %73 = arith.mulf %68, %72 : vector<8x16xf32>
    %c0_33 = arith.constant 0 : index
    %c2 = arith.constant 2 : index
    %c0_34 = arith.constant 0 : index
    %c0_35 = arith.constant 0 : index
    %74 = vector.load %arg7[%c0_33, %c2, %c0_34, %c0_35] : memref<1x4x8x16xf32, #tpu.memory_space<vmem>>, vector<1x1x8x16xf32>
    %75 = vector.shape_cast %74 : vector<1x1x8x16xf32> to vector<8x16xf32>
    %76 = vector.shape_cast %73 : vector<8x16xf32> to vector<1x1x8x16xf32>
    tpu.vector_store %arg7[%c0_33, %c2, %c0_34, %c0_35], %76 {strides = array<i32>} : memref<1x4x8x16xf32, #tpu.memory_space<vmem>>, vector<1x1x8x16xf32>,
    %77 = arith.truncf %73 : vector<8x16xf32> to vector<8x16xbf16>
    %cst_36 = arith.constant dense<0.000000e+00> : vector<8x32xf32>
    %78 = tpu.matmul %77, %58, %cst_36 {dimension_numbers = #tpu.dot_dimension_numbers<[1], [0], [0], [1], [0, 0, 1, 1], [], []>} : vector<8x16xbf16>, vector<16x32xbf16>, vector<8x32xf32> -> vector<8x32xf32>
    %79 = vector.extract_strided_slice %1 {offsets = [0, 96], sizes = [8, 32], strides = [1, 1]} : vector<8x128xbf16> to vector<8x32xbf16>
    %80 = vector.extract_strided_slice %3 {offsets = [0, 96], sizes = [16, 32], strides = [1, 1]} : vector<16x128xbf16> to vector<16x32xbf16>
    %81 = vector.extract_strided_slice %5 {offsets = [0, 96], sizes = [16, 32], strides = [1, 1]} : vector<16x128xbf16> to vector<16x32xbf16>
    %cst_37 = arith.constant dense<0.000000e+00> : vector<8x16xf32>
    %82 = tpu.matmul %79, %80, %cst_37 {dimension_numbers = #tpu.dot_dimension_numbers<[1], [1], [0], [0], [0, 0, 1, 0], [], []>} : vector<8x32xbf16>, vector<16x32xbf16>, vector<8x16xf32> -> vector<8x16xf32>
    %cst_38 = arith.constant 0.176776692 : f32
    %83 = vector.broadcast %cst_38 : f32 to vector<8x16xf32>
    %84 = arith.mulf %82, %83 : vector<8x16xf32>
    %85 = vector.broadcast %9 : vector<1x16xf32> to vector<8x16xf32>
    %86 = arith.addf %84, %85 : vector<8x16xf32>
    %cst_39 = arith.constant dense<0xFF800000> : vector<8xf32>
    %87 = vector.multi_reduction <maximumf>, %86, %cst_39 [1] : vector<8x16xf32> to vector<8xf32>
    %88 = vector.shape_cast %87 : vector<8xf32> to vector<8x1xf32>
    %89 = vector.broadcast %88 : vector<8x1xf32> to vector<8x16xf32>
    %90 = arith.subf %86, %89 : vector<8x16xf32>
    %91 = math.exp %90 : vector<8x16xf32>
    %cst_40 = arith.constant dense<0.000000e+00> : vector<8xf32>
    %92 = vector.multi_reduction <add>, %91, %cst_40 [1] : vector<8x16xf32> to vector<8xf32>
    %93 = vector.shape_cast %92 : vector<8xf32> to vector<8x1xf32>
    %94 = tpu.reciprocal %93 {approx = true} : vector<8x1xf32> -> vector<8x1xf32>
    %95 = vector.broadcast %94 : vector<8x1xf32> to vector<8x16xf32>
    %96 = arith.mulf %91, %95 : vector<8x16xf32>
    %c0_41 = arith.constant 0 : index
    %c3 = arith.constant 3 : index
    %c0_42 = arith.constant 0 : index
    %c0_43 = arith.constant 0 : index
    %97 = vector.load %arg7[%c0_41, %c3, %c0_42, %c0_43] : memref<1x4x8x16xf32, #tpu.memory_space<vmem>>, vector<1x1x8x16xf32>
    %98 = vector.shape_cast %97 : vector<1x1x8x16xf32> to vector<8x16xf32>
    %99 = vector.shape_cast %96 : vector<8x16xf32> to vector<1x1x8x16xf32>
    tpu.vector_store %arg7[%c0_41, %c3, %c0_42, %c0_43], %99 {strides = array<i32>} : memref<1x4x8x16xf32, #tpu.memory_space<vmem>>, vector<1x1x8x16xf32>,
    %100 = arith.truncf %96 : vector<8x16xf32> to vector<8x16xbf16>
    %cst_44 = arith.constant dense<0.000000e+00> : vector<8x32xf32>
    %101 = tpu.matmul %100, %81, %cst_44 {dimension_numbers = #tpu.dot_dimension_numbers<[1], [0], [0], [1], [0, 0, 1, 1], [], []>} : vector<8x16xbf16>, vector<16x32xbf16>, vector<8x32xf32> -> vector<8x32xf32>
    %102 = tpu.concatenate %32, %55, %78, %101 in 1 : vector<8x32xf32>, vector<8x32xf32>, vector<8x32xf32>, vector<8x32xf32> -> vector<8x128xf32>
    %103 = arith.truncf %102 : vector<8x128xf32> to vector<8x128xbf16>
    %c0_45 = arith.constant 0 : index
    %c0_46 = arith.constant 0 : index
    %c0_47 = arith.constant 0 : index
    %104 = vector.load %arg6[%c0_45, %c0_46, %c0_47] : memref<1x8x128xbf16, #tpu.memory_space<vmem>>, vector<1x8x128xbf16>
    %105 = vector.shape_cast %104 : vector<1x8x128xbf16> to vector<8x128xbf16>
    %106 = vector.shape_cast %103 : vector<8x128xbf16> to vector<1x8x128xbf16>
    tpu.vector_store %arg6[%c0_45, %c0_46, %c0_47], %106 {strides = array<i32>} : memref<1x8x128xbf16, #tpu.memory_space<vmem>>, vector<1x8x128xbf16>,
    return
  }
  func.func @transform_0(%arg0: i32, %arg1: i32) -> (i32, i32, i32) {
    %c0_i32 = arith.constant 0 : i32
    %c0_i32_0 = arith.constant 0 : i32
    return %arg0, %arg1, %c0_i32 : i32, i32, i32
  }
  func.func @transform_1(%arg0: i32, %arg1: i32) -> (i32, i32, i32) {
    %c0_i32 = arith.constant 0 : i32
    %c0_i32_0 = arith.constant 0 : i32
    %c0_i32_1 = arith.constant 0 : i32
    return %arg0, %c0_i32, %c0_i32_0 : i32, i32, i32
  }
  func.func @transform_2(%arg0: i32, %arg1: i32) -> (i32, i32, i32) {
    %c0_i32 = arith.constant 0 : i32
    %c1_i32 = arith.constant 1 : i32
    %c0_i32_0 = arith.constant 0 : i32
    return %arg0, %c0_i32, %c1_i32 : i32, i32, i32
  }
  func.func @transform_3(%arg0: i32, %arg1: i32) -> (i32, i32, i32, i32) {
    %c0_i32 = arith.constant 0 : i32
    %c0_i32_0 = arith.constant 0 : i32
    %c0_i32_1 = arith.constant 0 : i32
    %c0_i32_2 = arith.constant 0 : i32
    return %arg0, %c0_i32, %c0_i32_0, %c0_i32_1 : i32, i32, i32, i32
  }
  func.func @transform_4(%arg0: i32, %arg1: i32) -> (i32, i32, i32) {
    %c0_i32 = arith.constant 0 : i32
    %c0_i32_0 = arith.constant 0 : i32
    return %arg0, %arg1, %c0_i32 : i32, i32, i32
  }
  func.func @transform_5(%arg0: i32, %arg1: i32) -> (i32, i32, i32, i32) {
    %c0_i32 = arith.constant 0 : i32
    %c0_i32_0 = arith.constant 0 : i32
    %c0_i32_1 = arith.constant 0 : i32
    return %arg0, %c0_i32, %arg1, %c0_i32_0 : i32, i32, i32, i32
  }
}

module attributes {stable_mosaic.version = 11 : i64} {
  func.func @_ffn_add_ln_kernel(%arg0: i32, %arg1: i32, %arg2: memref<16x128xbf16, #tpu.memory_space<vmem>>, %arg3: memref<128x256xbf16, #tpu.memory_space<vmem>>, %arg4: memref<1x256xf32, #tpu.memory_space<vmem>>, %arg5: memref<256x128xbf16, #tpu.memory_space<vmem>>, %arg6: memref<1x128xf32, #tpu.memory_space<vmem>>, %arg7: memref<1x128xf32, #tpu.memory_space<vmem>>, %arg8: memref<1x128xf32, #tpu.memory_space<vmem>>, %arg9: memref<16x128xf32, #tpu.memory_space<vmem>>, %arg10: memref<16x128xf32, #tpu.memory_space<vmem>>) attributes {dimension_semantics = [#tpu.dimension_semantics<parallel>, #tpu.dimension_semantics<arbitrary>], iteration_bounds = array<i64: 1, 1>, scalar_prefetch = 0 : i64, scratch_operands = 1 : i64, tpu.core_type = #tpu.core_type<tc>, window_params = [{transform_indices = @transform_0, window_bounds = array<i64: 16, 128>}, {transform_indices = @transform_1, window_bounds = array<i64: 128, 256>}, {transform_indices = @transform_2, window_bounds = array<i64: 1, 256>}, {transform_indices = @transform_3, window_bounds = array<i64: 256, 128>}, {pipeline_mode = #tpu.pipeline_mode<synchronous>, transform_indices = @transform_4, window_bounds = array<i64: 1, 128>}, {pipeline_mode = #tpu.pipeline_mode<synchronous>, transform_indices = @transform_5, window_bounds = array<i64: 1, 128>}, {pipeline_mode = #tpu.pipeline_mode<synchronous>, transform_indices = @transform_6, window_bounds = array<i64: 1, 128>}, {transform_indices = @transform_7, window_bounds = array<i64: 16, 128>}]} {
    %c0_i32 = arith.constant 0 : i32
    %0 = arith.cmpi eq, %arg1, %c0_i32 : i32
    %1 = arith.extui %0 : i1 to i32
    %c0_i32_0 = arith.constant 0 : i32
    %2 = arith.cmpi ne, %1, %c0_i32_0 : i32
    scf.if %2 {
      %cst_16 = arith.constant 0.000000e+00 : f32
      %20 = vector.broadcast %cst_16 : f32 to vector<16x128xf32>
      %c0_17 = arith.constant 0 : index
      %c0_18 = arith.constant 0 : index
      %21 = vector.load %arg10[%c0_17, %c0_18] : memref<16x128xf32, #tpu.memory_space<vmem>>, vector<16x128xf32>
      tpu.vector_store %arg10[%c0_17, %c0_18], %20 {strides = array<i32>} : memref<16x128xf32, #tpu.memory_space<vmem>>, vector<16x128xf32>,
    } else {
    }
    %c0 = arith.constant 0 : index
    %c0_1 = arith.constant 0 : index
    %3 = vector.load %arg2[%c0, %c0_1] : memref<16x128xbf16, #tpu.memory_space<vmem>>, vector<16x128xbf16>
    %c0_2 = arith.constant 0 : index
    %c0_3 = arith.constant 0 : index
    %4 = vector.load %arg3[%c0_2, %c0_3] : memref<128x256xbf16, #tpu.memory_space<vmem>>, vector<128x256xbf16>
    %cst = arith.constant dense<0.000000e+00> : vector<16x256xf32>
    %5 = tpu.matmul %3, %4, %cst {dimension_numbers = #tpu.dot_dimension_numbers<[1], [0], [0], [1], [0, 0, 1, 1], [], []>} : vector<16x128xbf16>, vector<128x256xbf16>, vector<16x256xf32> -> vector<16x256xf32>
    %c0_4 = arith.constant 0 : index
    %c0_5 = arith.constant 0 : index
    %6 = vector.load %arg4[%c0_4, %c0_5] : memref<1x256xf32, #tpu.memory_space<vmem>>, vector<1x256xf32>
    %7 = vector.broadcast %6 : vector<1x256xf32> to vector<16x256xf32>
    %8 = arith.addf %5, %7 : vector<16x256xf32>
    %cst_6 = arith.constant 0.000000e+00 : f32
    %9 = vector.broadcast %cst_6 : f32 to vector<16x256xf32>
    %10 = arith.maximumf %8, %9 : vector<16x256xf32>
    %11 = arith.truncf %10 : vector<16x256xf32> to vector<16x256xbf16>
    %c0_7 = arith.constant 0 : index
    %c0_8 = arith.constant 0 : index
    %12 = vector.load %arg10[%c0_7, %c0_8] : memref<16x128xf32, #tpu.memory_space<vmem>>, vector<16x128xf32>
    %c0_9 = arith.constant 0 : index
    %c0_10 = arith.constant 0 : index
    %13 = vector.load %arg5[%c0_9, %c0_10] : memref<256x128xbf16, #tpu.memory_space<vmem>>, vector<256x128xbf16>
    %cst_11 = arith.constant dense<0.000000e+00> : vector<16x128xf32>
    %14 = tpu.matmul %11, %13, %cst_11 {dimension_numbers = #tpu.dot_dimension_numbers<[1], [0], [0], [1], [0, 0, 1, 1], [], []>} : vector<16x256xbf16>, vector<256x128xbf16>, vector<16x128xf32> -> vector<16x128xf32>
    %15 = arith.addf %12, %14 : vector<16x128xf32>
    %c0_12 = arith.constant 0 : index
    %c0_13 = arith.constant 0 : index
    %16 = vector.load %arg10[%c0_12, %c0_13] : memref<16x128xf32, #tpu.memory_space<vmem>>, vector<16x128xf32>
    tpu.vector_store %arg10[%c0_12, %c0_13], %15 {strides = array<i32>} : memref<16x128xf32, #tpu.memory_space<vmem>>, vector<16x128xf32>,
    %c0_i32_14 = arith.constant 0 : i32
    %17 = arith.cmpi eq, %arg1, %c0_i32_14 : i32
    %18 = arith.extui %17 : i1 to i32
    %c0_i32_15 = arith.constant 0 : i32
    %19 = arith.cmpi ne, %18, %c0_i32_15 : i32
    scf.if %19 {
      %c0_16 = arith.constant 0 : index
      %c0_17 = arith.constant 0 : index
      %20 = vector.load %arg10[%c0_16, %c0_17] : memref<16x128xf32, #tpu.memory_space<vmem>>, vector<16x128xf32>
      %c0_18 = arith.constant 0 : index
      %c0_19 = arith.constant 0 : index
      %21 = vector.load %arg6[%c0_18, %c0_19] : memref<1x128xf32, #tpu.memory_space<vmem>>, vector<1x128xf32>
      %22 = vector.broadcast %21 : vector<1x128xf32> to vector<16x128xf32>
      %23 = arith.addf %20, %22 : vector<16x128xf32>
      %c0_20 = arith.constant 0 : index
      %c0_21 = arith.constant 0 : index
      %24 = vector.load %arg2[%c0_20, %c0_21] : memref<16x128xbf16, #tpu.memory_space<vmem>>, vector<16x128xbf16>
      %25 = arith.extf %24 : vector<16x128xbf16> to vector<16x128xf32>
      %26 = arith.addf %23, %25 : vector<16x128xf32>
      %cst_22 = arith.constant dense<0.000000e+00> : vector<16xf32>
      %27 = vector.multi_reduction <add>, %26, %cst_22 [1] : vector<16x128xf32> to vector<16xf32>
      %28 = vector.shape_cast %27 : vector<16xf32> to vector<16x1xf32>
      %cst_23 = arith.constant 1.280000e+02 : f32
      %29 = vector.broadcast %cst_23 : f32 to vector<16x1xf32>
      %30 = arith.divf %28, %29 : vector<16x1xf32>
      %31 = vector.broadcast %30 : vector<16x1xf32> to vector<16x128xf32>
      %32 = arith.subf %26, %31 : vector<16x128xf32>
      %33 = arith.mulf %32, %32 : vector<16x128xf32>
      %cst_24 = arith.constant dense<0.000000e+00> : vector<16xf32>
      %34 = vector.multi_reduction <add>, %33, %cst_24 [1] : vector<16x128xf32> to vector<16xf32>
      %35 = vector.shape_cast %34 : vector<16xf32> to vector<16x1xf32>
      %cst_25 = arith.constant 1.280000e+02 : f32
      %36 = vector.broadcast %cst_25 : f32 to vector<16x1xf32>
      %37 = arith.divf %35, %36 : vector<16x1xf32>
      %38 = vector.broadcast %30 : vector<16x1xf32> to vector<16x128xf32>
      %39 = arith.subf %26, %38 : vector<16x128xf32>
      %cst_26 = arith.constant 9.99999997E-7 : f32
      %40 = vector.broadcast %cst_26 : f32 to vector<16x1xf32>
      %41 = arith.addf %37, %40 : vector<16x1xf32>
      %42 = math.rsqrt %41 : vector<16x1xf32>
      %43 = vector.broadcast %42 : vector<16x1xf32> to vector<16x128xf32>
      %44 = arith.mulf %39, %43 : vector<16x128xf32>
      %c0_27 = arith.constant 0 : index
      %c0_28 = arith.constant 0 : index
      %45 = vector.load %arg7[%c0_27, %c0_28] : memref<1x128xf32, #tpu.memory_space<vmem>>, vector<1x128xf32>
      %46 = vector.broadcast %45 : vector<1x128xf32> to vector<16x128xf32>
      %47 = arith.mulf %44, %46 : vector<16x128xf32>
      %c0_29 = arith.constant 0 : index
      %c0_30 = arith.constant 0 : index
      %48 = vector.load %arg8[%c0_29, %c0_30] : memref<1x128xf32, #tpu.memory_space<vmem>>, vector<1x128xf32>
      %49 = vector.broadcast %48 : vector<1x128xf32> to vector<16x128xf32>
      %50 = arith.addf %47, %49 : vector<16x128xf32>
      %c0_31 = arith.constant 0 : index
      %c0_32 = arith.constant 0 : index
      %51 = vector.load %arg9[%c0_31, %c0_32] : memref<16x128xf32, #tpu.memory_space<vmem>>, vector<16x128xf32>
      tpu.vector_store %arg9[%c0_31, %c0_32], %50 {strides = array<i32>} : memref<16x128xf32, #tpu.memory_space<vmem>>, vector<16x128xf32>,
    } else {
    }
    return
  }
  func.func @transform_0(%arg0: i32, %arg1: i32) -> (i32, i32) {
    %c0_i32 = arith.constant 0 : i32
    %c0_i32_0 = arith.constant 0 : i32
    return %arg0, %c0_i32 : i32, i32
  }
  func.func @transform_1(%arg0: i32, %arg1: i32) -> (i32, i32) {
    %c0_i32 = arith.constant 0 : i32
    %c0_i32_0 = arith.constant 0 : i32
    return %c0_i32, %arg1 : i32, i32
  }
  func.func @transform_2(%arg0: i32, %arg1: i32) -> (i32, i32) {
    %c0_i32 = arith.constant 0 : i32
    %c0_i32_0 = arith.constant 0 : i32
    return %c0_i32, %arg1 : i32, i32
  }
  func.func @transform_3(%arg0: i32, %arg1: i32) -> (i32, i32) {
    %c0_i32 = arith.constant 0 : i32
    %c0_i32_0 = arith.constant 0 : i32
    return %arg1, %c0_i32 : i32, i32
  }
  func.func @transform_4(%arg0: i32, %arg1: i32) -> (i32, i32) {
    %c0_i32 = arith.constant 0 : i32
    %c0_i32_0 = arith.constant 0 : i32
    %c0_i32_1 = arith.constant 0 : i32
    return %c0_i32, %c0_i32_0 : i32, i32
  }
  func.func @transform_5(%arg0: i32, %arg1: i32) -> (i32, i32) {
    %c0_i32 = arith.constant 0 : i32
    %c0_i32_0 = arith.constant 0 : i32
    %c0_i32_1 = arith.constant 0 : i32
    return %c0_i32, %c0_i32_0 : i32, i32
  }
  func.func @transform_6(%arg0: i32, %arg1: i32) -> (i32, i32) {
    %c0_i32 = arith.constant 0 : i32
    %c0_i32_0 = arith.constant 0 : i32
    %c0_i32_1 = arith.constant 0 : i32
    return %c0_i32, %c0_i32_0 : i32, i32
  }
  func.func @transform_7(%arg0: i32, %arg1: i32) -> (i32, i32) {
    %c0_i32 = arith.constant 0 : i32
    %c0_i32_0 = arith.constant 0 : i32
    return %arg0, %c0_i32 : i32, i32
  }
}

module attributes {stable_mosaic.version = 11 : i64} {
  func.func @_linear_add_ln_kernel(%arg0: i32, %arg1: i32, %arg2: memref<16x128xbf16, #tpu.memory_space<vmem>>, %arg3: memref<128x128xbf16, #tpu.memory_space<vmem>>, %arg4: memref<1x128xf32, #tpu.memory_space<vmem>>, %arg5: memref<16x128xbf16, #tpu.memory_space<vmem>>, %arg6: memref<1x128xf32, #tpu.memory_space<vmem>>, %arg7: memref<1x128xf32, #tpu.memory_space<vmem>>, %arg8: memref<16x128xbf16, #tpu.memory_space<vmem>>, %arg9: memref<16x128xf32, #tpu.memory_space<vmem>>) attributes {dimension_semantics = [#tpu.dimension_semantics<parallel>, #tpu.dimension_semantics<arbitrary>], iteration_bounds = array<i64: 1, 1>, scalar_prefetch = 0 : i64, scratch_operands = 1 : i64, tpu.core_type = #tpu.core_type<tc>, window_params = [{transform_indices = @transform_0, window_bounds = array<i64: 16, 128>}, {transform_indices = @transform_1, window_bounds = array<i64: 128, 128>}, {pipeline_mode = #tpu.pipeline_mode<synchronous>, transform_indices = @transform_2, window_bounds = array<i64: 1, 128>}, {transform_indices = @transform_3, window_bounds = array<i64: 16, 128>}, {pipeline_mode = #tpu.pipeline_mode<synchronous>, transform_indices = @transform_4, window_bounds = array<i64: 1, 128>}, {pipeline_mode = #tpu.pipeline_mode<synchronous>, transform_indices = @transform_5, window_bounds = array<i64: 1, 128>}, {transform_indices = @transform_6, window_bounds = array<i64: 16, 128>}]} {
    %c0_i32 = arith.constant 0 : i32
    %0 = arith.cmpi eq, %arg1, %c0_i32 : i32
    %1 = arith.extui %0 : i1 to i32
    %c0_i32_0 = arith.constant 0 : i32
    %2 = arith.cmpi ne, %1, %c0_i32_0 : i32
    scf.if %2 {
      %cst_10 = arith.constant 0.000000e+00 : f32
      %12 = vector.broadcast %cst_10 : f32 to vector<16x128xf32>
      %c0_11 = arith.constant 0 : index
      %c0_12 = arith.constant 0 : index
      %13 = vector.load %arg9[%c0_11, %c0_12] : memref<16x128xf32, #tpu.memory_space<vmem>>, vector<16x128xf32>
      tpu.vector_store %arg9[%c0_11, %c0_12], %12 {strides = array<i32>} : memref<16x128xf32, #tpu.memory_space<vmem>>, vector<16x128xf32>,
    } else {
    }
    %c0 = arith.constant 0 : index
    %c0_1 = arith.constant 0 : index
    %3 = vector.load %arg9[%c0, %c0_1] : memref<16x128xf32, #tpu.memory_space<vmem>>, vector<16x128xf32>
    %c0_2 = arith.constant 0 : index
    %c0_3 = arith.constant 0 : index
    %4 = vector.load %arg2[%c0_2, %c0_3] : memref<16x128xbf16, #tpu.memory_space<vmem>>, vector<16x128xbf16>
    %c0_4 = arith.constant 0 : index
    %c0_5 = arith.constant 0 : index
    %5 = vector.load %arg3[%c0_4, %c0_5] : memref<128x128xbf16, #tpu.memory_space<vmem>>, vector<128x128xbf16>
    %cst = arith.constant dense<0.000000e+00> : vector<16x128xf32>
    %6 = tpu.matmul %4, %5, %cst {dimension_numbers = #tpu.dot_dimension_numbers<[1], [0], [0], [1], [0, 0, 1, 1], [], []>} : vector<16x128xbf16>, vector<128x128xbf16>, vector<16x128xf32> -> vector<16x128xf32>
    %7 = arith.addf %3, %6 : vector<16x128xf32>
    %c0_6 = arith.constant 0 : index
    %c0_7 = arith.constant 0 : index
    %8 = vector.load %arg9[%c0_6, %c0_7] : memref<16x128xf32, #tpu.memory_space<vmem>>, vector<16x128xf32>
    tpu.vector_store %arg9[%c0_6, %c0_7], %7 {strides = array<i32>} : memref<16x128xf32, #tpu.memory_space<vmem>>, vector<16x128xf32>,
    %c0_i32_8 = arith.constant 0 : i32
    %9 = arith.cmpi eq, %arg1, %c0_i32_8 : i32
    %10 = arith.extui %9 : i1 to i32
    %c0_i32_9 = arith.constant 0 : i32
    %11 = arith.cmpi ne, %10, %c0_i32_9 : i32
    scf.if %11 {
      %c0_10 = arith.constant 0 : index
      %c0_11 = arith.constant 0 : index
      %12 = vector.load %arg9[%c0_10, %c0_11] : memref<16x128xf32, #tpu.memory_space<vmem>>, vector<16x128xf32>
      %c0_12 = arith.constant 0 : index
      %c0_13 = arith.constant 0 : index
      %13 = vector.load %arg4[%c0_12, %c0_13] : memref<1x128xf32, #tpu.memory_space<vmem>>, vector<1x128xf32>
      %14 = vector.broadcast %13 : vector<1x128xf32> to vector<16x128xf32>
      %15 = arith.addf %12, %14 : vector<16x128xf32>
      %c0_14 = arith.constant 0 : index
      %c0_15 = arith.constant 0 : index
      %16 = vector.load %arg5[%c0_14, %c0_15] : memref<16x128xbf16, #tpu.memory_space<vmem>>, vector<16x128xbf16>
      %17 = arith.extf %16 : vector<16x128xbf16> to vector<16x128xf32>
      %18 = arith.addf %15, %17 : vector<16x128xf32>
      %cst_16 = arith.constant dense<0.000000e+00> : vector<16xf32>
      %19 = vector.multi_reduction <add>, %18, %cst_16 [1] : vector<16x128xf32> to vector<16xf32>
      %20 = vector.shape_cast %19 : vector<16xf32> to vector<16x1xf32>
      %cst_17 = arith.constant 1.280000e+02 : f32
      %21 = vector.broadcast %cst_17 : f32 to vector<16x1xf32>
      %22 = arith.divf %20, %21 : vector<16x1xf32>
      %23 = vector.broadcast %22 : vector<16x1xf32> to vector<16x128xf32>
      %24 = arith.subf %18, %23 : vector<16x128xf32>
      %25 = arith.mulf %24, %24 : vector<16x128xf32>
      %cst_18 = arith.constant dense<0.000000e+00> : vector<16xf32>
      %26 = vector.multi_reduction <add>, %25, %cst_18 [1] : vector<16x128xf32> to vector<16xf32>
      %27 = vector.shape_cast %26 : vector<16xf32> to vector<16x1xf32>
      %cst_19 = arith.constant 1.280000e+02 : f32
      %28 = vector.broadcast %cst_19 : f32 to vector<16x1xf32>
      %29 = arith.divf %27, %28 : vector<16x1xf32>
      %30 = vector.broadcast %22 : vector<16x1xf32> to vector<16x128xf32>
      %31 = arith.subf %18, %30 : vector<16x128xf32>
      %cst_20 = arith.constant 9.99999997E-7 : f32
      %32 = vector.broadcast %cst_20 : f32 to vector<16x1xf32>
      %33 = arith.addf %29, %32 : vector<16x1xf32>
      %34 = math.rsqrt %33 : vector<16x1xf32>
      %35 = vector.broadcast %34 : vector<16x1xf32> to vector<16x128xf32>
      %36 = arith.mulf %31, %35 : vector<16x128xf32>
      %c0_21 = arith.constant 0 : index
      %c0_22 = arith.constant 0 : index
      %37 = vector.load %arg6[%c0_21, %c0_22] : memref<1x128xf32, #tpu.memory_space<vmem>>, vector<1x128xf32>
      %38 = vector.broadcast %37 : vector<1x128xf32> to vector<16x128xf32>
      %39 = arith.mulf %36, %38 : vector<16x128xf32>
      %c0_23 = arith.constant 0 : index
      %c0_24 = arith.constant 0 : index
      %40 = vector.load %arg7[%c0_23, %c0_24] : memref<1x128xf32, #tpu.memory_space<vmem>>, vector<1x128xf32>
      %41 = vector.broadcast %40 : vector<1x128xf32> to vector<16x128xf32>
      %42 = arith.addf %39, %41 : vector<16x128xf32>
      %43 = arith.truncf %42 : vector<16x128xf32> to vector<16x128xbf16>
      %c0_25 = arith.constant 0 : index
      %c0_26 = arith.constant 0 : index
      %44 = vector.load %arg8[%c0_25, %c0_26] : memref<16x128xbf16, #tpu.memory_space<vmem>>, vector<16x128xbf16>
      tpu.vector_store %arg8[%c0_25, %c0_26], %43 {strides = array<i32>} : memref<16x128xbf16, #tpu.memory_space<vmem>>, vector<16x128xbf16>,
    } else {
    }
    return
  }
  func.func @transform_0(%arg0: i32, %arg1: i32) -> (i32, i32) {
    %c0_i32 = arith.constant 0 : i32
    return %arg0, %arg1 : i32, i32
  }
  func.func @transform_1(%arg0: i32, %arg1: i32) -> (i32, i32) {
    %c0_i32 = arith.constant 0 : i32
    %c0_i32_0 = arith.constant 0 : i32
    return %arg1, %c0_i32 : i32, i32
  }
  func.func @transform_2(%arg0: i32, %arg1: i32) -> (i32, i32) {
    %c0_i32 = arith.constant 0 : i32
    %c0_i32_0 = arith.constant 0 : i32
    %c0_i32_1 = arith.constant 0 : i32
    return %c0_i32, %c0_i32_0 : i32, i32
  }
  func.func @transform_3(%arg0: i32, %arg1: i32) -> (i32, i32) {
    %c0_i32 = arith.constant 0 : i32
    %c0_i32_0 = arith.constant 0 : i32
    return %arg0, %c0_i32 : i32, i32
  }
  func.func @transform_4(%arg0: i32, %arg1: i32) -> (i32, i32) {
    %c0_i32 = arith.constant 0 : i32
    %c0_i32_0 = arith.constant 0 : i32
    %c0_i32_1 = arith.constant 0 : i32
    return %c0_i32, %c0_i32_0 : i32, i32
  }
  func.func @transform_5(%arg0: i32, %arg1: i32) -> (i32, i32) {
    %c0_i32 = arith.constant 0 : i32
    %c0_i32_0 = arith.constant 0 : i32
    %c0_i32_1 = arith.constant 0 : i32
    return %c0_i32, %c0_i32_0 : i32, i32
  }
  func.func @transform_6(%arg0: i32, %arg1: i32) -> (i32, i32) {
    %c0_i32 = arith.constant 0 : i32
    %c0_i32_0 = arith.constant 0 : i32
    return %arg0, %c0_i32 : i32, i32
  }
}

</mosaic_0001>

<bundles_post_ra>
// kernel: decoder_layer.8
= control target key start
LH: loop header
LB: loop body
LE: loop exit
PB: predicated region body
PF: predicated region fallthrough
CT: control target
= control target key end

     0   :  { %8 = vsyncpa [#allocation4], 0  ;;  %s862_s0 = inlined_call_operand.vmem [shape: f32[16,128], index: 0, kind: input, shape index: {}]   ;;  %s863_s1 = inlined_call_operand.hbm [shape: bf16[128,384], index: 1, kind: input, shape index: {}]   ;;  %s864_s2 = inlined_call_operand.vmem [shape: f32[1,384], index: 2, kind: input, shape index: {}]   ;;  %s865_s3 = inlined_call_operand.vmem [shape: bf16[16,384], index: 3, kind: output, shape index: {}]  }
   0x1   :  { %10 = vsyncpa [#allocation4 + $0x1], 0  ;;  %s753_s12 = smov 0   ;;  %s755_s13 = smov 0  }
   0x2   :  { %s757_s14 = smov 0   ;;  %s759_s15 = smov 0  }
   0x3   :  { %s761_s16 = smov 0   ;;  %s763_s17 = smov 0  }
   0x4 LB: > { %s530_s18 = sadd.s32 4294967295, %s728_s17   ;;  %s31_s19 = sadd.s32 1, %s724_s16  ;;  %s728_s17 = sphi %s763_s17, %s16_s17   ;;  %s724_s16 = sphi %s761_s16, %s873_s16   ;;  %s720_s15 = sphi %s759_s15, %s872_s15   ;;  %s716_s14 = sphi %s757_s14, %s871_s14   ;;  %s712_s13 = sphi %s755_s13, %s870_s13   ;;  %s708_s12 = sphi %s753_s12, %s869_s12  }
   0x5   : > { %p33_p0 = scmp.ge.s32.totalorder %s31_s19, 3  ;;  %s72_s20 = sadd.s32 1, %s716_s14 }
   0x6   : > { %p79_p1 = scmp.ne.s32.totalorder %s716_s14, %s712_s13  ;;  %p80_p2 = scmp.eq.s32.totalorder %s728_s17, 0 }
   0x7   : > { %s875_s19 = smov (%p33_p0, %s31_s19), 0  ;;  %p85_p4 = scmp.ne.s32.totalorder %s712_s13, %s708_s12 }
   0x8   : > { %p789_p3 = por %p80_p2, %p79_p1  ;;  %s68_s22 = ssub.s32 %s724_s16, %s875_s19 }
   0x9   : > { %p86_p5 = scmp.eq.s32.totalorder %s530_s18, 0  ;;  %p70_p6 = scmp.eq.s32.totalorder %s68_s22, 0 }
   0xa   : > { %p137_p7 = scmp.eq.s32.totalorder %s530_s18, 2  ;;  %p595_p10 = scmp.lt.s32.totalorder %s728_s17, 3 }
   0xb   : > { %p796_p8 = por %p86_p5, %p85_p4  ;;  %s175_s26 = sand.u32 1, %s716_s14  }
   0xc   : > { %s801_s24 = scalar_select %p70_p6, %s716_s14, %s72_s20  }
   0xd   : > { %p803_p9 = por %p137_p7, %p79_p1  ;;  %s536_s27 = sshll.u32 %s724_s16, 2 }
   0xe   : > { %s535_s28 = sshll.u32 %s175_s26, 6  ;;  %s186_s4 = scalar_lea.hbm %s863_s1, %s536_s27 }
   0xf   : > { %s187_s5 = sshll.u32 %s186_s4, 4  ;;  %s179_s6 = scalar_lea.vmem [#allocation3], %s535_s28  ;;  %s188_s5 = int_to_ptr.hbm [resolvable:$true] %s187_s5 }
  0x10   : > { %s189_s7 = sshll.u32 %s179_s6, 4  ;;  %p592_p11 = pnand %p595_p10, %p789_p3  ;;  %s190_s7 = int_to_ptr.vmem [resolvable:$true] %s189_s7 }
  0x11   : > { %p537_p12 = scmp.ge.s32.totalorder %s728_s17, 1  ;;  %s176_s8 = scalar_lea.sflag [#allocation4], %s175_s26 }
  0x12   : > { %s730_s9 = smov 192   ;;  %s731_s10 = smov 64  }
  0x13   : > { %s732_s11 = smov 4   ;;  %p203_p13 = scmp.lt.s32.totalorder %s728_s17, 4 }
  0x14   : > { %594 = dma.hbm_to_vmem [thread:$0]  (!%p592_p11), %s188_s5, 1024, %s190_s7, %s176_s8, %s730_s9, %s731_s10, %s732_s11  }
  0x15   : > { %p204_p0 = pnand %p537_p12, %p203_p13 }
  0x16   : > { %s818_s12 = sand.u32 (!%p204_p0), 1, %s712_s13  }
  0x17   : > { %207 = sbr.rel (%p204_p0) target bundleno = 209 (0xd1), region = 32  ;;  %s538_s18 = sshll.u32 (!%p204_p0), %s818_s12, 6 }
  0x18   : > { %s210_s20 = scalar_lea.sflag (!%p204_p0), [#allocation4], %s818_s12  ;;  %s213_s22 = scalar_lea.vmem (!%p204_p0), [#allocation3], %s538_s18 }
  0x1c   : > { %703 = dma.done.wait (%p796_p8), %s210_s20, 1024  }
  0x1d   : > { %705 = vsyncadd (%p796_p8), %s210_s20, 4294966272  ;;  %p257_p1 = scmp.lt.s32.totalorder %s720_s15, 2  ;;  %v583_v0 = vld [vmem:[%s213_s22 + $0x38] sm:$0xff]  ;;  %v582_v1 = vld [vmem:[%s213_s22 + $0x30] sm:$0xff]  ;;  %s539_s5 = sshll.u32 %s818_s12, 3 }
  0x1e   : > { %336 = vmatpush.bf16.msra.mxu0 %v583_v0  ;;  %v581_v2 = vld [vmem:[%s213_s22 + $0x28] sm:$0xff]  ;;  %v580_v3 = vld [vmem:[%s213_s22 + $0x20] sm:$0xff]  ;;  %v579_v4 = vld [vmem:[%s213_s22 + $0x18] sm:$0xff]  ;;  %s246_s6 = scalar_lea.vmem [#allocation5], %s539_s5  ;;  %s573_s7 = sshll.u32 (%p803_p9), %s720_s15, 2 }
  0x1f   : > { %s258_s21 = scalar_select %p257_p1, %s720_s15, 2  ;;  %v578_v5 = vld [vmem:[%s213_s22 + $0x10] sm:$0xff]  ;;  %v577_v6 = vld [vmem:[%s213_s22 + $0x8] sm:$0xff]  ;;  %v576_v7 = vld [vmem:[%s213_s22] sm:$0xff] }
  0x20   : > { %v269_v8 = vld [vmem:[%s862_s0] sm:$0xff]  ;;  %v270_v9 = vld [vmem:[%s862_s0 + $0x8] sm:$0xff]  ;;  %s380_s10 = scalar_lea.vmem (%p803_p9), %s865_s3, %s573_s7 }
  0x21   : > { %s259_s28 = scalar_lea.vmem %s864_s2, %s258_s21  ;;  %v271_v10 = vpack.c.bf16 %v270_v9, %v269_v8 }
  0x22   : > { %337 = vmatpush.bf16.msra.mxu0 %v582_v1  ;;  %v647_v12 = vld [vmem:[%s259_s28] ss:$0 sm:$0xff] }
  0x26   : > { %338 = vmatpush.bf16.msra.mxu0 %v581_v2 }
  0x2a   : > { %339 = vmatpush.bf16.msra.mxu0 %v580_v3 }
  0x2e   : > { %340 = vmatpush.bf16.msra.mxu0 %v579_v4 }
  0x32   : > { %341 = vmatpush.bf16.msra.mxu0 %v578_v5 }
  0x36   : > { %342 = vmatpush.bf16.msra.mxu0 %v577_v6 }
  0x3a   : > { %343 = vmatpush.bf16.msra.mxu0 %v576_v7 }
  0x3d   : > { %344 = vmatmul.bf16.vlgmr.msra.gmra.mxu0 %v271_v10 }
  0xba   : > { %v345_v11 = vpop.f32.mrf.mxu0 }
  0xbb   : > { %v363_v14 = vadd.f32 %v647_v12, %v345_v11 }
  0xc2   : > { %v347_v13 = vpop.f32.mrf.mxu0 }
  0xc3   : > { %v364_v15 = vadd.f32 %v647_v12, %v347_v13  ;;  %375 = sbr.rel (!%p803_p9) target bundleno = 209 (0xd1), region = 48 }
  0xc5   : > { %v587_v16 = vpack.c.bf16 %v364_v15, %v363_v14 }
  0xc7   : > { %588 = vst [vmem:[%s246_s6] sm:$0xff] %v587_v16  }
  0xce   : > { %v397_v17 = vld [vmem:[%s246_s6] sm:$0xf]  ;;  %v399_v18 = vld [vmem:[%s246_s6 + $0x4] sm:$0xf] }
  0xcf   : > { %398 = vst [vmem:[%s380_s10] sm:$0xf] %v397_v17 }
  0xd0   : > { %400 = vst [vmem:[%s380_s10 + $0xc] sm:$0xf] %v399_v18 }
  0xd1 PF: > { %s16_s17 = sadd.s32 1, %s728_s17   ;;  %s869_s12 = smov %s712_s13 }
  0xd2   : > { %p13_p2 = scmp.ge.s32.totalorder %s16_s17, 5   ;;  %s870_s13 = smov %s716_s14 }
  0xd3   : > { %s871_s14 = smov %s801_s24  ;;  %s872_s15 = smov %s724_s16 }
  0xd4   : > { %s873_s16 = smov %s875_s19  ;;  %15 = sbr.rel (!%p13_p2) target bundleno = 4 (0x4), region = 127 }
  0xd9   :  { %438 = vsyncpa [#allocation4], 1 }
  0xda   :  { %440 = vsyncpa [#allocation4 + $0x1], 1 }

// kernel: decoder_layer.9
= control target key start
LH: loop header
LB: loop body
LE: loop exit
PB: predicated region body
PF: predicated region fallthrough
CT: control target
= control target key end

     0   :  { %11 = vsyncpa [#allocation3], 0  ;;  %s1194_s0 = inlined_call_operand.vmem [shape: bf16[2,8,384], index: 0, kind: input, shape index: {}, may-alias: {0,1,2}]   ;;  %s1195_s1 = inlined_call_operand.vmem [shape: bf16[2,8,384], index: 1, kind: input, shape index: {}, may-alias: {0,1,2}]   ;;  %s1196_s2 = inlined_call_operand.vmem [shape: bf16[2,8,384], index: 2, kind: input, shape index: {}, may-alias: {0,1,2}]   ;;  %s1197_s3 = inlined_call_operand.vmem [shape: f32[1,1,8,8], index: 3, kind: input, shape index: {}]   ;;  %s1198_s4 = inlined_call_operand.vmem [shape: bf16[2,8,128], index: 4, kind: output, shape index: {0}]   ;;  %s1199_s5 = inlined_call_operand.hbm [shape: f32[2,4,8,8], index: 5, kind: output, shape index: {1}]  }
   0x1   :  { %13 = vsyncpa [#allocation3 + $0x1], 0  ;;  %s1015_s18 = smov 0   ;;  %s1017_s19 = smov 0  }
   0x2   :  { %s1019_s20 = smov 0   ;;  %s1021_s21 = smov 0  }
   0x3   :  { %s1023_s22 = smov 0   ;;  %s1025_s23 = smov 0  }
   0x4 LB: > { %s793_s24 = sadd.s32 4294967295, %s978_s23   ;;  %s794_s25 = sadd.s32 4294967294, %s978_s23   ;;  %s978_s23 = sphi %s1025_s23, %s19_s23   ;;  %s974_s22 = sphi %s1023_s22, %s1210_s22   ;;  %s970_s21 = sphi %s1021_s21, %s1209_s21   ;;  %s966_s20 = sphi %s1019_s20, %s1208_s20   ;;  %s962_s19 = sphi %s1017_s19, %s1207_s19   ;;  %s958_s18 = sphi %s1015_s18, %s1206_s18  }
   0x5   : > { %s31_s26 = sadd.s32 1, %s974_s22  ;;  %s174_s27 = sadd.s32 1, %s966_s20 }
   0x6   : > { %p33_p0 = scmp.ge.s32.totalorder %s31_s26, 2  ;;  %p184_p1 = scmp.ne.s32.totalorder %s966_s20, %s962_s19 }
   0x7   : > { %p185_p2 = scmp.eq.s32.totalorder %s793_s24, 1  ;;  %p190_p3 = scmp.ne.s32.totalorder %s962_s19, %s958_s18 }
   0x8   : > { %s1212_s26 = smov (%p33_p0, %s31_s26), 0  ;;  %p191_p5 = scmp.eq.s32.totalorder %s794_s25, 1 }
   0x9   : > { %p1055_p4 = por %p185_p2, %p184_p1  ;;  %s169_s29 = ssub.s32 %s974_s22, %s1212_s26 }
   0xa   : > { %p798_p6 = scmp.ge.s32.totalorder %s978_s23, 1  ;;  %p172_p7 = scmp.eq.s32.totalorder %s169_s29, 0 }
   0xb   : > { %p1062_p8 = por %p191_p5, %p190_p3  ;;  %p246_p9 = scmp.lt.s32.totalorder %s978_s23, 3 }
   0xc   : > { %s1068_s6 = scalar_select %p172_p7, %s966_s20, %s174_s27  }
   0xd   : > { %p247_p10 = pnand %p798_p6, %p246_p9 }
   0xe   : > { %p301_p11 = scmp.lt.s32.totalorder (!%p247_p10), %s970_s21, 1  ;;  %s1201_s15 = smov (!%p247_p10), 64  }
   0xf   : > { %250 = sbr.rel (%p247_p10) target bundleno = 1096 (0x448), region = 36  ;;  %s981_s16 = smov (!%p247_p10), 32  }
  0x10   : > { %s1200_s25 = smov (!%p247_p10), 96   ;;  %s298_s10 = sand.u32 (!%p247_p10), 1, %s962_s19  }
  0x11   : > { %s822_s12 = sshll.u32 (!%p247_p10), %s970_s21, 5  ;;  %s611_s29 = scalar_lea.sflag (!%p247_p10), [#allocation3], %s298_s10 }
  0x12   : > { %s626_s17 = scalar_lea.hbm (!%p247_p10), %s1199_s5, %s822_s12 }
  0x13   : > { %s629_s27 = sshll.u32 (!%p247_p10), %s626_s17, 4  ;;  %s630_s27 = int_to_ptr.hbm [resolvable:$true] %s629_s27 }
  0x14   : > { %s1072_s7 = scalar_select %p301_p11, %s970_s21, 1  ;;  %vm339_vm0 = vcmask 261120   ;;  %v337_v7 = vld [vmem:[%s1197_s3] sm:$0xff]  ;;  %vm361_vm1 = vcmask 64512   ;;  %vm378_vm2 = vcmask 1043456  }
  0x15   : > { %v1094_v8 = vmul.f32 -1e+09, %v337_v7 }
  0x16   : > { %s1075_s8 = smul.u32 12, %s1072_s7 }
  0x18   : > { %s707_s11 = scalar_lea.vmem %s1195_s1, %s1075_s8  ;;  %s309_s14 = scalar_lea.vmem %s1194_s0, %s1075_s8 }
  0x19   : > { %v804_v0 = vld [vmem:[%s707_s11 + $0x4] sm:$0xf]  ;;  %v334_v2 = vld [vmem:[%s309_s14] sm:$0xf]  ;;  %s711_s9 = scalar_lea.vmem %s1196_s2, %s1075_s8  ;;  %s799_s11 = sshll.u32 %s298_s10, 5 }
  0x1a   : > { %v344_v1 = vsel %vm339_vm0, %v804_v0, 0  ;;  %v401_v3 = vunpack.c.l.b16 %v804_v0  ;;  %v396_v5 = vunpack.c.l.b16 %v334_v2  ;;  %v805_v24 = vld [vmem:[%s711_s9 + $0x8] sm:$0xf]  ;;  %s1113_s8 = scalar_lea.vmem [#allocation2], %s799_s11  ;;  %s914_s9 = sshra.s32 %s630_s27, 4  ;;  %s915_s9 = int_to_ptr.hbm [resolvable:$true] %s914_s9 }
  0x1b   : > { %353 = vmatpush.bf16.xpose.msra.mxu0 %v344_v1  ;;  %v380_v25 = vsel %vm378_vm2, %v805_v24, 0  ;;  %v441_v51 = vunpack.c.l.b16 %v805_v24  ;;  %s627_s24 = sshll.u32 %s1113_s8, 4  ;;  %s916_s11 = scalar_lea.hbm %s915_s9, 32  ;;  %s628_s24 = int_to_ptr.vmem [resolvable:$true] %s627_s24 }
  0x1c   : > { %v402_v4 = vpack.c.b16 %v401_v3, %v401_v3  ;;  %v397_v6 = vpack.c.b16 %v396_v5, %v396_v5  ;;  %389 = vmatpush.bf16.msra.mxu1 %v380_v25  ;;  %p917_p12 = scmp.ne.s32.totalorder %s915_s9, %s916_s11  ;;  %p921_p1 = scmp.lt.s32.totalorder %s915_s9, %s1199_s5 }
  0x1d   : > { %v442_v52 = vpack.c.b16 %v441_v51, %v441_v51 }
  0x1e   : > { %466 = vrot.lane.b32.xlu2 %v402_v4, %s1201_s15  ;;  %p918_p13 = pnand %p917_p12, %p1055_p4 }
  0x20   : > { %p919_p0 = pneg %p918_p13 }
  0x22   : > { %806 = vmatmul.msk.bf16.vlgmr.msra.gmra.mxu0 %vm339_vm0, %v334_v2 }
  0x26   : > { %526 = vrot.lane.b32.xlu2 %v402_v4, %s981_s16 }
  0x2e   : > { %464 = vrot.lane.b32.xlu2 %v397_v6, %s1201_s15 }
  0x36   : > { %524 = vrot.lane.b32.xlu2 %v397_v6, %s981_s16 }
  0x78   : > { %v467_v14 = vpop.permute.xlu2 %466 }
  0x79   : > { %v472_v26 = vsel %vm339_vm0, %v467_v14, 0 }
  0x7a   : > { %481 = vmatpush.bf16.xpose.msrb.mxu1 %v472_v26 }
  0x80   : > { %v527_v15 = vpop.permute.xlu2 %526 }
  0x81   : > { %v532_v20 = vsel %vm339_vm0, %v527_v15, 0 }
  0x82   : > { %541 = vmatpush.bf16.xpose.msrb.mxu0 %v532_v20 }
  0x88   : > { %v465_v19 = vpop.permute.xlu2 %464 }
  0x90   : > { %v525_v23 = vpop.permute.xlu2 %524 }
  0x91   : > { %814 = vmatmul.msk.bf16.vlgmr.msrb.gmra.mxu0 %vm339_vm0, %v525_v23 }
  0x9f   : > { %v355_v9 = vpop.f32.mrf.mxu0 }
  0xa0   : > { %v359_v10 = vmul.f32 0.17677669, %v355_v9 }
  0xa2   : > { %v360_v11 = vadd.f32 %v359_v10, %v1094_v8 }
  0xa4   : > { %v362_v12 = vsel %vm361_vm1, %v360_v11, -inf }
  0xa5   : > { %363 = vmax.xlane.f32.xlu0 %v362_v12 }
  0xa7   : > { %v357_v13 = vpop.f32.mrf.mxu0 }
  0xb9   : > { %403 = vrot.lane.b32.xlu0 %v402_v4, %s1200_s25 }
 0x10e   : > { %v543_v33 = vpop.f32.mrf.mxu0 }
 0x10f   : > { %v547_v34 = vmul.f32 0.17677669, %v543_v33 }
 0x111   : > { %v548_v35 = vadd.f32 %v547_v34, %v1094_v8 }
 0x113   : > { %v549_v36 = vsel %vm361_vm1, %v548_v35, -inf }
 0x116   : > { %v545_v37 = vpop.f32.mrf.mxu0 }
 0x118   : > { %v364_v16 = vpop.xlane.xlu0 %363 }
 0x119   : > { %v365_v17 = vsub.f32 %v360_v11, %v364_v16 }
 0x11b   : > { %v366_v18 = vmul.f32 1.442695, %v365_v17 }
 0x11d   : > { %884 = vpow2.f32 %v366_v18 }
 0x123   : > { %v885_v21 = vpop.eup %884 }
 0x124   : > { %v368_v22 = vsel %vm361_vm1, %v885_v21, 0.0 }
 0x125   : > { %369 = vadd.xlane.f32.xlu1 %v368_v22 }
 0x12b   : > { %v404_v27 = vpop.permute.xlu0 %403 }
 0x12c   : > { %v409_v28 = vsel %vm339_vm0, %v404_v27, 0 }
 0x12d   : > { %418 = vmatpush.bf16.xpose.msra.mxu2 %v409_v28 }
 0x13e   : > { %398 = vrot.lane.b32.xlu1 %v397_v6, %s1200_s25 }
 0x168   : > { %550 = vmax.xlane.f32.xlu1 %v549_v36 }
 0x198   : > { %v370_v29 = vpop.xlane.xlu1 %369 }
 0x199   : > { %886 = vrcp.f32 %v370_v29 }
 0x19f   : > { %v887_v30 = vpop.eup %886 }
 0x1a0   : > { %v372_v31 = vmul.f32 %v887_v30, %v885_v21 }
 0x1a2   : > { %373 = vst.msk [vmem:[%s1113_s8] sm:$0xff] %vm361_vm1, %v372_v31  ;;  %v374_v32 = vpack.c.bf16 %v372_v31, %v372_v31 }
 0x1a4   : > { %807 = vmatmul.msk.bf16.vlgmr.msra.gmra.mxu1 %vm361_vm1, %v374_v32 }
 0x1b0   : > { %v399_v38 = vpop.permute.xlu1 %398 }
 0x1b1   : > { %808 = vmatmul.msk.bf16.vlgmr.msra.gmra.mxu2 %vm339_vm0, %v399_v38 }
 0x1b4   : > { %811 = vmatmul.msk.bf16.vlgmr.msrb.gmra.mxu1 %vm339_vm0, %v465_v19 }
 0x1db   : > { %v551_v55 = vpop.xlane.xlu1 %550 }
 0x1dc   : > { %v552_v59 = vsub.f32 %v548_v35, %v551_v55 }
 0x1de   : > { %v553_v61 = vmul.f32 1.442695, %v552_v59 }
 0x221   : > { %v1122_v39 = vpop.f32.mrf.mxu1 }
 0x229   : > { %v393_v40 = vpop.f32.mrf.mxu1 }
 0x231   : > { %v483_v41 = vpop.f32.mrf.mxu1 }
 0x232   : > { %v487_v42 = vmul.f32 0.17677669, %v483_v41 }
 0x234   : > { %v420_v43 = vpop.f32.mrf.mxu2  ;;  %v488_v44 = vadd.f32 %v487_v42, %v1094_v8 }
 0x235   : > { %v424_v45 = vmul.f32 0.17677669, %v420_v43 }
 0x236   : > { %v489_v46 = vsel %vm361_vm1, %v488_v44, -inf }
 0x237   : > { %490 = vmax.xlane.f32.xlu2 %v489_v46  ;;  %v425_v47 = vadd.f32 %v424_v45, %v1094_v8 }
 0x239   : > { %v485_v48 = vpop.f32.mrf.mxu1  ;;  %v426_v49 = vsel %vm361_vm1, %v425_v47, -inf }
 0x23a   : > { %427 = vmax.xlane.f32.xlu0 %v426_v49 }
 0x23c   : > { %v422_v50 = vpop.f32.mrf.mxu2 }
 0x24f   : > { %443 = vrot.lane.b32.xlu2 %v442_v52, %s1200_s25  ;;  %s920_s25 = scalar_lea.hbm %s1199_s5, 64 }
 0x250   : > { %p922_p2 = scmp.lt.s32.totalorder %s920_s25, %s916_s11 }
 0x252   : > { %p923_p3 = por %p922_p2, %p921_p1 }
 0x254   : > { %p924_p5 = pnand %p923_p3, %p919_p0 }
 0x2aa   : > { %v491_v53 = vpop.xlane.xlu2 %490 }
 0x2ab   : > { %v492_v54 = vsub.f32 %v488_v44, %v491_v53 }
 0x2ad   : > { %v493_v56 = vmul.f32 1.442695, %v492_v54  ;;  %v428_v57 = vpop.xlane.xlu0 %427 }
 0x2ae   : > { %v429_v58 = vsub.f32 %v425_v47, %v428_v57 }
 0x2af   : > { %888 = vpow2.f32 %v493_v56 }
 0x2b0   : > { %v430_v60 = vmul.f32 1.442695, %v429_v58 }
 0x2b2   : > { %890 = vpow2.f32 %v430_v60  ;;  %v444_v4 = vpop.permute.xlu2 %443 }
 0x2b3   : > { %892 = vpow2.f32 %v553_v61  ;;  %v449_v5 = vsel %vm378_vm2, %v444_v4, 0 }
 0x2b4   : > { %458 = vmatpush.bf16.msra.mxu3 %v449_v5 }
 0x2b5   : > { %v889_v62 = vpop.eup %888 }
 0x2b6   : > { %v495_v63 = vsel %vm361_vm1, %v889_v62, 0.0 }
 0x2b7   : > { %496 = vadd.xlane.f32.xlu1 %v495_v63 }
 0x2b8   : > { %v891_v0 = vpop.eup %890 }
 0x2b9   : > { %v432_v1 = vsel %vm361_vm1, %v891_v0, 0.0  ;;  %v893_v2 = vpop.eup %892 }
 0x2ba   : > { %433 = vadd.xlane.f32.xlu0 %v432_v1  ;;  %v555_v3 = vsel %vm361_vm1, %v893_v2, 0.0 }
 0x2c2   : > { %556 = vadd.xlane.f32.xlu0 %v555_v3 }
 0x2d0   : > { %503 = vrot.lane.b32.xlu1 %v442_v52, %s1201_s15 }
 0x2d6   : > { %563 = vrot.lane.b32.xlu0 %v442_v52, %s981_s16 }
 0x32a   : > { %v497_v6 = vpop.xlane.xlu1 %496 }
 0x32b   : > { %894 = vrcp.f32 %v497_v6 }
 0x32d   : > { %v434_v7 = vpop.xlane.xlu0 %433 }
 0x32e   : > { %896 = vrcp.f32 %v434_v7 }
 0x331   : > { %v895_v8 = vpop.eup %894 }
 0x332   : > { %v499_v9 = vmul.f32 %v895_v8, %v889_v62 }
 0x334   : > { %v897_v10 = vpop.eup %896  ;;  %812 = vst.msk [vmem:[%s1113_s8 + $0x10] sm:$0xff] %vm361_vm1, %v499_v9  ;;  %v502_v18 = vpack.c.bf16 %v499_v9, %v499_v9 }
 0x335   : > { %v557_v11 = vpop.xlane.xlu0 %556  ;;  %v436_v12 = vmul.f32 %v897_v10, %v891_v0 }
 0x336   : > { %898 = vrcp.f32 %v557_v11 }
 0x337   : > { %809 = vst.msk [vmem:[%s1113_s8 + $0x8] sm:$0xff] %vm361_vm1, %v436_v12  ;;  %v439_v13 = vpack.c.bf16 %v436_v12, %v436_v12 }
 0x339   : > { %810 = vmatmul.msk.bf16.vlgmr.msra.gmra.mxu3 %vm361_vm1, %v439_v13 }
 0x33c   : > { %v899_v14 = vpop.eup %898 }
 0x33d   : > { %v559_v15 = vmul.f32 %v899_v14, %v893_v2 }
 0x33f   : > { %815 = vst.msk [vmem:[%s1113_s8 + $0x18] sm:$0xff] %vm361_vm1, %v559_v15  ;;  %v562_v21 = vpack.c.bf16 %v559_v15, %v559_v15 }
 0x342   : > { %v504_v16 = vpop.permute.xlu1 %503 }
 0x343   : > { %v509_v17 = vsel %vm378_vm2, %v504_v16, 0 }
 0x344   : > { %518 = vmatpush.bf16.msrb.mxu3 %v509_v17 }
 0x348   : > { %v564_v19 = vpop.permute.xlu0 %563 }
 0x349   : > { %813 = vmatmul.msk.bf16.vlgmr.msrb.gmra.mxu3 %vm361_vm1, %v502_v18  ;;  %v569_v20 = vsel %vm378_vm2, %v564_v19, 0 }
 0x34a   : > { %578 = vmatpush.bf16.msrb.mxu2 %v569_v20 }
 0x34d   : > { %816 = vmatmul.msk.bf16.vlgmr.msrb.gmra.mxu2 %vm361_vm1, %v562_v21 }
 0x3bc   : > { %v460_v22 = vpop.f32.mrf.mxu3 }
 0x3bd   : > { %585 = vrot.lane.b32.xlu2 %v460_v22, %s981_s16 }
 0x3c4   : > { %v462_v23 = vpop.f32.mrf.mxu3 }
 0x3c5   : > { %927 = shalt.err (!%p924_p5)
}
 0x3c6   : > { %s983_s10 = smov 128   ;;  %s984_s8 = smov 8   ;;  %vm597_vm3 = vcmask 523264   ;;  %vm599_vm4 = vcmask 785408  }
 0x3c7   : > { %824 = dma.vmem_to_hbm [thread:$0]  (%p1055_p4), %s628_s24, 512, %s630_s27, %s611_s29, %s983_s10, %s983_s10, %s984_s8  }
 0x3c8   : > { %s1204_s12 = smov 64   ;;  %s1205_s14 = smov 96  }
 0x3c9   : > { %s803_s15 = sshll.u32 %s1072_s7, 2 }
 0x3ca   : > { %s332_s17 = scalar_lea.vmem %s1198_s4, %s803_s15 }
 0x3cc   : > { %v520_v24 = vpop.f32.mrf.mxu3 }
 0x3cd   : > { %589 = vrot.lane.b32.xlu2 %v520_v24, %s1204_s12 }
 0x3d0   : > { %v580_v25 = vpop.f32.mrf.mxu2 }
 0x3d1   : > { %593 = vrot.lane.b32.xlu0 %v580_v25, %s1205_s14 }
 0x3d4   : > { %v522_v26 = vpop.f32.mrf.mxu3 }
 0x3d8   : > { %v582_v27 = vpop.f32.mrf.mxu2 }
 0x417   : > { %v586_v28 = vpop.permute.xlu2 %585 }
 0x418   : > { %v596_v30 = vsel %vm339_vm0, %v1122_v39, %v586_v28 }
 0x427   : > { %v590_v29 = vpop.permute.xlu2 %589 }
 0x428   : > { %v598_v31 = vsel %vm597_vm3, %v596_v30, %v590_v29 }
 0x443   : > { %v594_v32 = vpop.permute.xlu0 %593 }
 0x444   : > { %v600_v33 = vsel %vm599_vm4, %v598_v31, %v594_v32 }
 0x445   : > { %v601_v34 = vpack.c.bf16 %v600_v33, %v600_v33 }
 0x447   : > { %602 = vst [vmem:[%s332_s17] sm:$0xf] %v601_v34 }
 0x448 PF: > { %p830_p4 = scmp.ge.s32.totalorder %s978_s23, 2  ;;  %s654_s24 = sand.u32 1, %s958_s18  }
 0x449   : > { %s655_s7 = scalar_lea.sflag [#allocation3], %s654_s24 }
 0x44a   : > { %p827_p6 = pnand %p830_p4, %p1062_p8 }
 0x44c   : > { %p828_p7 = pneg %p827_p6 }
 0x44e   : > { %953 = dma.done.wait (%p828_p7), %s655_s7, 512  }
 0x44f   : > { %955 = vsyncadd (%p828_p7), %s655_s7, 4294966784  ;;  %s19_s23 = sadd.s32 1, %s978_s23   ;;  %s1206_s18 = smov %s962_s19 }
 0x450   : > { %p16_p9 = scmp.ge.s32.totalorder %s19_s23, 4   ;;  %s1207_s19 = smov %s966_s20 }
 0x451   : > { %s1208_s20 = smov %s1068_s6  ;;  %s1209_s21 = smov %s974_s22 }
 0x452   : > { %s1210_s22 = smov %s1212_s26  ;;  %18 = sbr.rel (!%p16_p9) target bundleno = 4 (0x4), region = 95 }
 0x457   :  { %661 = vsyncpa [#allocation3], 1 }
 0x458   :  { %663 = vsyncpa [#allocation3 + $0x1], 1 }

// kernel: decoder_layer.10
= control target key start
LH: loop header
LB: loop body
LE: loop exit
PB: predicated region body
PF: predicated region fallthrough
CT: control target
= control target key end

     0   :  { %11 = vsyncpa [#allocation4], 0  ;;  %s309_s24 = smov [#allocation3]   ;;  %s310_s26 = smov 64   ;;  %s372_s0 = inlined_call_operand.vmem [shape: bf16[16,128], index: 0, kind: input, shape index: {}]   ;;  %s373_s1 = inlined_call_operand.hbm [shape: bf16[128,128], index: 1, kind: input, shape index: {}]   ;;  %s374_s2 = inlined_call_operand.vmem [shape: f32[1,128], index: 2, kind: input, shape index: {}]   ;;  %s375_s3 = inlined_call_operand.vmem [shape: f32[16,128], index: 3, kind: input, shape index: {}]   ;;  %s376_s4 = inlined_call_operand.vmem [shape: f32[1,128], index: 4, kind: input, shape index: {}]   ;;  %s377_s5 = inlined_call_operand.vmem [shape: f32[1,128], index: 5, kind: input, shape index: {}]   ;;  %s378_s6 = inlined_call_operand.vmem [shape: bf16[16,128], index: 6, kind: output, shape index: {}]  }
   0x1   :  { %s18_s23 = sshll.u32 %s373_s1, 4  ;;  %s20_s25 = sshll.u32 %s309_s24, 4  ;;  %s19_s23 = int_to_ptr.hbm [resolvable:$true] %s18_s23  ;;  %s21_s25 = int_to_ptr.vmem [resolvable:$true] %s20_s25 }
   0x2   :  { %s311_s27 = smov 4  }
   0x3   :  { %26 = dma.hbm_to_vmem [thread:$0]  %s19_s23, 1024, %s21_s25, [#allocation4], %s310_s26, %s310_s26, %s311_s27  }
   0x4   :  { %307 = dma.done.wait [#allocation4], 1024  }
   0x5   :  { %308 = vsyncadd [#allocation4], 4294966272  ;;  %v264_v0 = vld [vmem:[#allocation3 + $0x38] sm:$0xff]  ;;  %v263_v1 = vld [vmem:[#allocation3 + $0x30] sm:$0xff]  ;;  %v312_v18 = vmov 128.0  }
   0x6   :  { %119 = vmatpush.bf16.msra.mxu0 %v264_v0  ;;  %v262_v2 = vld [vmem:[#allocation3 + $0x28] sm:$0xff]  ;;  %v261_v3 = vld [vmem:[#allocation3 + $0x20] sm:$0xff]  ;;  %v260_v4 = vld [vmem:[#allocation3 + $0x18] sm:$0xff]  ;;  %277 = vrcp.f32 %v312_v18 }
   0x7   :  { %v259_v5 = vld [vmem:[#allocation3 + $0x10] sm:$0xff]  ;;  %v258_v6 = vld [vmem:[#allocation3 + $0x8] sm:$0xff]  ;;  %v257_v7 = vld [vmem:[#allocation3] sm:$0xff] }
   0x8   :  { %v256_v8 = vld [vmem:[%s372_s0] sm:$0xff]  ;;  %v149_v15 = vld [vmem:[%s375_s3 + $0x8] sm:$0xff] }
   0x9   :  { %v274_v9 = vld [vmem:[%s374_s2] ss:$0 sm:$0xff] }
   0xa   :  { %120 = vmatpush.bf16.msra.mxu0 %v263_v1  ;;  %v148_v11 = vld [vmem:[%s375_s3] sm:$0xff] }
   0xb   :  { %v275_v51 = vld [vmem:[%s376_s4] ss:$0 sm:$0xff] }
   0xc   :  { %v278_v19 = vpop.eup %277  ;;  %v276_v55 = vld [vmem:[%s377_s5] ss:$0 sm:$0xff] }
   0xd   :  { %v157_v20 = vmul.f32 128.0, %v278_v19  ;;  %vm161_vm0 = vweird.f32 %v278_v19 }
   0xe   :  { %121 = vmatpush.bf16.msra.mxu0 %v262_v2 }
   0xf   :  { %v158_v21 = vsub.f32 1.0, %v157_v20 }
  0x11   :  { %v159_v22 = vmul.f32 %v278_v19, %v158_v21 }
  0x12   :  { %122 = vmatpush.bf16.msra.mxu0 %v261_v3 }
  0x13   :  { %v160_v23 = vadd.f32 %v278_v19, %v159_v22 }
  0x15   :  { %v162_v24 = vsel %vm161_vm0, %v278_v19, %v160_v23 }
  0x16   :  { %123 = vmatpush.bf16.msra.mxu0 %v260_v4 }
  0x1a   :  { %124 = vmatpush.bf16.msra.mxu0 %v259_v5 }
  0x1e   :  { %125 = vmatpush.bf16.msra.mxu0 %v258_v6 }
  0x22   :  { %126 = vmatpush.bf16.msra.mxu0 %v257_v7 }
  0x25   :  { %127 = vmatmul.bf16.vlgmr.msra.gmra.mxu0 %v256_v8 }
  0xa2   :  { %v128_v10 = vpop.f32.mrf.mxu0 }
  0xa3   :  { %v146_v12 = vadd.f32 %v274_v9, %v128_v10 }
  0xa5   :  { %v150_v13 = vadd.f32 %v148_v11, %v146_v12 }
  0xa7   :  { %152 = vadd.xlane.f32.xlu0 %v150_v13 }
  0xaa   :  { %v130_v14 = vpop.f32.mrf.mxu0 }
  0xab   :  { %v147_v16 = vadd.f32 %v274_v9, %v130_v14 }
  0xad   :  { %v151_v17 = vadd.f32 %v149_v15, %v147_v16 }
  0xaf   :  { %154 = vadd.xlane.f32.xlu0 %v151_v17 }
 0x11a   :  { %v153_v25 = vpop.xlane.xlu0 %152 }
 0x11b   :  { %v163_v26 = vmul.f32 %v162_v24, %v153_v25 }
 0x11d   :  { %v165_v27 = vsub.f32 %v150_v13, %v163_v26 }
 0x11f   :  { %v167_v28 = vmul.f32 %v165_v27, %v165_v27 }
 0x121   :  { %169 = vadd.xlane.f32.xlu1 %v167_v28 }
 0x122   :  { %v155_v29 = vpop.xlane.xlu0 %154 }
 0x123   :  { %v164_v30 = vmul.f32 %v162_v24, %v155_v29 }
 0x125   :  { %v166_v31 = vsub.f32 %v151_v17, %v164_v30 }
 0x127   :  { %v168_v32 = vmul.f32 %v166_v31, %v166_v31 }
 0x129   :  { %171 = vadd.xlane.f32.xlu1 %v168_v32 }
 0x194   :  { %v170_v33 = vpop.xlane.xlu1 %169 }
 0x195   :  { %v173_v34 = vmul.f32 %v170_v33, %v162_v24 }
 0x197   :  { %v175_v35 = vadd.f32 1e-06, %v173_v34 }
 0x199   :  { %279 = vrsqrt.f32 %v175_v35  ;;  %vm183_vm2 = vweird.f32 %v175_v35 }
 0x19c   :  { %v172_v36 = vpop.xlane.xlu1 %171 }
 0x19d   :  { %v174_v37 = vmul.f32 %v172_v36, %v162_v24 }
 0x19f   :  { %v280_v38 = vpop.eup %279  ;;  %v176_v39 = vadd.f32 1e-06, %v174_v37 }
 0x1a0   :  { %v178_v40 = vmul.f32 %v280_v38, %v175_v35  ;;  %vm184_vm1 = vweird.f32 %v280_v38 }
 0x1a1   :  { %281 = vrsqrt.f32 %v176_v39  ;;  %vm185_vm3 = vmor %vm183_vm2, %vm184_vm1  ;;  %vm193_vm5 = vweird.f32 %v176_v39 }
 0x1a2   :  { %v179_v41 = vmul.f32 %v280_v38, %v178_v40 }
 0x1a4   :  { %v180_v42 = vmul.f32 0.5, %v179_v41 }
 0x1a6   :  { %v181_v43 = vsub.f32 1.5, %v180_v42 }
 0x1a7   :  { %v282_v44 = vpop.eup %281 }
 0x1a8   :  { %v182_v45 = vmul.f32 %v280_v38, %v181_v43  ;;  %v188_v46 = vmul.f32 %v282_v44, %v176_v39  ;;  %vm194_vm4 = vweird.f32 %v282_v44 }
 0x1a9   :  { %vm195_vm6 = vmor %vm193_vm5, %vm194_vm4 }
 0x1aa   :  { %v189_v47 = vmul.f32 %v282_v44, %v188_v46  ;;  %v186_v48 = vsel %vm185_vm3, %v280_v38, %v182_v45 }
 0x1ab   :  { %v197_v52 = vmul.f32 %v186_v48, %v165_v27 }
 0x1ac   :  { %v190_v49 = vmul.f32 0.5, %v189_v47 }
 0x1ad   :  { %v203_v56 = vmul.f32 %v275_v51, %v197_v52 }
 0x1ae   :  { %v191_v50 = vsub.f32 1.5, %v190_v49 }
 0x1af   :  { %v209_v59 = vadd.f32 %v276_v55, %v203_v56 }
 0x1b0   :  { %v192_v53 = vmul.f32 %v282_v44, %v191_v50 }
 0x1b2   :  { %v196_v54 = vsel %vm195_vm6, %v282_v44, %v192_v53 }
 0x1b3   :  { %v198_v57 = vmul.f32 %v196_v54, %v166_v31 }
 0x1b5   :  { %v204_v58 = vmul.f32 %v275_v51, %v198_v57 }
 0x1b7   :  { %v210_v60 = vadd.f32 %v276_v55, %v204_v58 }
 0x1b9   :  { %v268_v61 = vpack.c.bf16 %v210_v60, %v209_v59 }
 0x1bb   :  { %269 = vst [vmem:[%s378_s6] sm:$0xff] %v268_v61  }
 0x1bc   :  { %219 = vsyncpa [#allocation4], 1 }

// kernel: decoder_layer.11
= control target key start
LH: loop header
LB: loop body
LE: loop exit
PB: predicated region body
PF: predicated region fallthrough
CT: control target
= control target key end

     0   :  { %8 = vsyncpa [#allocation4], 0  ;;  %s458_s0 = inlined_call_operand.hbm [shape: f32[32,128], index: 0, kind: input, shape index: {}]   ;;  %s459_s1 = inlined_call_operand.hbm [shape: bf16[128,256], index: 1, kind: input, shape index: {}]   ;;  %s460_s2 = inlined_call_operand.vmem [shape: f32[1,256], index: 2, kind: input, shape index: {}]   ;;  %s461_s3 = inlined_call_operand.vmem [shape: bf16[32,256], index: 3, kind: output, shape index: {}]  }
   0x1   :  { %s14_s14 = sshll.u32 %s458_s0, 4  ;;  %s15_s14 = int_to_ptr.hbm [resolvable:$true] %s14_s14 }
   0x2   :  { %9 = vsyncpa [#allocation6], 0  ;;  %s413_s15 = smov [#allocation3]   ;;  %s27_s19 = sshll.u32 %s459_s1, 4  ;;  %s28_s19 = int_to_ptr.hbm [resolvable:$true] %s27_s19 }
   0x3   :  { %s16_s16 = sshll.u32 %s413_s15, 4  ;;  %s414_s20 = smov 128   ;;  %s17_s16 = int_to_ptr.vmem [resolvable:$true] %s16_s16 }
   0x4   :  { %s415_s21 = smov 8   ;;  %s416_s22 = smov [#allocation5]  }
   0x5   :  { %22 = dma.hbm_to_vmem [thread:$0]  %s15_s14, 512, %s17_s16, [#allocation4], %s414_s20, %s414_s20, %s415_s21  }
   0x6   :  { %s29_s23 = sshll.u32 %s416_s22, 4  ;;  %s30_s23 = int_to_ptr.vmem [resolvable:$true] %s29_s23 }
   0x7   :  { %35 = dma.hbm_to_vmem [thread:$0]  %s28_s19, 2048, %s30_s23, [#allocation6], %s414_s20, %s414_s20, %s415_s21  }
   0x8   :  { %409 = dma.done.wait [#allocation4], 512  }
   0x9   :  { %410 = vsyncadd [#allocation4], 4294966784 }
   0xa   :  { %411 = dma.done.wait [#allocation6], 2048  }
   0xb   :  { %412 = vsyncadd [#allocation6], 4294965248  ;;  %v319_v0 = vld [vmem:[#allocation5 + $0x70] sm:$0xf]  ;;  %v340_v1 = vld [vmem:[#allocation5 + $0x74] sm:$0xf0] }
   0xc   :  { %v339_v2 = vld [vmem:[#allocation5 + $0x74] sm:$0xf]  ;;  %v320_v3 = vor.u32 %v340_v1, %v319_v0  ;;  %v321_v4 = vld [vmem:[#allocation5 + $0x78] sm:$0xf0]  ;;  %v311_v5 = vld [vmem:[#allocation5 + $0x60] sm:$0xf] }
   0xd   :  { %v338_v6 = vld [vmem:[#allocation5 + $0x64] sm:$0xf0]  ;;  %v324_v7 = vor.u32 %v339_v2, %v321_v4  ;;  %v337_v8 = vld [vmem:[#allocation5 + $0x64] sm:$0xf]  ;;  %v313_v9 = vld [vmem:[#allocation5 + $0x68] sm:$0xf0] }
   0xe   :  { %168 = vmatpush.bf16.msra.mxu0 %v320_v3  ;;  %341 = vmatpush.bf16.msra.mxu2 %v320_v3  ;;  %v312_v10 = vor.u32 %v338_v6, %v311_v5  ;;  %v316_v11 = vor.u32 %v337_v8, %v313_v9  ;;  %v303_v12 = vld [vmem:[#allocation5 + $0x50] sm:$0xf]  ;;  %v336_v13 = vld [vmem:[#allocation5 + $0x54] sm:$0xf0]  ;;  %v335_v14 = vld [vmem:[#allocation5 + $0x54] sm:$0xf] }
   0xf   :  { %187 = vmatpush.bf16.msra.mxu1 %v324_v7  ;;  %349 = vmatpush.bf16.msra.mxu3 %v324_v7  ;;  %v305_v15 = vld [vmem:[#allocation5 + $0x58] sm:$0xf0]  ;;  %v304_v16 = vor.u32 %v336_v13, %v303_v12  ;;  %v295_v18 = vld [vmem:[#allocation5 + $0x40] sm:$0xf]  ;;  %v334_v19 = vld [vmem:[#allocation5 + $0x44] sm:$0xf0] }
  0x10   :  { %v308_v17 = vor.u32 %v335_v14, %v305_v15  ;;  %v333_v20 = vld [vmem:[#allocation5 + $0x44] sm:$0xf]  ;;  %v297_v21 = vld [vmem:[#allocation5 + $0x48] sm:$0xf0]  ;;  %v296_v22 = vor.u32 %v334_v19, %v295_v18  ;;  %v287_v24 = vld [vmem:[#allocation5 + $0x30] sm:$0xf] }
  0x11   :  { %v300_v23 = vor.u32 %v333_v20, %v297_v21  ;;  %v332_v25 = vld [vmem:[#allocation5 + $0x34] sm:$0xf0]  ;;  %v331_v26 = vld [vmem:[#allocation5 + $0x34] sm:$0xf]  ;;  %v289_v27 = vld [vmem:[#allocation5 + $0x38] sm:$0xf0] }
  0x12   :  { %169 = vmatpush.bf16.msra.mxu0 %v312_v10  ;;  %342 = vmatpush.bf16.msra.mxu2 %v312_v10  ;;  %v288_v28 = vor.u32 %v332_v25, %v287_v24  ;;  %v292_v29 = vor.u32 %v331_v26, %v289_v27  ;;  %v279_v30 = vld [vmem:[#allocation5 + $0x20] sm:$0xf]  ;;  %v330_v31 = vld [vmem:[#allocation5 + $0x24] sm:$0xf0]  ;;  %v329_v32 = vld [vmem:[#allocation5 + $0x24] sm:$0xf] }
  0x13   :  { %188 = vmatpush.bf16.msra.mxu1 %v316_v11  ;;  %350 = vmatpush.bf16.msra.mxu3 %v316_v11  ;;  %v281_v33 = vld [vmem:[#allocation5 + $0x28] sm:$0xf0]  ;;  %v280_v34 = vor.u32 %v330_v31, %v279_v30  ;;  %v271_v36 = vld [vmem:[#allocation5 + $0x10] sm:$0xf]  ;;  %v328_v37 = vld [vmem:[#allocation5 + $0x14] sm:$0xf0] }
  0x14   :  { %v284_v35 = vor.u32 %v329_v32, %v281_v33  ;;  %v327_v38 = vld [vmem:[#allocation5 + $0x14] sm:$0xf]  ;;  %v273_v39 = vld [vmem:[#allocation5 + $0x18] sm:$0xf0]  ;;  %v272_v40 = vor.u32 %v328_v37, %v271_v36  ;;  %v263_v42 = vld [vmem:[#allocation5] sm:$0xf] }
  0x15   :  { %v276_v41 = vor.u32 %v327_v38, %v273_v39  ;;  %v326_v43 = vld [vmem:[#allocation5 + $0x4] sm:$0xf0]  ;;  %v325_v44 = vld [vmem:[#allocation5 + $0x4] sm:$0xf]  ;;  %v265_v45 = vld [vmem:[#allocation5 + $0x8] sm:$0xf0] }
  0x16   :  { %170 = vmatpush.bf16.msra.mxu0 %v304_v16  ;;  %343 = vmatpush.bf16.msra.mxu2 %v304_v16  ;;  %v66_v46 = vld [vmem:[#allocation3] sm:$0xff]  ;;  %v264_v47 = vor.u32 %v326_v43, %v263_v42  ;;  %v67_v48 = vld [vmem:[#allocation3 + $0x8] sm:$0xff]  ;;  %v68_v49 = vld [vmem:[#allocation3 + $0x10] sm:$0xff]  ;;  %v268_v51 = vor.u32 %v325_v44, %v265_v45 }
  0x17   :  { %189 = vmatpush.bf16.msra.mxu1 %v308_v17  ;;  %351 = vmatpush.bf16.msra.mxu3 %v308_v17  ;;  %v69_v50 = vld [vmem:[#allocation3 + $0x18] sm:$0xff]  ;;  %v70_v52 = vpack.c.bf16 %v67_v48, %v66_v46  ;;  %v233_v54 = vld [vmem:[%s460_s2] sm:$0x3] }
  0x18   :  { %v71_v53 = vpack.c.bf16 %v69_v50, %v68_v49  ;;  %v235_v55 = vperm.slane %v233_v54, 0  ;;  %v236_v56 = vperm.slane %v233_v54, 1 }
  0x1a   :  { %171 = vmatpush.bf16.msra.mxu0 %v296_v22  ;;  %344 = vmatpush.bf16.msra.mxu2 %v296_v22 }
  0x1b   :  { %190 = vmatpush.bf16.msra.mxu1 %v300_v23  ;;  %352 = vmatpush.bf16.msra.mxu3 %v300_v23 }
  0x1e   :  { %172 = vmatpush.bf16.msra.mxu0 %v288_v28  ;;  %345 = vmatpush.bf16.msra.mxu2 %v288_v28 }
  0x1f   :  { %191 = vmatpush.bf16.msra.mxu1 %v292_v29  ;;  %353 = vmatpush.bf16.msra.mxu3 %v292_v29 }
  0x22   :  { %173 = vmatpush.bf16.msra.mxu0 %v280_v34  ;;  %346 = vmatpush.bf16.msra.mxu2 %v280_v34 }
  0x23   :  { %192 = vmatpush.bf16.msra.mxu1 %v284_v35  ;;  %354 = vmatpush.bf16.msra.mxu3 %v284_v35 }
  0x26   :  { %174 = vmatpush.bf16.msra.mxu0 %v272_v40  ;;  %347 = vmatpush.bf16.msra.mxu2 %v272_v40 }
  0x27   :  { %193 = vmatpush.bf16.msra.mxu1 %v276_v41  ;;  %355 = vmatpush.bf16.msra.mxu3 %v276_v41 }
  0x2a   :  { %175 = vmatpush.bf16.msra.mxu0 %v264_v47  ;;  %348 = vmatpush.bf16.msra.mxu2 %v264_v47 }
  0x2b   :  { %194 = vmatpush.bf16.msra.mxu1 %v268_v51  ;;  %356 = vmatpush.bf16.msra.mxu3 %v268_v51 }
  0x2d   :  { %176 = vmatmul.bf16.vlgmr.msra.gmra.mxu0 %v70_v52  ;;  %181 = vmatmul.bf16.vlgmr.msra.gmra.mxu2 %v71_v53 }
  0x2e   :  { %195 = vmatmul.bf16.vlgmr.msra.gmra.mxu1 %v70_v52  ;;  %200 = vmatmul.bf16.vlgmr.msra.gmra.mxu3 %v71_v53 }
  0xaa   :  { %v177_v57 = vpop.f32.mrf.mxu0 }
  0xab   :  { %v239_v58 = vadd.f32 %v235_v55, %v177_v57  ;;  %v196_v59 = vpop.f32.mrf.mxu1 }
  0xac   :  { %v240_v60 = vadd.f32 %v236_v56, %v196_v59 }
  0xae   :  { %v247_v61 = vpack.c.bf16 %v240_v60, %v239_v58 }
  0xb0   :  { %251 = vst [vmem:[%s461_s3] sm:$0xff] %v247_v61  ;;  %v182_v62 = vpop.f32.mrf.mxu2 }
  0xb1   :  { %v243_v63 = vadd.f32 %v235_v55, %v182_v62  ;;  %v201_v0 = vpop.f32.mrf.mxu3 }
  0xb2   :  { %v244_v1 = vadd.f32 %v236_v56, %v201_v0  ;;  %v179_v2 = vpop.f32.mrf.mxu0 }
  0xb3   :  { %v241_v3 = vadd.f32 %v235_v55, %v179_v2  ;;  %v198_v4 = vpop.f32.mrf.mxu1 }
  0xb4   :  { %v249_v5 = vpack.c.bf16 %v244_v1, %v243_v63  ;;  %v242_v6 = vadd.f32 %v236_v56, %v198_v4 }
  0xb6   :  { %253 = vst [vmem:[%s461_s3 + $0x10] sm:$0xff] %v249_v5  ;;  %v248_v7 = vpack.c.bf16 %v242_v6, %v241_v3 }
  0xb8   :  { %252 = vst [vmem:[%s461_s3 + $0x8] sm:$0xff] %v248_v7  ;;  %v184_v8 = vpop.f32.mrf.mxu2 }
  0xb9   :  { %v245_v9 = vadd.f32 %v235_v55, %v184_v8  ;;  %v203_v10 = vpop.f32.mrf.mxu3 }
  0xba   :  { %v246_v11 = vadd.f32 %v236_v56, %v203_v10 }
  0xbc   :  { %v250_v12 = vpack.c.bf16 %v246_v11, %v245_v9 }
  0xbe   :  { %254 = vst [vmem:[%s461_s3 + $0x18] sm:$0xff] %v250_v12 }
  0xbf   :  { %259 = vsyncpa [#allocation4], 1 }
  0xc0   :  { %260 = vsyncpa [#allocation6], 1 }

// kernel: decoder_layer.12
= control target key start
LH: loop header
LB: loop body
LE: loop exit
PB: predicated region body
PF: predicated region fallthrough
CT: control target
= control target key end

     0   :  { %8 = vsyncpa [#allocation4], 0  ;;  %s228_s15 = smov [#allocation3]   ;;  %s229_s17 = smov 64   ;;  %s263_s0 = inlined_call_operand.vmem [shape: bf16[16,128], index: 0, kind: input, shape index: {}]   ;;  %s264_s1 = inlined_call_operand.hbm [shape: bf16[128,128], index: 1, kind: input, shape index: {}]   ;;  %s265_s2 = inlined_call_operand.vmem [shape: f32[1,128], index: 2, kind: input, shape index: {}]   ;;  %s266_s3 = inlined_call_operand.vmem [shape: bf16[16,128], index: 3, kind: output, shape index: {}]  }
   0x1   :  { %s15_s14 = sshll.u32 %s264_s1, 4  ;;  %s17_s16 = sshll.u32 %s228_s15, 4  ;;  %s16_s14 = int_to_ptr.hbm [resolvable:$true] %s15_s14  ;;  %s18_s16 = int_to_ptr.vmem [resolvable:$true] %s17_s16 }
   0x2   :  { %s230_s18 = smov 4  }
   0x3   :  { %23 = dma.hbm_to_vmem [thread:$0]  %s16_s14, 1024, %s18_s16, [#allocation4], %s229_s17, %s229_s17, %s230_s18  }
   0x4   :  { %226 = dma.done.wait [#allocation4], 1024  }
   0x5   :  { %227 = vsyncadd [#allocation4], 4294966272  ;;  %v192_v0 = vld [vmem:[#allocation3 + $0x38] sm:$0xff]  ;;  %v191_v1 = vld [vmem:[#allocation3 + $0x30] sm:$0xff] }
   0x6   :  { %110 = vmatpush.bf16.msra.mxu0 %v192_v0  ;;  %v190_v2 = vld [vmem:[#allocation3 + $0x28] sm:$0xff]  ;;  %v189_v3 = vld [vmem:[#allocation3 + $0x20] sm:$0xff]  ;;  %v188_v4 = vld [vmem:[#allocation3 + $0x18] sm:$0xff] }
   0x7   :  { %v187_v5 = vld [vmem:[#allocation3 + $0x10] sm:$0xff]  ;;  %v186_v6 = vld [vmem:[#allocation3 + $0x8] sm:$0xff]  ;;  %v185_v7 = vld [vmem:[#allocation3] sm:$0xff] }
   0x8   :  { %v184_v8 = vld [vmem:[%s263_s0] sm:$0xff] }
   0x9   :  { %v201_v10 = vld [vmem:[%s265_s2] ss:$0 sm:$0xff] }
   0xa   :  { %111 = vmatpush.bf16.msra.mxu0 %v191_v1 }
   0xe   :  { %112 = vmatpush.bf16.msra.mxu0 %v190_v2 }
  0x12   :  { %113 = vmatpush.bf16.msra.mxu0 %v189_v3 }
  0x16   :  { %114 = vmatpush.bf16.msra.mxu0 %v188_v4 }
  0x1a   :  { %115 = vmatpush.bf16.msra.mxu0 %v187_v5 }
  0x1e   :  { %116 = vmatpush.bf16.msra.mxu0 %v186_v6 }
  0x22   :  { %117 = vmatpush.bf16.msra.mxu0 %v185_v7 }
  0x25   :  { %118 = vmatmul.bf16.vlgmr.msra.gmra.mxu0 %v184_v8 }
  0xa2   :  { %v119_v9 = vpop.f32.mrf.mxu0 }
  0xa3   :  { %v137_v12 = vadd.f32 %v201_v10, %v119_v9 }
  0xaa   :  { %v121_v11 = vpop.f32.mrf.mxu0 }
  0xab   :  { %v138_v13 = vadd.f32 %v201_v10, %v121_v11 }
  0xad   :  { %v196_v14 = vpack.c.bf16 %v138_v13, %v137_v12 }
  0xaf   :  { %197 = vst [vmem:[%s266_s3] sm:$0xff] %v196_v14  }
  0xb0   :  { %147 = vsyncpa [#allocation4], 1 }

// kernel: decoder_layer.14
= control target key start
LH: loop header
LB: loop body
LE: loop exit
PB: predicated region body
PF: predicated region fallthrough
CT: control target
= control target key end

     0   :  { %11 = vsyncpa [#allocation4], 0  ;;  %s315_s24 = smov [#allocation3]   ;;  %s316_s26 = smov 64   ;;  %s375_s0 = inlined_call_operand.vmem [shape: bf16[16,128], index: 0, kind: input, shape index: {}]   ;;  %s376_s1 = inlined_call_operand.hbm [shape: bf16[128,128], index: 1, kind: input, shape index: {}]   ;;  %s377_s2 = inlined_call_operand.vmem [shape: f32[1,128], index: 2, kind: input, shape index: {}]   ;;  %s378_s3 = inlined_call_operand.vmem [shape: bf16[16,128], index: 3, kind: input, shape index: {}]   ;;  %s379_s4 = inlined_call_operand.vmem [shape: f32[1,128], index: 4, kind: input, shape index: {}]   ;;  %s380_s5 = inlined_call_operand.vmem [shape: f32[1,128], index: 5, kind: input, shape index: {}]   ;;  %s381_s6 = inlined_call_operand.vmem [shape: bf16[16,128], index: 6, kind: output, shape index: {}]  }
   0x1   :  { %s18_s23 = sshll.u32 %s376_s1, 4  ;;  %s20_s25 = sshll.u32 %s315_s24, 4  ;;  %s19_s23 = int_to_ptr.hbm [resolvable:$true] %s18_s23  ;;  %s21_s25 = int_to_ptr.vmem [resolvable:$true] %s20_s25 }
   0x2   :  { %s317_s27 = smov 4  }
   0x3   :  { %26 = dma.hbm_to_vmem [thread:$0]  %s19_s23, 1024, %s21_s25, [#allocation4], %s316_s26, %s316_s26, %s317_s27  }
   0x4   :  { %313 = dma.done.wait [#allocation4], 1024  }
   0x5   :  { %314 = vsyncadd [#allocation4], 4294966272  ;;  %v266_v0 = vld [vmem:[#allocation3 + $0x38] sm:$0xff]  ;;  %v265_v1 = vld [vmem:[#allocation3 + $0x30] sm:$0xff]  ;;  %v318_v19 = vmov 128.0  }
   0x6   :  { %119 = vmatpush.bf16.msra.mxu0 %v266_v0  ;;  %v264_v2 = vld [vmem:[#allocation3 + $0x28] sm:$0xff]  ;;  %v263_v3 = vld [vmem:[#allocation3 + $0x20] sm:$0xff]  ;;  %v262_v4 = vld [vmem:[#allocation3 + $0x18] sm:$0xff]  ;;  %283 = vrcp.f32 %v318_v19 }
   0x7   :  { %v261_v5 = vld [vmem:[#allocation3 + $0x10] sm:$0xff]  ;;  %v260_v6 = vld [vmem:[#allocation3 + $0x8] sm:$0xff]  ;;  %v259_v7 = vld [vmem:[#allocation3] sm:$0xff] }
   0x8   :  { %v258_v8 = vld [vmem:[%s375_s0] sm:$0xff] }
   0x9   :  { %v268_v9 = vld [vmem:[%s378_s3] sm:$0xff]  }
   0xa   :  { %120 = vmatpush.bf16.msra.mxu0 %v265_v1  ;;  %v280_v10 = vld [vmem:[%s377_s2] ss:$0 sm:$0xff]  ;;  %v269_v11 = vunpack.c.l.bf16 %v268_v9  ;;  %v270_v15 = vunpack.c.h.bf16 %v268_v9 }
   0xb   :  { %v281_v52 = vld [vmem:[%s379_s4] ss:$0 sm:$0xff] }
   0xc   :  { %v284_v20 = vpop.eup %283  ;;  %v282_v56 = vld [vmem:[%s380_s5] ss:$0 sm:$0xff] }
   0xd   :  { %v159_v21 = vmul.f32 128.0, %v284_v20  ;;  %vm163_vm0 = vweird.f32 %v284_v20 }
   0xe   :  { %121 = vmatpush.bf16.msra.mxu0 %v264_v2 }
   0xf   :  { %v160_v22 = vsub.f32 1.0, %v159_v21 }
  0x11   :  { %v161_v23 = vmul.f32 %v284_v20, %v160_v22 }
  0x12   :  { %122 = vmatpush.bf16.msra.mxu0 %v263_v3 }
  0x13   :  { %v162_v24 = vadd.f32 %v284_v20, %v161_v23 }
  0x15   :  { %v164_v25 = vsel %vm163_vm0, %v284_v20, %v162_v24 }
  0x16   :  { %123 = vmatpush.bf16.msra.mxu0 %v262_v4 }
  0x1a   :  { %124 = vmatpush.bf16.msra.mxu0 %v261_v5 }
  0x1e   :  { %125 = vmatpush.bf16.msra.mxu0 %v260_v6 }
  0x22   :  { %126 = vmatpush.bf16.msra.mxu0 %v259_v7 }
  0x25   :  { %127 = vmatmul.bf16.vlgmr.msra.gmra.mxu0 %v258_v8 }
  0xa2   :  { %v128_v12 = vpop.f32.mrf.mxu0 }
  0xa3   :  { %v146_v13 = vadd.f32 %v280_v10, %v128_v12 }
  0xa5   :  { %v152_v14 = vadd.f32 %v269_v11, %v146_v13 }
  0xa7   :  { %154 = vadd.xlane.f32.xlu0 %v152_v14 }
  0xaa   :  { %v130_v16 = vpop.f32.mrf.mxu0 }
  0xab   :  { %v147_v17 = vadd.f32 %v280_v10, %v130_v16 }
  0xad   :  { %v153_v18 = vadd.f32 %v270_v15, %v147_v17 }
  0xaf   :  { %156 = vadd.xlane.f32.xlu0 %v153_v18 }
 0x11a   :  { %v155_v26 = vpop.xlane.xlu0 %154 }
 0x11b   :  { %v165_v27 = vmul.f32 %v164_v25, %v155_v26 }
 0x11d   :  { %v167_v28 = vsub.f32 %v152_v14, %v165_v27 }
 0x11f   :  { %v169_v29 = vmul.f32 %v167_v28, %v167_v28 }
 0x121   :  { %171 = vadd.xlane.f32.xlu1 %v169_v29 }
 0x122   :  { %v157_v30 = vpop.xlane.xlu0 %156 }
 0x123   :  { %v166_v31 = vmul.f32 %v164_v25, %v157_v30 }
 0x125   :  { %v168_v32 = vsub.f32 %v153_v18, %v166_v31 }
 0x127   :  { %v170_v33 = vmul.f32 %v168_v32, %v168_v32 }
 0x129   :  { %173 = vadd.xlane.f32.xlu1 %v170_v33 }
 0x194   :  { %v172_v34 = vpop.xlane.xlu1 %171 }
 0x195   :  { %v175_v35 = vmul.f32 %v172_v34, %v164_v25 }
 0x197   :  { %v177_v36 = vadd.f32 1e-06, %v175_v35 }
 0x199   :  { %285 = vrsqrt.f32 %v177_v36  ;;  %vm185_vm2 = vweird.f32 %v177_v36 }
 0x19c   :  { %v174_v37 = vpop.xlane.xlu1 %173 }
 0x19d   :  { %v176_v38 = vmul.f32 %v174_v37, %v164_v25 }
 0x19f   :  { %v286_v39 = vpop.eup %285  ;;  %v178_v40 = vadd.f32 1e-06, %v176_v38 }
 0x1a0   :  { %v180_v41 = vmul.f32 %v286_v39, %v177_v36  ;;  %vm186_vm1 = vweird.f32 %v286_v39 }
 0x1a1   :  { %287 = vrsqrt.f32 %v178_v40  ;;  %vm187_vm3 = vmor %vm185_vm2, %vm186_vm1  ;;  %vm195_vm5 = vweird.f32 %v178_v40 }
 0x1a2   :  { %v181_v42 = vmul.f32 %v286_v39, %v180_v41 }
 0x1a4   :  { %v182_v43 = vmul.f32 0.5, %v181_v42 }
 0x1a6   :  { %v183_v44 = vsub.f32 1.5, %v182_v43 }
 0x1a7   :  { %v288_v45 = vpop.eup %287 }
 0x1a8   :  { %v184_v46 = vmul.f32 %v286_v39, %v183_v44  ;;  %v190_v47 = vmul.f32 %v288_v45, %v178_v40  ;;  %vm196_vm4 = vweird.f32 %v288_v45 }
 0x1a9   :  { %vm197_vm6 = vmor %vm195_vm5, %vm196_vm4 }
 0x1aa   :  { %v191_v48 = vmul.f32 %v288_v45, %v190_v47  ;;  %v188_v49 = vsel %vm187_vm3, %v286_v39, %v184_v46 }
 0x1ab   :  { %v199_v53 = vmul.f32 %v188_v49, %v167_v28 }
 0x1ac   :  { %v192_v50 = vmul.f32 0.5, %v191_v48 }
 0x1ad   :  { %v205_v57 = vmul.f32 %v281_v52, %v199_v53 }
 0x1ae   :  { %v193_v51 = vsub.f32 1.5, %v192_v50 }
 0x1af   :  { %v211_v60 = vadd.f32 %v282_v56, %v205_v57 }
 0x1b0   :  { %v194_v54 = vmul.f32 %v288_v45, %v193_v51 }
 0x1b2   :  { %v198_v55 = vsel %vm197_vm6, %v288_v45, %v194_v54 }
 0x1b3   :  { %v200_v58 = vmul.f32 %v198_v55, %v168_v32 }
 0x1b5   :  { %v206_v59 = vmul.f32 %v281_v52, %v200_v58 }
 0x1b7   :  { %v212_v61 = vadd.f32 %v282_v56, %v206_v59 }
 0x1b9   :  { %v274_v62 = vpack.c.bf16 %v212_v61, %v211_v60 }
 0x1bb   :  { %275 = vst [vmem:[%s381_s6] sm:$0xff] %v274_v62  }
 0x1bc   :  { %221 = vsyncpa [#allocation4], 1 }

// kernel: decoder_layer.13
= control target key start
LH: loop header
LB: loop body
LE: loop exit
PB: predicated region body
PF: predicated region fallthrough
CT: control target
= control target key end

     0   :  { %11 = vsyncpa [#allocation5], 0  ;;  %s1293_s0 = inlined_call_operand.vmem [shape: bf16[2,8,128], index: 0, kind: input, shape index: {}]   ;;  %s1294_s1 = inlined_call_operand.vmem [shape: bf16[2,16,256], index: 1, kind: input, shape index: {}, may-alias: {1,2}]   ;;  %s1295_s2 = inlined_call_operand.vmem [shape: bf16[2,16,256], index: 2, kind: input, shape index: {}, may-alias: {1,2}]   ;;  %s1296_s3 = inlined_call_operand.vmem [shape: f32[2,1,1,16], index: 3, kind: input, shape index: {}]   ;;  %s1297_s4 = inlined_call_operand.vmem [shape: bf16[2,8,128], index: 4, kind: output, shape index: {0}]   ;;  %s1298_s5 = inlined_call_operand.hbm [shape: f32[2,4,8,16], index: 5, kind: output, shape index: {1}]  }
   0x1   :  { %13 = vsyncpa [#allocation5 + $0x1], 0  ;;  %s1103_s18 = smov 0   ;;  %s1105_s19 = smov 0  }
   0x2   :  { %s1107_s20 = smov 0   ;;  %s1109_s21 = smov 0  }
   0x3   :  { %s1111_s22 = smov 0   ;;  %s1113_s23 = smov 0  }
   0x4 LB: > { %s865_s24 = sadd.s32 4294967295, %s1066_s23   ;;  %s866_s25 = sadd.s32 4294967294, %s1066_s23   ;;  %s1066_s23 = sphi %s1113_s23, %s19_s23   ;;  %s1062_s22 = sphi %s1111_s22, %s1312_s22   ;;  %s1058_s21 = sphi %s1109_s21, %s1311_s21   ;;  %s1054_s20 = sphi %s1107_s20, %s1310_s20   ;;  %s1050_s19 = sphi %s1105_s19, %s1309_s19   ;;  %s1046_s18 = sphi %s1103_s18, %s1308_s18  }
   0x5   : > { %s31_s26 = sadd.s32 1, %s1062_s22  ;;  %s66_s27 = sadd.s32 1, %s1054_s20 }
   0x6   : > { %p33_p0 = scmp.ge.s32.totalorder %s31_s26, 2  ;;  %p73_p1 = scmp.ne.s32.totalorder %s1054_s20, %s1050_s19 }
   0x7   : > { %p74_p2 = scmp.eq.s32.totalorder %s1066_s23, 0  ;;  %p185_p3 = scmp.eq.s32.totalorder %s865_s24, 1 }
   0x8   : > { %s1314_s26 = smov (%p33_p0, %s31_s26), 0  ;;  %p190_p6 = scmp.ne.s32.totalorder %s1050_s19, %s1046_s18 }
   0x9   : > { %p1142_p4 = por %p74_p2, %p73_p1  ;;  %p1146_p5 = por %p185_p3, %p73_p1 }
   0xa   : > { %s63_s30 = ssub.s32 %s1062_s22, %s1314_s26  ;;  %p191_p8 = scmp.eq.s32.totalorder %s866_s25, 1 }
   0xb   : > { %p64_p7 = scmp.eq.s32.totalorder %s63_s30, 0  ;;  %p868_p10 = scmp.ge.s32.totalorder %s1066_s23, 2 }
   0xc   : > { %p1157_p9 = por %p191_p8, %p190_p6 }
   0xd   : > { %s1155_s6 = scalar_select %p64_p7, %s1054_s20, %s66_s27  }
   0xe   : > { %207 = sbr.rel (%p868_p10) target bundleno = 31 (0x1f), region = 16 }
  0x13   : > { %220 = sbr.rel (!%p1142_p4) target bundleno = 25 (0x19), region = 24  ;;  %s222_s8 = sand.u32 (%p1142_p4), 1, %s1054_s20  }
  0x14   : > { %s907_s9 = sshll.u32 (%p1142_p4), %s1062_s22, 4  ;;  %s869_s10 = sshll.u32 (%p1142_p4), %s222_s8, 3 }
  0x15   : > { %s227_s13 = scalar_lea.vmem (%p1142_p4), %s1294_s1, %s907_s9  ;;  %s224_s14 = scalar_lea.vmem (%p1142_p4), [#allocation2], %s869_s10 }
  0x16   : > { %v244_v0 = vld [vmem:[%s227_s13] sm:$0xf] (%p1142_p4)  ;;  %v246_v1 = vld [vmem:[%s227_s13 + $0x8] sm:$0xf] (%p1142_p4) }
  0x17   : > { %245 = vst [vmem:[%s224_s14] sm:$0xf] (%p1142_p4), %v244_v0 }
  0x18   : > { %247 = vst [vmem:[%s224_s14 + $0x4] sm:$0xf] %v246_v1 }
  0x19 PF: > { %275 = sbr.rel (!%p1142_p4) target bundleno = 31 (0x1f), region = 65  ;;  %s277_s15 = sand.u32 (%p1142_p4), 1, %s1054_s20  }
  0x1a   : > { %s908_s16 = sshll.u32 (%p1142_p4), %s1062_s22, 4  ;;  %s872_s17 = sshll.u32 (%p1142_p4), %s277_s15, 3 }
  0x1b   : > { %s757_s27 = scalar_lea.vmem (%p1142_p4), %s1295_s2, %s908_s16  ;;  %s279_s30 = scalar_lea.vmem (%p1142_p4), [#allocation3], %s872_s17 }
  0x1c   : > { %v875_v2 = vld [vmem:[%s757_s27 + $0x4] sm:$0xf] (%p1142_p4)  ;;  %v876_v3 = vld [vmem:[%s757_s27 + $0xc] sm:$0xf] (%p1142_p4) }
  0x1d   : > { %301 = vst [vmem:[%s279_s30] sm:$0xf] (%p1142_p4), %v875_v2 }
  0x1e   : > { %303 = vst [vmem:[%s279_s30 + $0x4] sm:$0xf] %v876_v3 }
  0x1f PF: > { %p877_p11 = scmp.ge.s32.totalorder %s1066_s23, 1  ;;  %p336_p12 = scmp.lt.s32.totalorder %s1066_s23, 3 }
  0x21   : > { %p337_p13 = pnand %p877_p11, %p336_p12 }
  0x22   : > { %s1181_s28 = sand.u32 (!%p337_p13), 1, %s1050_s19   ;;  %p398_p0 = scmp.lt.s32.totalorder (!%p337_p13), %s1058_s21, 1 }
  0x23   : > { %340 = sbr.rel (%p337_p13) target bundleno = 1110 (0x456), region = 110  ;;  %s878_s8 = sshll.u32 (!%p337_p13), %s1181_s28, 3 }
  0x24   : > { %s345_s9 = scalar_lea.vmem (!%p337_p13), [#allocation2], %s878_s8  ;;  %s1301_s15 = smov (!%p337_p13), 64  }
  0x25   : > { %s1069_s16 = smov (!%p337_p13), 32   ;;  %s1300_s27 = smov (!%p337_p13), 96  }
  0x26   : > { %s352_s30 = scalar_lea.vmem (!%p337_p13), [#allocation3], %s878_s8  ;;  %s911_s8 = sshll.u32 (!%p337_p13), %s1058_s21, 5 }
  0x27   : > { %s708_s17 = scalar_lea.hbm (!%p337_p13), %s1298_s5, %s911_s8 }
  0x28   : > { %vm428_vm0 = vcmask 261120   ;;  %v909_v4 = vld [vmem:[%s345_s9] sm:$0xff]  ;;  %s1188_s10 = scalar_select %p398_p0, %s1058_s21, 1  ;;  %vm453_vm1 = vcmask 130048   ;;  %v910_v27 = vld [vmem:[%s352_s30] sm:$0xff] }
  0x29   : > { %v433_v5 = vsel %vm428_vm0, %v909_v4, 0  ;;  %552 = vrot.lane.b32.xlu2 %v909_v4, %s1301_s15  ;;  %483 = vmatpush.bf16.msra.mxu1 %v910_v27  ;;  %s880_s9 = sshll.u32 %s1181_s28, 5  ;;  %s693_s30 = scalar_lea.sflag [#allocation5], %s1181_s28 }
  0x2a   : > { %442 = vmatpush.bf16.xpose.msra.mxu0 %v433_v5  ;;  %s1299_s11 = sshll.u32 %s1188_s10, 2  ;;  %s407_s25 = scalar_lea.vmem %s1296_s3, %s1188_s10 }
  0x2b   : > { %s404_s14 = scalar_lea.vmem %s1293_s0, %s1299_s11  ;;  %v421_v9 = vld [vmem:[%s407_s25] sm:$0x1]  ;;  %s1217_s12 = scalar_lea.vmem [#allocation4], %s880_s9 }
  0x2c   : > { %v416_v6 = vld [vmem:[%s404_s14] sm:$0xf]  ;;  %v422_v10 = vmul.f32 -1e+09, %v421_v9  ;;  %s709_s24 = sshll.u32 %s1217_s12, 4  ;;  %s711_s25 = sshll.u32 %s708_s17, 4  ;;  %s710_s24 = int_to_ptr.vmem [resolvable:$true] %s709_s24  ;;  %s712_s25 = int_to_ptr.hbm [resolvable:$true] %s711_s25 }
  0x2d   : > { %v490_v7 = vunpack.c.l.b16 %v416_v6  ;;  %s1002_s9 = sshra.s32 %s712_s25, 4  ;;  %s1008_s21 = scalar_lea.hbm %s1298_s5, 64  ;;  %s1003_s9 = int_to_ptr.hbm [resolvable:$true] %s1002_s9 }
  0x2e   : > { %v450_v11 = vperm.slane %v422_v10, 0  ;;  %s1004_s11 = scalar_lea.hbm %s1003_s9, 32  ;;  %p1009_p4 = scmp.lt.s32.totalorder %s1003_s9, %s1298_s5 }
  0x2f   : > { %v491_v8 = vpack.c.b16 %v490_v7, %v490_v7  ;;  %p1005_p1 = scmp.ne.s32.totalorder %s1003_s9, %s1004_s11  ;;  %p1010_p6 = scmp.lt.s32.totalorder %s1008_s21, %s1004_s11 }
  0x31   : > { %887 = vmatmul.msk.bf16.vlgmr.msra.gmra.mxu0 %vm428_vm0, %v416_v6  ;;  %610 = vrot.lane.b32.xlu2 %v909_v4, %s1069_s16  ;;  %p1006_p2 = pnand %p1005_p1, %p1146_p5  ;;  %p1011_p7 = por %p1010_p6, %p1009_p4 }
  0x33   : > { %p1007_p3 = pneg %p1006_p2 }
  0x35   : > { %p1012_p8 = pnand %p1011_p7, %p1007_p3 }
  0x39   : > { %550 = vrot.lane.b32.xlu2 %v491_v8, %s1301_s15 }
  0x41   : > { %608 = vrot.lane.b32.xlu2 %v491_v8, %s1069_s16 }
  0x83   : > { %v553_v17 = vpop.permute.xlu2 %552 }
  0x84   : > { %v558_v28 = vsel %vm428_vm0, %v553_v17, 0 }
  0x85   : > { %567 = vmatpush.bf16.xpose.msrb.mxu1 %v558_v28 }
  0x8b   : > { %v611_v18 = vpop.permute.xlu2 %610 }
  0x8c   : > { %v616_v23 = vsel %vm428_vm0, %v611_v18, 0 }
  0x8d   : > { %625 = vmatpush.bf16.xpose.msrb.mxu0 %v616_v23 }
  0x93   : > { %v551_v22 = vpop.permute.xlu2 %550 }
  0x9b   : > { %v609_v26 = vpop.permute.xlu2 %608 }
  0x9c   : > { %899 = vmatmul.msk.bf16.vlgmr.msrb.gmra.mxu0 %vm428_vm0, %v609_v26 }
  0xae   : > { %v444_v12 = vpop.f32.mrf.mxu0 }
  0xaf   : > { %v448_v13 = vmul.f32 0.17677669, %v444_v12 }
  0xb1   : > { %v452_v14 = vadd.f32 %v450_v11, %v448_v13 }
  0xb3   : > { %v454_v15 = vsel %vm453_vm1, %v452_v14, -inf }
  0xb4   : > { %455 = vmax.xlane.f32.xlu0 %v454_v15 }
  0xb6   : > { %v446_v16 = vpop.f32.mrf.mxu0 }
  0xc8   : > { %494 = vrot.lane.b32.xlu0 %v909_v4, %s1300_s27 }
 0x119   : > { %v627_v35 = vpop.f32.mrf.mxu0 }
 0x11a   : > { %v631_v36 = vmul.f32 0.17677669, %v627_v35 }
 0x11c   : > { %v632_v37 = vadd.f32 %v631_v36, %v450_v11 }
 0x11e   : > { %v633_v38 = vsel %vm453_vm1, %v632_v37, -inf }
 0x121   : > { %v629_v39 = vpop.f32.mrf.mxu0 }
 0x127   : > { %v456_v19 = vpop.xlane.xlu0 %455 }
 0x128   : > { %v457_v20 = vsub.f32 %v452_v14, %v456_v19 }
 0x12a   : > { %v458_v21 = vmul.f32 1.442695, %v457_v20 }
 0x12c   : > { %972 = vpow2.f32 %v458_v21 }
 0x132   : > { %v973_v24 = vpop.eup %972 }
 0x133   : > { %v460_v25 = vsel %vm453_vm1, %v973_v24, 0.0 }
 0x134   : > { %461 = vadd.xlane.f32.xlu1 %v460_v25 }
 0x13a   : > { %v495_v29 = vpop.permute.xlu0 %494 }
 0x13b   : > { %v500_v30 = vsel %vm428_vm0, %v495_v29, 0 }
 0x13c   : > { %509 = vmatpush.bf16.xpose.msra.mxu2 %v500_v30 }
 0x14d   : > { %492 = vrot.lane.b32.xlu1 %v491_v8, %s1300_s27 }
 0x177   : > { %634 = vmax.xlane.f32.xlu1 %v633_v38 }
 0x1a7   : > { %v462_v31 = vpop.xlane.xlu1 %461 }
 0x1a8   : > { %974 = vrcp.f32 %v462_v31 }
 0x1ae   : > { %v975_v32 = vpop.eup %974 }
 0x1af   : > { %v464_v33 = vmul.f32 %v975_v32, %v973_v24 }
 0x1b1   : > { %465 = vst.msk [vmem:[%s1217_s12] sm:$0xff] %vm453_vm1, %v464_v33  ;;  %v466_v34 = vpack.c.bf16 %v464_v33, %v464_v33 }
 0x1b3   : > { %892 = vmatmul.msk.bf16.vlgmr.msra.gmra.mxu1 %vm453_vm1, %v466_v34 }
 0x1bf   : > { %v493_v40 = vpop.permute.xlu1 %492 }
 0x1c0   : > { %893 = vmatmul.msk.bf16.vlgmr.msra.gmra.mxu2 %vm428_vm0, %v493_v40 }
 0x1c3   : > { %896 = vmatmul.msk.bf16.vlgmr.msrb.gmra.mxu1 %vm428_vm0, %v551_v22 }
 0x1ea   : > { %v635_v55 = vpop.xlane.xlu1 %634 }
 0x1eb   : > { %v636_v59 = vsub.f32 %v632_v37, %v635_v55 }
 0x1ed   : > { %v637_v61 = vmul.f32 1.442695, %v636_v59 }
 0x230   : > { %v1225_v41 = vpop.f32.mrf.mxu1 }
 0x238   : > { %v487_v42 = vpop.f32.mrf.mxu1 }
 0x240   : > { %v569_v43 = vpop.f32.mrf.mxu1 }
 0x241   : > { %v573_v44 = vmul.f32 0.17677669, %v569_v43 }
 0x243   : > { %v511_v45 = vpop.f32.mrf.mxu2  ;;  %v574_v46 = vadd.f32 %v573_v44, %v450_v11 }
 0x244   : > { %v515_v47 = vmul.f32 0.17677669, %v511_v45 }
 0x245   : > { %v575_v48 = vsel %vm453_vm1, %v574_v46, -inf }
 0x246   : > { %576 = vmax.xlane.f32.xlu2 %v575_v48  ;;  %v516_v49 = vadd.f32 %v515_v47, %v450_v11 }
 0x248   : > { %v571_v50 = vpop.f32.mrf.mxu1  ;;  %v517_v51 = vsel %vm453_vm1, %v516_v49, -inf }
 0x249   : > { %518 = vmax.xlane.f32.xlu0 %v517_v51 }
 0x24b   : > { %v513_v52 = vpop.f32.mrf.mxu2 }
 0x25e   : > { %531 = vrot.lane.b32.xlu2 %v910_v27, %s1300_s27 }
 0x2b9   : > { %v577_v53 = vpop.xlane.xlu2 %576 }
 0x2ba   : > { %v578_v54 = vsub.f32 %v574_v46, %v577_v53 }
 0x2bc   : > { %v579_v56 = vmul.f32 1.442695, %v578_v54  ;;  %v519_v57 = vpop.xlane.xlu0 %518 }
 0x2bd   : > { %v520_v58 = vsub.f32 %v516_v49, %v519_v57 }
 0x2be   : > { %976 = vpow2.f32 %v579_v56 }
 0x2bf   : > { %v521_v60 = vmul.f32 1.442695, %v520_v58 }
 0x2c1   : > { %978 = vpow2.f32 %v521_v60  ;;  %v532_v4 = vpop.permute.xlu2 %531 }
 0x2c2   : > { %980 = vpow2.f32 %v637_v61  ;;  %544 = vmatpush.bf16.msra.mxu3 %v532_v4 }
 0x2c4   : > { %v977_v62 = vpop.eup %976 }
 0x2c5   : > { %v581_v63 = vsel %vm453_vm1, %v977_v62, 0.0 }
 0x2c6   : > { %582 = vadd.xlane.f32.xlu1 %v581_v63 }
 0x2c7   : > { %v979_v0 = vpop.eup %978 }
 0x2c8   : > { %v523_v1 = vsel %vm453_vm1, %v979_v0, 0.0  ;;  %v981_v2 = vpop.eup %980 }
 0x2c9   : > { %524 = vadd.xlane.f32.xlu0 %v523_v1  ;;  %v639_v3 = vsel %vm453_vm1, %v981_v2, 0.0 }
 0x2d1   : > { %640 = vadd.xlane.f32.xlu0 %v639_v3 }
 0x2df   : > { %589 = vrot.lane.b32.xlu1 %v910_v27, %s1301_s15 }
 0x2e5   : > { %647 = vrot.lane.b32.xlu0 %v910_v27, %s1069_s16 }
 0x339   : > { %v583_v5 = vpop.xlane.xlu1 %582 }
 0x33a   : > { %982 = vrcp.f32 %v583_v5 }
 0x33c   : > { %v525_v6 = vpop.xlane.xlu0 %524 }
 0x33d   : > { %984 = vrcp.f32 %v525_v6 }
 0x340   : > { %v983_v7 = vpop.eup %982 }
 0x341   : > { %v585_v8 = vmul.f32 %v983_v7, %v977_v62 }
 0x343   : > { %v985_v9 = vpop.eup %984  ;;  %897 = vst.msk [vmem:[%s1217_s12 + $0x10] sm:$0xff] %vm453_vm1, %v585_v8  ;;  %v588_v16 = vpack.c.bf16 %v585_v8, %v585_v8 }
 0x344   : > { %v641_v10 = vpop.xlane.xlu0 %640  ;;  %v527_v11 = vmul.f32 %v985_v9, %v979_v0 }
 0x345   : > { %986 = vrcp.f32 %v641_v10 }
 0x346   : > { %894 = vst.msk [vmem:[%s1217_s12 + $0x8] sm:$0xff] %vm453_vm1, %v527_v11  ;;  %v530_v12 = vpack.c.bf16 %v527_v11, %v527_v11 }
 0x348   : > { %895 = vmatmul.msk.bf16.vlgmr.msra.gmra.mxu3 %vm453_vm1, %v530_v12 }
 0x34b   : > { %v987_v13 = vpop.eup %986 }
 0x34c   : > { %v643_v14 = vmul.f32 %v987_v13, %v981_v2 }
 0x34e   : > { %900 = vst.msk [vmem:[%s1217_s12 + $0x18] sm:$0xff] %vm453_vm1, %v643_v14  ;;  %v646_v18 = vpack.c.bf16 %v643_v14, %v643_v14 }
 0x351   : > { %v590_v15 = vpop.permute.xlu1 %589 }
 0x352   : > { %602 = vmatpush.bf16.msrb.mxu3 %v590_v15 }
 0x357   : > { %v648_v17 = vpop.permute.xlu0 %647 }
 0x358   : > { %898 = vmatmul.msk.bf16.vlgmr.msrb.gmra.mxu3 %vm453_vm1, %v588_v16  ;;  %660 = vmatpush.bf16.msrb.mxu2 %v648_v17 }
 0x35b   : > { %901 = vmatmul.msk.bf16.vlgmr.msrb.gmra.mxu2 %vm453_vm1, %v646_v18 }
 0x3cb   : > { %v546_v19 = vpop.f32.mrf.mxu3 }
 0x3cc   : > { %667 = vrot.lane.b32.xlu2 %v546_v19, %s1069_s16 }
 0x3d3   : > { %v548_v20 = vpop.f32.mrf.mxu3 }
 0x3d4   : > { %1015 = shalt.err (!%p1012_p8)
}
 0x3d5   : > { %s1071_s28 = smov 128   ;;  %s1072_s12 = smov 8   ;;  %vm679_vm2 = vcmask 523264   ;;  %vm681_vm3 = vcmask 785408  }
 0x3d6   : > { %912 = dma.vmem_to_hbm [thread:$0]  (%p1146_p5), %s710_s24, 512, %s712_s25, %s693_s30, %s1071_s28, %s1071_s28, %s1072_s12  }
 0x3d7   : > { %s1305_s8 = smov 64   ;;  %s1306_s27 = smov 96  }
 0x3d8   : > { %s1307_s11 = sshll.u32 %s1188_s10, 2 }
 0x3d9   : > { %s414_s14 = scalar_lea.vmem %s1297_s4, %s1307_s11 }
 0x3db   : > { %v604_v21 = vpop.f32.mrf.mxu3 }
 0x3dc   : > { %671 = vrot.lane.b32.xlu2 %v604_v21, %s1305_s8 }
 0x3de   : > { %v662_v22 = vpop.f32.mrf.mxu2 }
 0x3df   : > { %675 = vrot.lane.b32.xlu0 %v662_v22, %s1306_s27 }
 0x3e3   : > { %v606_v23 = vpop.f32.mrf.mxu3 }
 0x3e6   : > { %v664_v24 = vpop.f32.mrf.mxu2 }
 0x426   : > { %v668_v25 = vpop.permute.xlu2 %667 }
 0x427   : > { %v678_v27 = vsel %vm428_vm0, %v1225_v41, %v668_v25 }
 0x436   : > { %v672_v26 = vpop.permute.xlu2 %671 }
 0x437   : > { %v680_v28 = vsel %vm679_vm2, %v678_v27, %v672_v26 }
 0x451   : > { %v676_v29 = vpop.permute.xlu0 %675 }
 0x452   : > { %v682_v30 = vsel %vm681_vm3, %v680_v28, %v676_v29 }
 0x453   : > { %v683_v31 = vpack.c.bf16 %v682_v30, %v682_v30 }
 0x455   : > { %684 = vst [vmem:[%s414_s14] sm:$0xf] %v683_v31 }
 0x456 PF: > { %s736_s17 = sand.u32 1, %s1046_s18   ;;  %p915_p5 = pnand %p868_p10, %p1157_p9 }
 0x457   : > { %s737_s24 = scalar_lea.sflag [#allocation5], %s736_s17 }
 0x458   : > { %p916_p11 = pneg %p915_p5 }
 0x45a   : > { %1041 = dma.done.wait (%p916_p11), %s737_s24, 512  }
 0x45b   : > { %1043 = vsyncadd (%p916_p11), %s737_s24, 4294966784  ;;  %s19_s23 = sadd.s32 1, %s1066_s23   ;;  %s1308_s18 = smov %s1050_s19 }
 0x45c   : > { %p16_p12 = scmp.ge.s32.totalorder %s19_s23, 4   ;;  %s1309_s19 = smov %s1054_s20 }
 0x45d   : > { %s1310_s20 = smov %s1155_s6  ;;  %s1311_s21 = smov %s1062_s22 }
 0x45e   : > { %s1312_s22 = smov %s1314_s26  ;;  %18 = sbr.rel (!%p16_p12) target bundleno = 4 (0x4), region = 187 }
 0x463   :  { %743 = vsyncpa [#allocation5], 1 }
 0x464   :  { %745 = vsyncpa [#allocation5 + $0x1], 1 }

// kernel: decoder_layer.15
= control target key start
LH: loop header
LB: loop body
LE: loop exit
PB: predicated region body
PF: predicated region fallthrough
CT: control target
= control target key end

     0   :  { %12 = vsyncpa [#allocation4], 0  ;;  %s814_s0 = inlined_call_operand.vmem [shape: bf16[16,128], index: 0, kind: input, shape index: {}]   ;;  %s815_s1 = inlined_call_operand.hbm [shape: bf16[128,256], index: 1, kind: input, shape index: {}]   ;;  %s816_s2 = inlined_call_operand.vmem [shape: f32[1,256], index: 2, kind: input, shape index: {}]   ;;  %s817_s3 = inlined_call_operand.hbm [shape: bf16[256,128], index: 3, kind: input, shape index: {}]   ;;  %s818_s4 = inlined_call_operand.vmem [shape: f32[1,128], index: 4, kind: input, shape index: {}]   ;;  %s819_s5 = inlined_call_operand.vmem [shape: f32[1,128], index: 5, kind: input, shape index: {}]   ;;  %s820_s6 = inlined_call_operand.vmem [shape: f32[1,128], index: 6, kind: input, shape index: {}]   ;;  %s821_s7 = inlined_call_operand.hbm [shape: f32[16,128], index: 7, kind: output, shape index: {}]  }
   0x1   :  { %13 = vsyncpa [#allocation7], 0 }
   0x2   :  { %14 = vsyncpa [#allocation5], 0  ;;  %s21_s26 = sshll.u32 %s815_s1, 4  ;;  %s733_s27 = smov [#allocation3]   ;;  %s22_s26 = int_to_ptr.hbm [resolvable:$true] %s21_s26 }
   0x3   :  { %s23_s28 = sshll.u32 %s733_s27, 4  ;;  %s36_s8 = sshll.u32 %s817_s3, 4  ;;  %s24_s28 = int_to_ptr.vmem [resolvable:$true] %s23_s28  ;;  %s37_s8 = int_to_ptr.hbm [resolvable:$true] %s36_s8 }
   0x4   :  { %s734_s9 = smov 128   ;;  %s735_s10 = smov 8  }
   0x5   :  { %29 = dma.hbm_to_vmem [thread:$0]  %s22_s26, 2048, %s24_s28, [#allocation4], %s734_s9, %s734_s9, %s735_s10  }
   0x6   :  { %s736_s11 = smov [#allocation6]   ;;  %s737_s13 = smov 64  }
   0x7   :  { %s38_s12 = sshll.u32 %s736_s11, 4  ;;  %s738_s1 = smov 4   ;;  %s39_s12 = int_to_ptr.vmem [resolvable:$true] %s38_s12 }
   0x8   :  { %44 = dma.hbm_to_vmem [thread:$0]  %s37_s8, 2048, %s39_s12, [#allocation7], %s737_s13, %s737_s13, %s738_s1  }
   0x9   :  { %727 = dma.done.wait [#allocation4], 2048  }
   0xa   :  { %728 = vsyncadd [#allocation4], 4294965248 }
   0xb   :  { %729 = dma.done.wait [#allocation7], 2048  }
   0xc   :  { %730 = vsyncadd [#allocation7], 4294965248  ;;  %v531_v0 = vld [vmem:[#allocation3 + $0x70] sm:$0xf]  ;;  %v617_v1 = vld [vmem:[#allocation3 + $0x74] sm:$0xf0] }
   0xd   :  { %v616_v2 = vld [vmem:[#allocation3 + $0x74] sm:$0xf]  ;;  %v532_v3 = vor.u32 %v617_v1, %v531_v0  ;;  %v533_v4 = vld [vmem:[#allocation3 + $0x78] sm:$0xf0]  ;;  %v523_v5 = vld [vmem:[#allocation3 + $0x60] sm:$0xf] }
   0xe   :  { %v615_v6 = vld [vmem:[#allocation3 + $0x64] sm:$0xf0]  ;;  %v536_v7 = vor.u32 %v616_v2, %v533_v4  ;;  %v614_v8 = vld [vmem:[#allocation3 + $0x64] sm:$0xf]  ;;  %v525_v9 = vld [vmem:[#allocation3 + $0x68] sm:$0xf0] }
   0xf   :  { %175 = vmatpush.bf16.msra.mxu0 %v532_v3  ;;  %v524_v10 = vor.u32 %v615_v6, %v523_v5  ;;  %v528_v11 = vor.u32 %v614_v8, %v525_v9  ;;  %v515_v12 = vld [vmem:[#allocation3 + $0x50] sm:$0xf]  ;;  %v613_v13 = vld [vmem:[#allocation3 + $0x54] sm:$0xf0]  ;;  %v612_v14 = vld [vmem:[#allocation3 + $0x54] sm:$0xf] }
  0x10   :  { %189 = vmatpush.bf16.msra.mxu1 %v536_v7  ;;  %v517_v15 = vld [vmem:[#allocation3 + $0x58] sm:$0xf0]  ;;  %v516_v16 = vor.u32 %v613_v13, %v515_v12  ;;  %v507_v18 = vld [vmem:[#allocation3 + $0x40] sm:$0xf]  ;;  %v611_v19 = vld [vmem:[#allocation3 + $0x44] sm:$0xf0] }
  0x11   :  { %v520_v17 = vor.u32 %v612_v14, %v517_v15  ;;  %v610_v20 = vld [vmem:[#allocation3 + $0x44] sm:$0xf]  ;;  %v509_v21 = vld [vmem:[#allocation3 + $0x48] sm:$0xf0]  ;;  %v508_v22 = vor.u32 %v611_v19, %v507_v18  ;;  %v625_v23 = vld [vmem:[#allocation6 + $0x38] sm:$0xff]  ;;  %s740_s22 = smov [#allocation8]  }
  0x12   :  { %v633_v24 = vld [vmem:[#allocation6 + $0x78] sm:$0xff]  ;;  %v512_v25 = vor.u32 %v610_v20, %v509_v21  ;;  %v499_v26 = vld [vmem:[#allocation3 + $0x30] sm:$0xf]  ;;  %v608_v28 = vld [vmem:[#allocation3 + $0x34] sm:$0xf]  ;;  %339 = vmatpush.bf16.msra.mxu2 %v625_v23  ;;  %s455_s25 = sshll.u32 %s821_s7, 4  ;;  %s456_s25 = int_to_ptr.hbm [resolvable:$true] %s455_s25 }
  0x13   :  { %176 = vmatpush.bf16.msra.mxu0 %v524_v10  ;;  %v609_v27 = vld [vmem:[#allocation3 + $0x34] sm:$0xf0]  ;;  %v501_v29 = vld [vmem:[#allocation3 + $0x38] sm:$0xf0]  ;;  %353 = vmatpush.bf16.msra.mxu3 %v633_v24  ;;  %v624_v30 = vld [vmem:[#allocation6 + $0x30] sm:$0xff] }
  0x14   :  { %190 = vmatpush.bf16.msra.mxu1 %v528_v11  ;;  %v632_v31 = vld [vmem:[#allocation6 + $0x70] sm:$0xff]  ;;  %v500_v32 = vor.u32 %v609_v27, %v499_v26  ;;  %v504_v33 = vor.u32 %v608_v28, %v501_v29  ;;  %v491_v34 = vld [vmem:[#allocation3 + $0x20] sm:$0xf]  ;;  %v607_v35 = vld [vmem:[#allocation3 + $0x24] sm:$0xf0] }
  0x15   :  { %v606_v36 = vld [vmem:[#allocation3 + $0x24] sm:$0xf]  ;;  %v493_v37 = vld [vmem:[#allocation3 + $0x28] sm:$0xf0]  ;;  %v492_v40 = vor.u32 %v607_v35, %v491_v34  ;;  %v483_v42 = vld [vmem:[#allocation3 + $0x10] sm:$0xf] }
  0x16   :  { %340 = vmatpush.bf16.msra.mxu2 %v624_v30  ;;  %v623_v38 = vld [vmem:[#allocation6 + $0x28] sm:$0xff]  ;;  %v496_v41 = vor.u32 %v606_v36, %v493_v37  ;;  %v605_v43 = vld [vmem:[#allocation3 + $0x14] sm:$0xf0]  ;;  %v604_v44 = vld [vmem:[#allocation3 + $0x14] sm:$0xf] }
  0x17   :  { %177 = vmatpush.bf16.msra.mxu0 %v516_v16  ;;  %354 = vmatpush.bf16.msra.mxu3 %v632_v31  ;;  %v631_v39 = vld [vmem:[#allocation6 + $0x68] sm:$0xff]  ;;  %v485_v45 = vld [vmem:[#allocation3 + $0x18] sm:$0xf0]  ;;  %v622_v46 = vld [vmem:[#allocation6 + $0x20] sm:$0xff]  ;;  %v484_v48 = vor.u32 %v605_v43, %v483_v42 }
  0x18   :  { %191 = vmatpush.bf16.msra.mxu1 %v520_v17  ;;  %v630_v47 = vld [vmem:[#allocation6 + $0x60] sm:$0xff]  ;;  %v488_v49 = vor.u32 %v604_v44, %v485_v45  ;;  %v603_v51 = vld [vmem:[#allocation3 + $0x4] sm:$0xf0]  ;;  %v477_v53 = vld [vmem:[#allocation3 + $0x8] sm:$0xf0] }
  0x19   :  { %v475_v50 = vld [vmem:[#allocation3] sm:$0xf]  ;;  %v602_v52 = vld [vmem:[#allocation3 + $0x4] sm:$0xf]  ;;  %v621_v57 = vld [vmem:[#allocation6 + $0x18] sm:$0xff] }
  0x1a   :  { %341 = vmatpush.bf16.msra.mxu2 %v623_v38  ;;  %v476_v54 = vor.u32 %v603_v51, %v475_v50  ;;  %v480_v55 = vor.u32 %v602_v52, %v477_v53  ;;  %v601_v56 = vld [vmem:[%s814_s0] sm:$0xff]  ;;  %v629_v58 = vld [vmem:[#allocation6 + $0x58] sm:$0xff]  ;;  %v620_v59 = vld [vmem:[#allocation6 + $0x10] sm:$0xff] }
  0x1b   :  { %178 = vmatpush.bf16.msra.mxu0 %v508_v22  ;;  %355 = vmatpush.bf16.msra.mxu3 %v631_v39  ;;  %v628_v60 = vld [vmem:[#allocation6 + $0x50] sm:$0xff]  ;;  %v619_v61 = vld [vmem:[#allocation6 + $0x8] sm:$0xff]  ;;  %v618_v63 = vld [vmem:[#allocation6] sm:$0xff] }
  0x1c   :  { %192 = vmatpush.bf16.msra.mxu1 %v512_v25  ;;  %v627_v62 = vld [vmem:[#allocation6 + $0x48] sm:$0xff]  ;;  %v626_v0 = vld [vmem:[#allocation6 + $0x40] sm:$0xff] }
  0x1d   :  { %v83_v1 = vld [vmem:[%s816_s2] sm:$0x3] }
  0x1e   :  { %342 = vmatpush.bf16.msra.mxu2 %v622_v46  ;;  %v85_v4 = vperm.slane %v83_v1, 0  ;;  %v86_v5 = vperm.slane %v83_v1, 1  ;;  %v635_v18 = vld [vmem:[%s814_s0] sm:$0xff]  }
  0x1f   :  { %179 = vmatpush.bf16.msra.mxu0 %v500_v32  ;;  %356 = vmatpush.bf16.msra.mxu3 %v630_v47  ;;  %v646_v20 = vld [vmem:[%s818_s4] ss:$0 sm:$0xff]  ;;  %v636_v23 = vunpack.c.l.bf16 %v635_v18  ;;  %v637_v29 = vunpack.c.h.bf16 %v635_v18  ;;  %v739_v32 = vmov 128.0  }
  0x20   :  { %193 = vmatpush.bf16.msra.mxu1 %v504_v33  ;;  %649 = vrcp.f32 %v739_v32  ;;  %v648_v1 = vld [vmem:[%s820_s6] ss:$0 sm:$0xff] }
  0x22   :  { %343 = vmatpush.bf16.msra.mxu2 %v621_v57 }
  0x23   :  { %180 = vmatpush.bf16.msra.mxu0 %v492_v40  ;;  %357 = vmatpush.bf16.msra.mxu3 %v629_v58 }
  0x24   :  { %194 = vmatpush.bf16.msra.mxu1 %v496_v41 }
  0x26   :  { %344 = vmatpush.bf16.msra.mxu2 %v620_v59  ;;  %v650_v33 = vpop.eup %649 }
  0x27   :  { %181 = vmatpush.bf16.msra.mxu0 %v484_v48  ;;  %358 = vmatpush.bf16.msra.mxu3 %v628_v60  ;;  %v393_v34 = vmul.f32 128.0, %v650_v33  ;;  %vm397_vm0 = vweird.f32 %v650_v33 }
  0x28   :  { %195 = vmatpush.bf16.msra.mxu1 %v488_v49 }
  0x29   :  { %v394_v35 = vsub.f32 1.0, %v393_v34 }
  0x2a   :  { %345 = vmatpush.bf16.msra.mxu2 %v619_v61  ;;  %v647_v61 = vld [vmem:[%s819_s5] ss:$0 sm:$0xff]  ;;  %s453_s5 = sshll.u32 %s740_s22, 4  ;;  %s454_s5 = int_to_ptr.vmem [resolvable:$true] %s453_s5 }
  0x2b   :  { %182 = vmatpush.bf16.msra.mxu0 %v476_v54  ;;  %359 = vmatpush.bf16.msra.mxu3 %v627_v62  ;;  %v395_v36 = vmul.f32 %v650_v33, %v394_v35 }
  0x2c   :  { %196 = vmatpush.bf16.msra.mxu1 %v480_v55 }
  0x2d   :  { %v396_v37 = vadd.f32 %v650_v33, %v395_v36 }
  0x2e   :  { %183 = vmatmul.bf16.vlgmr.msra.gmra.mxu0 %v601_v56  ;;  %346 = vmatpush.bf16.msra.mxu2 %v618_v63 }
  0x2f   :  { %197 = vmatmul.bf16.vlgmr.msra.gmra.mxu1 %v601_v56  ;;  %360 = vmatpush.bf16.msra.mxu3 %v626_v0  ;;  %v398_v38 = vsel %vm397_vm0, %v650_v33, %v396_v37 }
  0xab   :  { %v184_v2 = vpop.f32.mrf.mxu0 }
  0xac   :  { %v198_v3 = vpop.f32.mrf.mxu1  ;;  %v185_v6 = vadd.f32 %v184_v2, %v85_v4 }
  0xad   :  { %v199_v7 = vadd.f32 %v198_v3, %v86_v5 }
  0xae   :  { %v203_v12 = vmax.f32 %v185_v6, 0.0 }
  0xaf   :  { %v204_v14 = vmax.f32 %v199_v7, 0.0 }
  0xb3   :  { %v186_v8 = vpop.f32.mrf.mxu0 }
  0xb4   :  { %v187_v9 = vadd.f32 %v186_v8, %v85_v4  ;;  %v200_v10 = vpop.f32.mrf.mxu1 }
  0xb5   :  { %v201_v11 = vadd.f32 %v200_v10, %v86_v5 }
  0xb6   :  { %v205_v13 = vmax.f32 %v187_v9, 0.0 }
  0xb7   :  { %v206_v15 = vmax.f32 %v201_v11, 0.0 }
  0xb8   :  { %v207_v16 = vpack.c.bf16 %v205_v13, %v203_v12 }
  0xb9   :  { %v208_v17 = vpack.c.bf16 %v206_v15, %v204_v14 }
  0xba   :  { %347 = vmatmul.bf16.vlgmr.msra.gmra.mxu2 %v207_v16 }
  0xbb   :  { %361 = vmatmul.bf16.vlgmr.msra.gmra.mxu3 %v208_v17 }
 0x13d   :  { %v348_v19 = vpop.f32.mrf.mxu2 }
 0x13e   :  { %v362_v21 = vpop.f32.mrf.mxu3 }
 0x13f   :  { %v363_v22 = vadd.f32 %v362_v21, %v348_v19 }
 0x141   :  { %v380_v24 = vadd.f32 %v646_v20, %v363_v22 }
 0x143   :  { %v386_v25 = vadd.f32 %v636_v23, %v380_v24 }
 0x145   :  { %388 = vadd.xlane.f32.xlu0 %v386_v25  ;;  %v350_v26 = vpop.f32.mrf.mxu2 }
 0x146   :  { %v364_v27 = vpop.f32.mrf.mxu3 }
 0x147   :  { %v365_v28 = vadd.f32 %v364_v27, %v350_v26 }
 0x149   :  { %v381_v30 = vadd.f32 %v646_v20, %v365_v28 }
 0x14b   :  { %v387_v31 = vadd.f32 %v637_v29, %v381_v30 }
 0x14d   :  { %390 = vadd.xlane.f32.xlu0 %v387_v31 }
 0x1b8   :  { %v389_v39 = vpop.xlane.xlu0 %388 }
 0x1b9   :  { %v399_v40 = vmul.f32 %v398_v38, %v389_v39 }
 0x1bb   :  { %v401_v41 = vsub.f32 %v386_v25, %v399_v40 }
 0x1bd   :  { %v403_v42 = vmul.f32 %v401_v41, %v401_v41 }
 0x1bf   :  { %405 = vadd.xlane.f32.xlu1 %v403_v42 }
 0x1c0   :  { %v391_v43 = vpop.xlane.xlu0 %390 }
 0x1c1   :  { %v400_v44 = vmul.f32 %v398_v38, %v391_v43 }
 0x1c3   :  { %v402_v45 = vsub.f32 %v387_v31, %v400_v44 }
 0x1c5   :  { %v404_v46 = vmul.f32 %v402_v45, %v402_v45 }
 0x1c7   :  { %407 = vadd.xlane.f32.xlu1 %v404_v46 }
 0x232   :  { %v406_v47 = vpop.xlane.xlu1 %405 }
 0x233   :  { %v409_v48 = vmul.f32 %v406_v47, %v398_v38 }
 0x235   :  { %v411_v49 = vadd.f32 1e-06, %v409_v48 }
 0x237   :  { %651 = vrsqrt.f32 %v411_v49  ;;  %vm419_vm2 = vweird.f32 %v411_v49 }
 0x23a   :  { %v408_v50 = vpop.xlane.xlu1 %407 }
 0x23b   :  { %v410_v51 = vmul.f32 %v408_v50, %v398_v38 }
 0x23d   :  { %v652_v52 = vpop.eup %651  ;;  %v412_v53 = vadd.f32 1e-06, %v410_v51 }
 0x23e   :  { %v414_v54 = vmul.f32 %v652_v52, %v411_v49  ;;  %vm420_vm1 = vweird.f32 %v652_v52 }
 0x23f   :  { %653 = vrsqrt.f32 %v412_v53  ;;  %vm421_vm3 = vmor %vm419_vm2, %vm420_vm1  ;;  %vm429_vm5 = vweird.f32 %v412_v53 }
 0x240   :  { %v415_v55 = vmul.f32 %v652_v52, %v414_v54 }
 0x242   :  { %v416_v56 = vmul.f32 0.5, %v415_v55 }
 0x244   :  { %v417_v57 = vsub.f32 1.5, %v416_v56 }
 0x245   :  { %v654_v58 = vpop.eup %653 }
 0x246   :  { %v418_v59 = vmul.f32 %v652_v52, %v417_v57  ;;  %v424_v60 = vmul.f32 %v654_v58, %v412_v53  ;;  %vm430_vm4 = vweird.f32 %v654_v58 }
 0x247   :  { %vm431_vm6 = vmor %vm429_vm5, %vm430_vm4 }
 0x248   :  { %v422_v62 = vsel %vm421_vm3, %v652_v52, %v418_v59  ;;  %v425_v63 = vmul.f32 %v654_v58, %v424_v60 }
 0x249   :  { %v433_v0 = vmul.f32 %v422_v62, %v401_v41 }
 0x24a   :  { %v426_v2 = vmul.f32 0.5, %v425_v63 }
 0x24b   :  { %v439_v3 = vmul.f32 %v647_v61, %v433_v0 }
 0x24c   :  { %v427_v4 = vsub.f32 1.5, %v426_v2 }
 0x24d   :  { %v445_v5 = vadd.f32 %v648_v1, %v439_v3 }
 0x24e   :  { %v428_v6 = vmul.f32 %v654_v58, %v427_v4 }
 0x24f   :  { %447 = vst [vmem:[#allocation8] sm:$0xff] %v445_v5 }
 0x250   :  { %v432_v7 = vsel %vm431_vm6, %v654_v58, %v428_v6 }
 0x251   :  { %v434_v8 = vmul.f32 %v432_v7, %v402_v45 }
 0x253   :  { %v440_v9 = vmul.f32 %v647_v61, %v434_v8 }
 0x255   :  { %v446_v10 = vadd.f32 %v648_v1, %v440_v9 }
 0x257   :  { %448 = vst [vmem:[#allocation8 + $0x8] sm:$0xff] %v446_v10 }
 0x258   :  { %461 = dma.vmem_to_hbm [thread:$0]  %s454_s5, 256, %s456_s25, [#allocation5], %s734_s9, %s734_s9, %s735_s10  }
 0x259   :  { %731 = dma.done.wait [#allocation5], 256  }
 0x25a   :  { %732 = vsyncadd [#allocation5], 4294967040 }
 0x25b   :  { %466 = vsyncpa [#allocation4], 1 }
 0x25c   :  { %467 = vsyncpa [#allocation7], 1 }
 0x25d   :  { %468 = vsyncpa [#allocation5], 1 }

</bundles_post_ra>
